<compile_context>
chip_gen: v5e
topology: v5e:2x2
jax: 0.10.0
libtpu: 0.0.40
codegen_flags: <defaults>
</compile_context>

<pallas_src>
import functools

import jax
import jax.numpy as jnp
from jax.experimental import pallas as pl
from jax.experimental.pallas import tpu as pltpu

NUM_GROUPS = 32
EPS = 1e-6


def _round_up(v, m):
    return -(-v // m) * m


def _vmem_limit_bytes():
    """Scoped VMEM request: 64 MiB on 128-MiB chips (v5e/v6e), 32 MiB on v7x."""
    try:
        phys = pltpu.get_tpu_info().vmem_capacity_bytes
    except Exception:
        phys = None
    if not phys or phys <= 0:
        phys = 64 * 1024 * 1024  # conservative default (v7x physical VMEM)
    return int(min(phys // 2, 64 * 1024 * 1024))


def _block_vmem_bytes(bg, cg, hw, itemsize):
    """Estimated VMEM footprint of one grid step for a (bg, cg, hw) block."""
    sub = max(8, 8 * 4 // itemsize)        # sublane tile: 8 f32 / 16 bf16 / 32 int8
    io_block = bg * _round_up(cg, sub) * _round_up(hw, 128) * itemsize
    f32_block = bg * _round_up(cg, 8) * _round_up(hw, 128) * 4
    # in + out double-buffered, plus ~2 f32-sized in-kernel temporaries
    # (upcast x / centred copy); gamma/beta tiles are negligible.
    return 4 * io_block + 2 * f32_block


def _choose_group_block(G, N, cg, hw, itemsize, vmem_limit):
    """Groups per grid step.  Bg divides G so a block never straddles a batch."""
    budget = int(vmem_limit * 0.75)
    cands = sorted((d for d in range(1, G + 1) if G % d == 0), reverse=True)
    fitting = [d for d in cands
               if _block_vmem_bytes(d, cg, hw, itemsize) <= budget]
    if not fitting:
        # TODO(synk): chunk the group along HW (two-phase stats/normalize grid)
        # for very large Cg*HW instead of one oversized single-group block.
        return 1
    # Mild parallelism floor: >=2 total grid cells so a 2-TensorCore chip
    # (v7x) can shard the grid; single-TC chips lose at most one grid step.
    par = [d for d in fitting if (G // d) * N >= 2]
    return max(par or fitting)


def _group_norm_kernel(x_ref, gamma_ref, beta_ref, o_ref, *, inv_count, eps):
    # x_ref/o_ref: (Bg, Cg, HW); gamma_ref/beta_ref: (Bg, Cg, 1) float32.
    x = x_ref[...].astype(jnp.float32)

    # Two-pass statistics (block is VMEM-resident -> no extra HBM traffic).
    s = jnp.sum(x, axis=2, keepdims=True)                    # (Bg, Cg, 1) lane reduce
    mean = jnp.sum(s, axis=1, keepdims=True) * inv_count     # (Bg, 1, 1) sublane reduce
    d = x - mean
    v = jnp.sum(d * d, axis=2, keepdims=True)
    var = jnp.sum(v, axis=1, keepdims=True) * inv_count
    inv_std = jax.lax.rsqrt(var + eps)

    scale = gamma_ref[...] * inv_std                          # (Bg, Cg, 1)
    o_ref[...] = (d * scale + beta_ref[...]).astype(o_ref.dtype)


def group_norm(x, gamma, beta):
    """x: (N, C, H, W); gamma, beta: (C,).  Matches nn.GroupNorm(32, C, eps=1e-6)."""
    N, C, H, W = x.shape
    G = NUM_GROUPS
    assert C % G == 0, "channels must be divisible by num_groups=32"
    Cg = C // G
    HW = H * W
    L = Cg * HW
    itemsize = jnp.dtype(x.dtype).itemsize

    # Free (contiguous) views only — no pad / broadcast / slice through HBM.
    x3 = x.reshape(N * G, Cg, HW)
    gamma3 = gamma.astype(jnp.float32).reshape(G, Cg, 1)   # affine params stay f32
    beta3 = beta.astype(jnp.float32).reshape(G, Cg, 1)

    vmem_limit = _vmem_limit_bytes()
    Bg = _choose_group_block(G, N, Cg, HW, itemsize, vmem_limit)
    need = _block_vmem_bytes(Bg, Cg, HW, itemsize)
    if need > vmem_limit:
        # Oversized single-group block (huge Cg*HW): request more scoped VMEM.
        vmem_limit = int(min(need + (4 << 20), 128 * 1024 * 1024))

    gpb = G // Bg                 # group-blocks per batch element
    grid = (gpb, N)               # batch innermost -> gamma/beta DMA'd gpb times total

    kernel = functools.partial(_group_norm_kernel, inv_count=1.0 / L, eps=EPS)

    x_index = lambda gb, n: (n * gpb + gb, 0, 0)
    p_index = lambda gb, n: (gb, 0, 0)

    out = pl.pallas_call(
        kernel,
        out_shape=jax.ShapeDtypeStruct((N * G, Cg, HW), x.dtype),
        grid_spec=pltpu.PrefetchScalarGridSpec(
            num_scalar_prefetch=0,
            grid=grid,
            in_specs=[
                pl.BlockSpec((Bg, Cg, HW), x_index),
                pl.BlockSpec((Bg, Cg, 1), p_index),
                pl.BlockSpec((Bg, Cg, 1), p_index),
            ],
            out_specs=pl.BlockSpec((Bg, Cg, HW), x_index),
        ),
        compiler_params=pltpu.CompilerParams(
            # NOTE(v7x): if profiling shows only one TensorCore busy, switch the
            # leading axis to pltpu.CORE_PARALLEL; generic "parallel" is a no-op
            # on single-TC v5e/v6e either way.
            dimension_semantics=("parallel", "parallel"),
            vmem_limit_bytes=vmem_limit,
        ),
        cost_estimate=pl.CostEstimate(
            flops=10 * N * C * HW,
            transcendentals=N * G,
            bytes_accessed=2 * N * C * HW * itemsize + 2 * C * 4,
        ),
    )(x3, gamma3, beta3)

    return out.reshape(N, C, H, W)


def _reference_group_norm(x, gamma, beta):
    N, C, H, W = x.shape
    G = NUM_GROUPS
    xg = x.reshape(N, G, -1)
    mean = jnp.mean(xg, axis=-1, keepdims=True)
    var = jnp.mean((xg - mean) ** 2, axis=-1, keepdims=True)
    xn = ((xg - mean) / jnp.sqrt(var + EPS)).reshape(N, C, H, W)
    return xn * gamma[None, :, None, None] + beta[None, :, None, None]


if __name__ == "__main__":
    key = jax.random.PRNGKey(0)
    kx, kg, kb = jax.random.split(key, 3)

    # channels must be a multiple of num_groups=32
    N, C, H, W = 2, 64, 16, 16
    x = jax.random.normal(kx, (N, C, H, W), dtype=jnp.float32)

    # nn.GroupNorm(affine=True) initializes weight=1, bias=0; perturb
    # deterministically so the affine path is actually exercised.
    gamma = jnp.ones((C,), jnp.float32) + 0.1 * jax.random.normal(kg, (C,), jnp.float32)
    beta = 0.1 * jax.random.normal(kb, (C,), jnp.float32)

    out = group_norm(x, gamma, beta)
    jax.block_until_ready(out)

    ref = _reference_group_norm(x, gamma, beta)
    assert out.shape == (N, C, H, W)
    assert jnp.allclose(out, ref, atol=5e-5, rtol=5e-5), "mismatch vs reference"

    print("KERNEL_OK")
</pallas_src>

<mosaic_0001>
module attributes {stable_mosaic.version = 11 : i64} {
  func.func @_group_norm_kernel(%arg0: i32, %arg1: i32, %arg2: memref<32x2x256xf32, #tpu.memory_space<vmem>>, %arg3: memref<32x2x1xf32, #tpu.memory_space<vmem>>, %arg4: memref<32x2x1xf32, #tpu.memory_space<vmem>>, %arg5: memref<32x2x256xf32, #tpu.memory_space<vmem>>) attributes {dimension_semantics = [#tpu.dimension_semantics<parallel>, #tpu.dimension_semantics<parallel>], iteration_bounds = array<i64: 1, 2>, scalar_prefetch = 0 : i64, scratch_operands = 0 : i64, tpu.core_type = #tpu.core_type<tc>, window_params = [{transform_indices = @transform_0, window_bounds = array<i64: 32, 2, 256>}, {transform_indices = @transform_1, window_bounds = array<i64: 32, 2, 1>}, {transform_indices = @transform_2, window_bounds = array<i64: 32, 2, 1>}, {transform_indices = @transform_3, window_bounds = array<i64: 32, 2, 256>}]} {
    %c0 = arith.constant 0 : index
    %c0_0 = arith.constant 0 : index
    %c0_1 = arith.constant 0 : index
    %0 = vector.load %arg2[%c0, %c0_0, %c0_1] : memref<32x2x256xf32, #tpu.memory_space<vmem>>, vector<32x2x256xf32>
    %cst = arith.constant dense<0.000000e+00> : vector<32x2xf32>
    %1 = vector.multi_reduction <add>, %0, %cst [2] : vector<32x2x256xf32> to vector<32x2xf32>
    %2 = vector.shape_cast %1 : vector<32x2xf32> to vector<32x2x1xf32>
    %cst_2 = arith.constant dense<0.000000e+00> : vector<32x1xf32>
    %3 = vector.multi_reduction <add>, %2, %cst_2 [1] : vector<32x2x1xf32> to vector<32x1xf32>
    %4 = vector.shape_cast %3 : vector<32x1xf32> to vector<32x1x1xf32>
    %cst_3 = arith.constant 0.001953125 : f32
    %5 = vector.broadcast %cst_3 : f32 to vector<32x1x1xf32>
    %6 = arith.mulf %4, %5 : vector<32x1x1xf32>
    %7 = vector.broadcast %6 : vector<32x1x1xf32> to vector<32x2x256xf32>
    %8 = arith.subf %0, %7 : vector<32x2x256xf32>
    %9 = arith.mulf %8, %8 : vector<32x2x256xf32>
    %cst_4 = arith.constant dense<0.000000e+00> : vector<32x2xf32>
    %10 = vector.multi_reduction <add>, %9, %cst_4 [2] : vector<32x2x256xf32> to vector<32x2xf32>
    %11 = vector.shape_cast %10 : vector<32x2xf32> to vector<32x2x1xf32>
    %cst_5 = arith.constant dense<0.000000e+00> : vector<32x1xf32>
    %12 = vector.multi_reduction <add>, %11, %cst_5 [1] : vector<32x2x1xf32> to vector<32x1xf32>
    %13 = vector.shape_cast %12 : vector<32x1xf32> to vector<32x1x1xf32>
    %cst_6 = arith.constant 0.001953125 : f32
    %14 = vector.broadcast %cst_6 : f32 to vector<32x1x1xf32>
    %15 = arith.mulf %13, %14 : vector<32x1x1xf32>
    %cst_7 = arith.constant 9.99999997E-7 : f32
    %16 = vector.broadcast %cst_7 : f32 to vector<32x1x1xf32>
    %17 = arith.addf %15, %16 : vector<32x1x1xf32>
    %18 = math.rsqrt %17 : vector<32x1x1xf32>
    %c0_8 = arith.constant 0 : index
    %c0_9 = arith.constant 0 : index
    %c0_10 = arith.constant 0 : index
    %19 = vector.load %arg3[%c0_8, %c0_9, %c0_10] : memref<32x2x1xf32, #tpu.memory_space<vmem>>, vector<32x2x1xf32>
    %20 = vector.broadcast %18 : vector<32x1x1xf32> to vector<32x2x1xf32>
    %21 = arith.mulf %19, %20 : vector<32x2x1xf32>
    %22 = vector.broadcast %21 : vector<32x2x1xf32> to vector<32x2x256xf32>
    %23 = arith.mulf %8, %22 : vector<32x2x256xf32>
    %c0_11 = arith.constant 0 : index
    %c0_12 = arith.constant 0 : index
    %c0_13 = arith.constant 0 : index
    %24 = vector.load %arg4[%c0_11, %c0_12, %c0_13] : memref<32x2x1xf32, #tpu.memory_space<vmem>>, vector<32x2x1xf32>
    %25 = vector.broadcast %24 : vector<32x2x1xf32> to vector<32x2x256xf32>
    %26 = arith.addf %23, %25 : vector<32x2x256xf32>
    %c0_14 = arith.constant 0 : index
    %c0_15 = arith.constant 0 : index
    %c0_16 = arith.constant 0 : index
    %27 = vector.load %arg5[%c0_14, %c0_15, %c0_16] : memref<32x2x256xf32, #tpu.memory_space<vmem>>, vector<32x2x256xf32>
    tpu.vector_store %arg5[%c0_14, %c0_15, %c0_16], %26 {strides = array<i32>} : memref<32x2x256xf32, #tpu.memory_space<vmem>>, vector<32x2x256xf32>,
    return
  }
  func.func @transform_0(%arg0: i32, %arg1: i32) -> (i32, i32, i32) {
    %c1_i32 = arith.constant 1 : i32
    %0 = arith.muli %arg1, %c1_i32 : i32
    %1 = arith.addi %0, %arg0 : i32
    %c0_i32 = arith.constant 0 : i32
    %c0_i32_0 = arith.constant 0 : i32
    %c0_i32_1 = arith.constant 0 : i32
    return %1, %c0_i32, %c0_i32_0 : i32, i32, i32
  }
  func.func @transform_1(%arg0: i32, %arg1: i32) -> (i32, i32, i32) {
    %c0_i32 = arith.constant 0 : i32
    %c0_i32_0 = arith.constant 0 : i32
    %c0_i32_1 = arith.constant 0 : i32
    return %arg0, %c0_i32, %c0_i32_0 : i32, i32, i32
  }
  func.func @transform_2(%arg0: i32, %arg1: i32) -> (i32, i32, i32) {
    %c0_i32 = arith.constant 0 : i32
    %c0_i32_0 = arith.constant 0 : i32
    %c0_i32_1 = arith.constant 0 : i32
    return %arg0, %c0_i32, %c0_i32_0 : i32, i32, i32
  }
  func.func @transform_3(%arg0: i32, %arg1: i32) -> (i32, i32, i32) {
    %c1_i32 = arith.constant 1 : i32
    %0 = arith.muli %arg1, %c1_i32 : i32
    %1 = arith.addi %0, %arg0 : i32
    %c0_i32 = arith.constant 0 : i32
    %c0_i32_0 = arith.constant 0 : i32
    %c0_i32_1 = arith.constant 0 : i32
    return %1, %c0_i32, %c0_i32_0 : i32, i32, i32
  }
}

</mosaic_0001>

<bundles_post_ra>
// kernel: tpu_custom_call.1
= control target key start
LH: loop header
LB: loop body
LE: loop exit
PB: predicated region body
PF: predicated region fallthrough
CT: control target
= control target key end

     0   :  { %8 = vsyncpa [#allocation3], 0  ;;  %s5005_s0 = inlined_call_operand.hbm [shape: f32[64,2,256], index: 0, kind: input, shape index: {}]   ;;  %s5006_s1 = inlined_call_operand.vmem [shape: f32[32,2,1], index: 1, kind: input, shape index: {}]   ;;  %s5007_s2 = inlined_call_operand.vmem [shape: f32[32,2,1], index: 2, kind: input, shape index: {}]   ;;  %s5008_s3 = inlined_call_operand.hbm [shape: f32[64,2,256], index: 3, kind: output, shape index: {}]  }
   0x1   :  { %10 = vsyncpa [#allocation3 + $0x1], 0 }
   0x2   :  { %11 = vsyncpa [#allocation4], 0 }
   0x3   :  { %13 = vsyncpa [#allocation4 + $0x1], 0  ;;  %s3121_s12 = smov 0   ;;  %s3123_s13 = smov 0  }
   0x4   :  { %s3125_s14 = smov 0   ;;  %s3127_s15 = smov 0  }
   0x5   :  { %s3129_s16 = smov 0   ;;  %s3131_s17 = smov 0  }
   0x6 LB: > { %s2823_s18 = sadd.s32 4294967295, %s3093_s17   ;;  %s2824_s19 = sadd.s32 4294967294, %s3093_s17   ;;  %s3093_s17 = sphi %s3131_s17, %s19_s17   ;;  %s3089_s16 = sphi %s3129_s16, %s5231_s16   ;;  %s3085_s15 = sphi %s3127_s15, %s5230_s15   ;;  %s3081_s14 = sphi %s3125_s14, %s5229_s14   ;;  %s3077_s13 = sphi %s3123_s13, %s5228_s13   ;;  %s3073_s12 = sphi %s3121_s12, %s5227_s12  }
   0x7   : > { %s28_s20 = sadd.s32 1, %s3089_s16  ;;  %s40_s21 = sadd.s32 1, %s3081_s14 }
   0x8   : > { %p29_p0 = scmp.ge.s32.totalorder %s28_s20, 2  ;;  %p47_p1 = scmp.ne.s32.totalorder %s3081_s14, %s3077_s13 }
   0x9   : > { %p48_p2 = scmp.eq.s32.totalorder %s3093_s17, 0  ;;  %p53_p3 = scmp.ne.s32.totalorder %s3077_s13, %s3073_s12 }
   0xa   : > { %s5233_s20 = smov (%p29_p0, %s28_s20), 0  ;;  %p54_p5 = scmp.eq.s32.totalorder %s2823_s18, 0 }
   0xb   : > { %p3162_p4 = por %p48_p2, %p47_p1  ;;  %s37_s23 = ssub.s32 %s3089_s16, %s5233_s20 }
   0xc   : > { %p131_p6 = scmp.eq.s32.totalorder %s2823_s18, 1  ;;  %p38_p7 = scmp.eq.s32.totalorder %s37_s23, 0 }
   0xd   : > { %p3168_p8 = por %p54_p5, %p53_p3  ;;  %p137_p10 = scmp.eq.s32.totalorder %s2824_s19, 1 }
   0xe   : > { %p3172_p9 = por %p131_p6, %p47_p1  ;;  %p2828_p12 = scmp.ge.s32.totalorder %s3093_s17, 2 }
   0xf   : > { %s3177_s26 = scalar_select %p38_p7, %s3081_s14, %s40_s21  }
  0x10   : > { %p3179_p11 = por %p137_p10, %p53_p3  ;;  %p2858_p13 = scmp.lt.s32.totalorder %s3093_s17, 2 }
  0x11   : > { %s175_s28 = sand.u32 1, %s3081_s14   ;;  %s2843_s30 = sshll.u32 %s3089_s16, 7 }
  0x12   : > { %s2829_s29 = sshll.u32 %s175_s28, 7  ;;  %s186_s6 = scalar_lea.hbm %s5005_s0, %s2843_s30 }
  0x13   : > { %s179_s7 = scalar_lea.vmem [#allocation2], %s2829_s29  ;;  %s187_s9 = sshll.u32 %s186_s6, 4  ;;  %s188_s9 = int_to_ptr.hbm [resolvable:$true] %s187_s9 }
  0x14   : > { %s189_s8 = sshll.u32 %s179_s7, 4  ;;  %p2851_p0 = pnand %p2858_p13, %p3162_p4  ;;  %s190_s8 = int_to_ptr.vmem [resolvable:$true] %s189_s8 }
  0x15   : > { %p2833_p1 = scmp.ge.s32.totalorder %s3093_s17, 1  ;;  %s176_s10 = scalar_lea.sflag [#allocation3], %s175_s28 }
  0x16   : > { %s3095_s11 = smov 64   ;;  %s3096_s18 = smov 4  }
  0x17   : > { %2853 = dma.hbm_to_vmem [thread:$0]  (!%p2851_p0), %s188_s9, 2048, %s190_s8, %s176_s10, %s3095_s11, %s3095_s11, %s3096_s18  }
  0x18   : > { %p197_p2 = scmp.lt.s32.totalorder %s3093_s17, 3 }
  0x1a   : > { %p198_p3 = pnand %p2833_p1, %p197_p2 }
  0x1c   : > { %201 = sbr.rel (%p198_p3) target bundleno = 936 (0x3a8), region = 32 }
  0x21   : > { %s3195_s19 = sand.u32 1, %s3077_s13  }
  0x22   : > { %s2834_s21 = sshll.u32 %s3195_s19, 7  ;;  %s204_s23 = scalar_lea.sflag [#allocation3], %s3195_s19 }
  0x23   : > { %s3201_s22 = scalar_lea.vmem [#allocation2], %s2834_s21 }
  0x24   : > { %3064 = dma.done.wait (%p3168_p8), %s204_s23, 2048  }
  0x25   : > { %3066 = vsyncadd (%p3168_p8), %s204_s23, 4294965248  ;;  %v3097_v0 = vmov 0   ;;  %v2310_v1 = vld [vmem:[%s5007_s2 + $0x4] sm:$0x3]  ;;  %v2309_v2 = vld [vmem:[%s5007_s2 + $0x2] sm:$0x3] }
  0x26   : > { %2916 = vset.pattern.permute.xlu2 %v3097_v0  ;;  %2915 = vset.pattern.permute.xlu0 %v3097_v0  ;;  %v2308_v3 = vld [vmem:[%s5007_s2] sm:$0x3]  ;;  %v3217_v4 = vld [vmem:[%s3201_s22] sm:$0xf]  ;;  %v2311_v6 = vld [vmem:[%s5007_s2 + $0x6] sm:$0x3] }
  0x27   : > { %2914 = vset.pattern.permute.xlu1 %v3097_v0  ;;  %2350 = vperm.xlu2 %2916, %v2310_v1   ;;  %321 = vst [vmem:[#allocation1] ss:$4 sm:$0xff] %v3217_v4  ;;  %v2313_v5 = vld [vmem:[%s5007_s2 + $0xa] sm:$0x3]  ;;  %v3227_v7 = vld [vmem:[%s3201_s22 + $0x4] sm:$0xf] }
  0x28   : > { %2346 = vperm.xlu0 %2915, %v2309_v2   ;;  %2342 = vperm.xlu1 %2914, %v2308_v3   ;;  %325 = vst [vmem:[#allocation1 + $0x20] ss:$4 sm:$0xff] %v3227_v7  ;;  %v3231_v8 = vld [vmem:[%s3201_s22 + $0x8] sm:$0xf]  ;;  %v3238_v14 = vld [vmem:[%s3201_s22 + $0x10] sm:$0xf] }
  0x29   : > { %v2316_v11 = vld [vmem:[%s5007_s2 + $0x10] sm:$0x3]  ;;  %v3241_v15 = vld [vmem:[%s3201_s22 + $0xc] sm:$0xf]  ;;  %v3246_v18 = vld [vmem:[%s3201_s22 + $0x14] sm:$0xf] }
  0x2a   : > { %v3249_v19 = vld [vmem:[%s3201_s22 + $0x18] sm:$0xf]  ;;  %vm482_vm0 = vcmask 1041408   ;;  %v3254_v24 = vld [vmem:[%s3201_s22 + $0x20] sm:$0xf]  ;;  %s4680_s10 = scalar_lea.vmem [#allocation5], %s2834_s21 }
  0x2b   : > { %v3264_v30 = vld [vmem:[%s3201_s22 + $0x28] sm:$0xf]  ;;  %v3274_v41 = vld [vmem:[%s3201_s22 + $0x1c] sm:$0xf]  ;;  %v3282_v50 = vld [vmem:[%s3201_s22 + $0x24] sm:$0xf] }
  0x2c   : > { %v3296_v58 = vld [vmem:[%s3201_s22 + $0x2c] sm:$0xf]  ;;  %v3299_v59 = vld [vmem:[%s3201_s22 + $0x30] sm:$0xf]  ;;  %v2312_v62 = vld [vmem:[%s5007_s2 + $0x8] sm:$0x3] }
  0x2d   : > { %v2315_v0 = vld [vmem:[%s5007_s2 + $0xe] sm:$0x3]  ;;  %v3314_v1 = vld [vmem:[%s3201_s22 + $0x38] sm:$0xf]  ;;  %v3317_v2 = vld [vmem:[%s3201_s22 + $0x34] sm:$0xf] }
  0x2e   : > { %v322_v9 = vld.sshfl [vmem:[#allocation1] sm:$0xff pattern:$0x73625140]  ;;  %v323_v10 = vld.sshfl [vmem:[#allocation1 + $0x8] sm:$0xff pattern:$0x73625140] }
  0x2f   : > { %2362 = vperm.xlu2 %2916, %v2313_v5   ;;  %328 = vst [vmem:[#allocation1] ss:$4 sm:$0xff] %v3231_v8  ;;  %v326_v12 = vld.sshfl [vmem:[#allocation1 + $0x20] sm:$0xff pattern:$0x73625140]  ;;  %v483_v27 = vsel %vm482_vm0, %v322_v9, 0.0 }
  0x30   : > { %2354 = vperm.xlu1 %2914, %v2311_v6   ;;  %v327_v13 = vld.sshfl [vmem:[#allocation1 + $0x28] sm:$0xff pattern:$0x73625140]  ;;  %v484_v28 = vsel %vm482_vm0, %v323_v10, 0.0  ;;  %v488_v33 = vsel %vm482_vm0, %v326_v12, 0.0  ;;  %5058 = vst [vmem:[#allocation8_spill] sm:$0xff] %v3314_v1 }
  0x31   : > { %331 = vst [vmem:[#allocation1 + $0x20] ss:$4 sm:$0xff] %v3241_v15  ;;  %v485_v29 = vadd.f32 %v484_v28, %v483_v27  ;;  %v489_v34 = vsel %vm482_vm0, %v327_v13, 0.0  ;;  %v2314_v10 = vld [vmem:[%s5007_s2 + $0xc] sm:$0x3]  ;;  %s2845_s9 = sshll.u32 %s3085_s15, 7 }
  0x32   : > { %v490_v37 = vadd.f32 %v489_v34, %v488_v33  ;;  %v3338_v13 = vld [vmem:[%s3201_s22 + $0x3c] sm:$0xf]  ;;  %v3371_v33 = vld [vmem:[%s3201_s22 + $0x4c] sm:$0xf]  ;;  %s2706_s11 = scalar_lea.hbm %s5008_s3, %s2845_s9  ;;  %s2707_s18 = sshll.u32 %s4680_s10, 4  ;;  %s2708_s18 = int_to_ptr.vmem [resolvable:$true] %s2707_s18 }
  0x33   : > { %5060 = vst [vmem:[#allocation10_spill] sm:$0xff] %v3338_v13  ;;  %s2709_s23 = sshll.u32 %s2706_s11, 4  ;;  %s2693_s15 = scalar_lea.sflag [#allocation4], %s3195_s19  ;;  %s2710_s23 = int_to_ptr.hbm [resolvable:$true] %s2709_s23 }
  0x34   : > { %5064 = vst [vmem:[#allocation14_spill] sm:$0xff] %v3371_v33  ;;  %s3025_s28 = sshra.s32 %s2710_s23, 4  ;;  %s3031_s5 = scalar_lea.hbm %s5008_s3, 256  ;;  %s3026_s28 = int_to_ptr.hbm [resolvable:$true] %s3025_s28 }
  0x35   : > { %s3027_s29 = scalar_lea.hbm %s3026_s28, 128  ;;  %p3032_p7 = scmp.lt.s32.totalorder %s3026_s28, %s5008_s3 }
  0x36   : > { %v329_v16 = vld.sshfl [vmem:[#allocation1] sm:$0xff pattern:$0x73625140]  ;;  %v330_v17 = vld.sshfl [vmem:[#allocation1 + $0x8] sm:$0xff pattern:$0x73625140]  ;;  %p3028_p4 = scmp.ne.s32.totalorder %s3026_s28, %s3027_s29  ;;  %p3033_p8 = scmp.lt.s32.totalorder %s3031_s5, %s3027_s29 }
  0x37   : > { %2374 = vperm.xlu2 %2916, %v2316_v11   ;;  %334 = vst [vmem:[#allocation1] ss:$4 sm:$0xff] %v3238_v14  ;;  %v493_v35 = vsel %vm482_vm0, %v329_v16, 0.0  ;;  %v494_v36 = vsel %vm482_vm0, %v330_v17, 0.0  ;;  %v3333_v11 = vld [vmem:[%s3201_s22 + $0x40] sm:$0xf] }
  0x38   : > { %v332_v20 = vld.sshfl [vmem:[#allocation1 + $0x20] sm:$0xff pattern:$0x73625140]  ;;  %v333_v21 = vld.sshfl [vmem:[#allocation1 + $0x28] sm:$0xff pattern:$0x73625140]  ;;  %v495_v38 = vadd.f32 %v494_v36, %v493_v35  ;;  %p3029_p5 = pnand %p3028_p4, %p3172_p9  ;;  %p3034_p10 = por %p3033_p8, %p3032_p7 }
  0x39   : > { %337 = vst [vmem:[#allocation1 + $0x20] ss:$4 sm:$0xff] %v3246_v18  ;;  %v498_v44 = vsel %vm482_vm0, %v332_v20, 0.0  ;;  %v499_v45 = vsel %vm482_vm0, %v333_v21, 0.0  ;;  %v3349_v21 = vld [vmem:[%s3201_s22 + $0x44] sm:$0xf] }
  0x3a   : > { %v500_v47 = vadd.f32 %v499_v45, %v498_v44  ;;  %5059 = vst [vmem:[#allocation9_spill] sm:$0xff] %v3333_v11  ;;  %p3030_p6 = pneg %p3029_p5 }
  0x3b   : > { %5061 = vst [vmem:[#allocation11_spill] sm:$0xff] %v3349_v21 }
  0x3c   : > { %p3035_p13 = pnand %p3034_p10, %p3030_p6 }
  0x3e   : > { %v335_v22 = vld.sshfl [vmem:[#allocation1] sm:$0xff pattern:$0x73625140]  ;;  %v336_v23 = vld.sshfl [vmem:[#allocation1 + $0x8] sm:$0xff pattern:$0x73625140] }
  0x3f   : > { %340 = vst [vmem:[#allocation1] ss:$4 sm:$0xff] %v3249_v19  ;;  %v503_v39 = vsel %vm482_vm0, %v335_v22, 0.0  ;;  %v504_v40 = vsel %vm482_vm0, %v336_v23, 0.0  ;;  %v3352_v22 = vld [vmem:[%s3201_s22 + $0x48] sm:$0xf] }
  0x40   : > { %v338_v42 = vld.sshfl [vmem:[#allocation1 + $0x20] sm:$0xff pattern:$0x73625140]  ;;  %v339_v43 = vld.sshfl [vmem:[#allocation1 + $0x28] sm:$0xff pattern:$0x73625140]  ;;  %v505_v46 = vadd.f32 %v504_v40, %v503_v39 }
  0x41   : > { %343 = vst [vmem:[#allocation1 + $0x20] ss:$4 sm:$0xff] %v3274_v41  ;;  %v508_v48 = vsel %vm482_vm0, %v338_v42, 0.0  ;;  %v509_v49 = vsel %vm482_vm0, %v339_v43, 0.0  ;;  %v3387_v39 = vld [vmem:[%s3201_s22 + $0x54] sm:$0xf] }
  0x42   : > { %v510_v53 = vadd.f32 %v509_v49, %v508_v48  ;;  %5062 = vst [vmem:[#allocation12_spill] sm:$0xff] %v3352_v22  ;;  %v3404_v48 = vld [vmem:[%s3201_s22 + $0x60] sm:$0xf]  ;;  %v3407_v49 = vld [vmem:[%s3201_s22 + $0x5c] sm:$0xf] }
  0x43   : > { %5066 = vst [vmem:[#allocation16_spill] sm:$0xff] %v3387_v39 }
  0x44   : > { %5067 = vst [vmem:[#allocation17_spill] sm:$0xff] %v3404_v48 }
  0x45   : > { %5068 = vst [vmem:[#allocation18_spill] sm:$0xff] %v3407_v49 }
  0x46   : > { %v3256_v25 = vld.sshfl [vmem:[#allocation1] sm:$0xff pattern:$0x73625140]  ;;  %v3258_v26 = vld.sshfl [vmem:[#allocation1 + $0x8] sm:$0xff pattern:$0x73625140] }
  0x47   : > { %346 = vst [vmem:[#allocation1] ss:$4 sm:$0xff] %v3254_v24  ;;  %v513_v45 = vsel %vm482_vm0, %v3256_v25, 0.0 }
  0x48   : > { %v3284_v51 = vld.sshfl [vmem:[#allocation1 + $0x20] sm:$0xff pattern:$0x73625140]  ;;  %v3286_v52 = vld.sshfl [vmem:[#allocation1 + $0x28] sm:$0xff pattern:$0x73625140] }
  0x49   : > { %349 = vst [vmem:[#allocation1 + $0x20] ss:$4 sm:$0xff] %v3282_v50  ;;  %v519_v25 = vsel %vm482_vm0, %v3286_v52, 0.0  ;;  %v3428_v52 = vld [vmem:[%s3201_s22 + $0x68] sm:$0xf] }
  0x4a   : > { %5071 = vst [vmem:[#allocation21_spill] sm:$0xff] %v3428_v52 }
  0x4e   : > { %v347_v31 = vld.sshfl [vmem:[#allocation1] sm:$0xff pattern:$0x73625140]  ;;  %v348_v32 = vld.sshfl [vmem:[#allocation1 + $0x8] sm:$0xff pattern:$0x73625140] }
  0x4f   : > { %352 = vst [vmem:[#allocation1] ss:$4 sm:$0xff] %v3264_v30  ;;  %v523_v56 = vsel %vm482_vm0, %v347_v31, 0.0  ;;  %v524_v57 = vsel %vm482_vm0, %v348_v32, 0.0  ;;  %v2319_v31 = vld [vmem:[%s5007_s2 + $0x16] sm:$0x3] }
  0x50   : > { %v3301_v60 = vld.sshfl [vmem:[#allocation1 + $0x20] sm:$0xff pattern:$0x73625140]  ;;  %v3303_v61 = vld.sshfl [vmem:[#allocation1 + $0x28] sm:$0xff pattern:$0x73625140]  ;;  %v525_v63 = vadd.f32 %v524_v57, %v523_v56 }
  0x51   : > { %355 = vst [vmem:[#allocation1 + $0x20] ss:$4 sm:$0xff] %v3296_v58  ;;  %v3368_v32 = vld [vmem:[%s3201_s22 + $0x50] sm:$0xf]  ;;  %v518_v57 = vsel %vm482_vm0, %v3284_v51, 0.0 }
  0x52   : > { %486 = vadd.xlane.f32.xlu0 %v485_v29  ;;  %5063 = vst [vmem:[#allocation13_spill] sm:$0xff] %v3368_v32  ;;  %v520_v51 = vadd.f32 %v519_v25, %v518_v57  ;;  %v3448_v25 = vld [vmem:[%s3201_s22 + $0x70] sm:$0xf] }
  0x53   : > { %5073 = vst [vmem:[#allocation23_spill] sm:$0xff] %v3448_v25 }
  0x56   : > { %v3289_v54 = vld.sshfl [vmem:[#allocation1] sm:$0xff pattern:$0x73625140]  ;;  %v3291_v55 = vld.sshfl [vmem:[#allocation1 + $0x8] sm:$0xff pattern:$0x73625140] }
  0x57   : > { %358 = vst [vmem:[#allocation1] ss:$4 sm:$0xff] %v3299_v59 }
  0x58   : > { %v3319_v3 = vld.sshfl [vmem:[#allocation1 + $0x20] sm:$0xff pattern:$0x73625140]  ;;  %v3321_v5 = vld.sshfl [vmem:[#allocation1 + $0x28] sm:$0xff pattern:$0x73625140] }
  0x59   : > { %361 = vst [vmem:[#allocation1 + $0x20] ss:$4 sm:$0xff] %v3317_v2  ;;  %v539_v57 = vsel %vm482_vm0, %v3321_v5, 0.0 }
  0x5a   : > { %491 = vadd.xlane.f32.xlu0 %v490_v37  ;;  %496 = vadd.xlane.f32.xlu1 %v495_v38  ;;  %v3384_v38 = vld [vmem:[%s3201_s22 + $0x58] sm:$0xf] }
  0x5b   : > { %5065 = vst [vmem:[#allocation15_spill] sm:$0xff] %v3384_v38 }
  0x5e   : > { %v3323_v6 = vld.sshfl [vmem:[#allocation1] sm:$0xff pattern:$0x73625140]  ;;  %v3325_v9 = vld.sshfl [vmem:[#allocation1 + $0x8] sm:$0xff pattern:$0x73625140] }
  0x5f   : > { %364 = vst [vmem:[#allocation1] ss:$4 sm:$0xff] %v3314_v1 }
  0x60   : > { %506 = vadd.xlane.f32.xlu2 %v505_v46  ;;  %v3342_v17 = vld.sshfl [vmem:[#allocation1 + $0x20] sm:$0xff pattern:$0x73625140]  ;;  %v3345_v20 = vld.sshfl [vmem:[#allocation1 + $0x28] sm:$0xff pattern:$0x73625140] }
  0x61   : > { %367 = vst [vmem:[#allocation1 + $0x20] ss:$4 sm:$0xff] %v3338_v13  ;;  %v514_v46 = vsel %vm482_vm0, %v3258_v26, 0.0 }
  0x62   : > { %501 = vadd.xlane.f32.xlu1 %v500_v47  ;;  %v515_v47 = vadd.f32 %v514_v46, %v513_v45 }
  0x66   : > { %v3335_v12 = vld.sshfl [vmem:[#allocation1] sm:$0xff pattern:$0x73625140]  ;;  %v3340_v16 = vld.sshfl [vmem:[#allocation1 + $0x8] sm:$0xff pattern:$0x73625140] }
  0x67   : > { %370 = vst [vmem:[#allocation1] ss:$4 sm:$0xff] %v3333_v11  ;;  %v554_v5 = vsel %vm482_vm0, %v3340_v16, 0.0  ;;  %v2318_v16 = vld [vmem:[%s5007_s2 + $0x14] sm:$0x3] }
  0x68   : > { %511 = vadd.xlane.f32.xlu2 %v510_v53  ;;  %v3358_v28 = vld.sshfl [vmem:[#allocation1 + $0x20] sm:$0xff pattern:$0x73625140]  ;;  %v3360_v29 = vld.sshfl [vmem:[#allocation1 + $0x28] sm:$0xff pattern:$0x73625140] }
  0x69   : > { %373 = vst [vmem:[#allocation1 + $0x20] ss:$4 sm:$0xff] %v3349_v21 }
  0x6e   : > { %2358 = vperm.xlu0 %2915, %v2312_v62   ;;  %v3354_v23 = vld.sshfl [vmem:[#allocation1] sm:$0xff pattern:$0x73625140]  ;;  %v3356_v27 = vld.sshfl [vmem:[#allocation1 + $0x8] sm:$0xff pattern:$0x73625140] }
  0x6f   : > { %376 = vst [vmem:[#allocation1] ss:$4 sm:$0xff] %v3352_v22 }
  0x70   : > { %526 = vadd.xlane.f32.xlu2 %v525_v63  ;;  %v3373_v34 = vld.sshfl [vmem:[#allocation1 + $0x20] sm:$0xff pattern:$0x73625140]  ;;  %v3375_v35 = vld.sshfl [vmem:[#allocation1 + $0x28] sm:$0xff pattern:$0x73625140] }
  0x71   : > { %379 = vst [vmem:[#allocation1 + $0x20] ss:$4 sm:$0xff] %v3371_v33  ;;  %v528_v63 = vsel %vm482_vm0, %v3301_v60, 0.0 }
  0x76   : > { %2370 = vperm.xlu0 %2915, %v2315_v0   ;;  %v3377_v36 = vld.sshfl [vmem:[#allocation1] sm:$0xff pattern:$0x73625140]  ;;  %v3379_v37 = vld.sshfl [vmem:[#allocation1 + $0x8] sm:$0xff pattern:$0x73625140] }
  0x77   : > { %382 = vst [vmem:[#allocation1] ss:$4 sm:$0xff] %v3368_v32  ;;  %v529_v0 = vsel %vm482_vm0, %v3303_v61, 0.0 }
  0x78   : > { %v3394_v43 = vld.sshfl [vmem:[#allocation1 + $0x20] sm:$0xff pattern:$0x73625140]  ;;  %v3396_v44 = vld.sshfl [vmem:[#allocation1 + $0x28] sm:$0xff pattern:$0x73625140] }
  0x79   : > { %385 = vst [vmem:[#allocation1 + $0x20] ss:$4 sm:$0xff] %v3387_v39 }
  0x7b   : > { %2366 = vperm.xlu1 %2914, %v2314_v10   ;;  %v530_v10 = vadd.f32 %v529_v0, %v528_v63  ;;  %v3451_v63 = vld [vmem:[%s3201_s22 + $0x6c] sm:$0xf] }
  0x7c   : > { %5074 = vst [vmem:[#allocation24_spill] sm:$0xff] %v3451_v63 }
  0x7e   : > { %v3389_v40 = vld.sshfl [vmem:[#allocation1] sm:$0xff pattern:$0x73625140]  ;;  %v3391_v42 = vld.sshfl [vmem:[#allocation1 + $0x8] sm:$0xff pattern:$0x73625140] }
  0x7f   : > { %388 = vst [vmem:[#allocation1] ss:$4 sm:$0xff] %v3384_v38 }
  0x80   : > { %v3418_v26 = vld.sshfl [vmem:[#allocation1 + $0x20] sm:$0xff pattern:$0x73625140]  ;;  %v3420_v62 = vld.sshfl [vmem:[#allocation1 + $0x28] sm:$0xff pattern:$0x73625140] }
  0x81   : > { %391 = vst [vmem:[#allocation1 + $0x20] ss:$4 sm:$0xff] %v3407_v49 }
  0x86   : > { %v3409_v53 = vld.sshfl [vmem:[#allocation1] sm:$0xff pattern:$0x73625140]  ;;  %v3411_v56 = vld.sshfl [vmem:[#allocation1 + $0x8] sm:$0xff pattern:$0x73625140] }
  0x87   : > { %5069 = vst [vmem:[#allocation19_spill] sm:$0xff] %v3409_v53 }
  0x88   : > { %2386 = vperm.xlu2 %2916, %v2319_v31   ;;  %5070 = vst [vmem:[#allocation20_spill] sm:$0xff] %v3411_v56  ;;  %v3431_v31 = vld [vmem:[%s3201_s22 + $0x64] sm:$0xf]  ;;  %v3438_v60 = vld.sshfl [vmem:[#allocation1 + $0x20] sm:$0xff pattern:$0x73625140] }
  0x89   : > { %394 = vst [vmem:[#allocation1] ss:$4 sm:$0xff] %v3404_v48  ;;  %v3440_v61 = vld.sshfl [vmem:[#allocation1 + $0x28] sm:$0xff pattern:$0x73625140] }
  0x8a   : > { %5072 = vst [vmem:[#allocation22_spill] sm:$0xff] %v3431_v31 }
  0x8b   : > { %397 = vst [vmem:[#allocation1 + $0x20] ss:$4 sm:$0xff] %v3431_v31 }
  0x90   : > { %v3433_v45 = vld.sshfl [vmem:[#allocation1] sm:$0xff pattern:$0x73625140]  ;;  %v3435_v46 = vld.sshfl [vmem:[#allocation1 + $0x8] sm:$0xff pattern:$0x73625140] }
  0x91   : > { %400 = vst [vmem:[#allocation1] ss:$4 sm:$0xff] %v3428_v52 }
  0x92   : > { %v3458_v52 = vld.sshfl [vmem:[#allocation1 + $0x20] sm:$0xff pattern:$0x73625140]  ;;  %v3460_v31 = vld.sshfl [vmem:[#allocation1 + $0x28] sm:$0xff pattern:$0x73625140] }
  0x93   : > { %5075 = vst [vmem:[#allocation25_spill] sm:$0xff] %v3458_v52 }
  0x94   : > { %5076 = vst [vmem:[#allocation26_spill] sm:$0xff] %v3460_v31 }
  0x95   : > { %403 = vst [vmem:[#allocation1 + $0x20] ss:$4 sm:$0xff] %v3451_v63 }
  0xa0   : > { %516 = vadd.xlane.f32.xlu0 %v515_v47  ;;  %v538_v47 = vsel %vm482_vm0, %v3319_v3, 0.0  ;;  %v553_v3 = vsel %vm482_vm0, %v3335_v12, 0.0  ;;  %v3482_v12 = vld.sshfl [vmem:[#allocation1 + $0x28] sm:$0xff pattern:$0x73625140] }
  0xa1   : > { %v540_v0 = vadd.f32 %v539_v57, %v538_v47  ;;  %v3468_v47 = vld [vmem:[%s3201_s22 + $0x78] sm:$0xf]  ;;  %v3471_v57 = vld [vmem:[%s3201_s22 + $0x74] sm:$0xf]  ;;  %v555_v48 = vadd.f32 %v554_v5, %v553_v3  ;;  %v3488_v3 = vpop.permute.xlu1 %2342  ;;  %v2317_v5 = vld [vmem:[%s5007_s2 + $0x12] sm:$0x3] }
  0xa2   : > { %5077 = vst [vmem:[#allocation27_spill] sm:$0xff] %v3468_v47 }
  0xa3   : > { %5078 = vst [vmem:[#allocation28_spill] sm:$0xff] %v3471_v57 }
  0xa4   : > { %5082 = vst [vmem:[#allocation32_spill] sm:$0xff] %v3488_v3 }
  0xa5   : > { %521 = vadd.xlane.f32.xlu1 %v520_v51  ;;  %v3453_v51 = vld.sshfl [vmem:[#allocation1] sm:$0xff pattern:$0x73625140] }
  0xa8   : > { %531 = vadd.xlane.f32.xlu0 %v530_v10  ;;  %v3455_v10 = vld.sshfl [vmem:[#allocation1 + $0x8] sm:$0xff pattern:$0x73625140] }
  0xa9   : > { %406 = vst [vmem:[#allocation1] ss:$4 sm:$0xff] %v3448_v25  ;;  %v3473_v25 = vpop.permute.xlu2 %2350  ;;  %v3505_v3 = vpop.permute.xlu1 %2354 }
  0xaa   : > { %5079 = vst [vmem:[#allocation29_spill] sm:$0xff] %v3473_v25  ;;  %v3493_v25 = vpop.permute.xlu0 %2346 }
  0xab   : > { %5083 = vst [vmem:[#allocation33_spill] sm:$0xff] %v3493_v25 }
  0xac   : > { %5088 = vst [vmem:[#allocation38_spill] sm:$0xff] %v3505_v3 }
  0xb0   : > { %v3475_v38 = vld.sshfl [vmem:[#allocation1] sm:$0xff pattern:$0x73625140]  ;;  %v3477_v49 = vld.sshfl [vmem:[#allocation1 + $0x8] sm:$0xff pattern:$0x73625140] }
  0xb1   : > { %541 = vadd.xlane.f32.xlu2 %v540_v0  ;;  %5080 = vst [vmem:[#allocation30_spill] sm:$0xff] %v3475_v38  ;;  %v3480_v0 = vld.sshfl [vmem:[#allocation1 + $0x20] sm:$0xff pattern:$0x73625140]  ;;  %v3498_v63 = vpop.permute.xlu2 %2362 }
  0xb2   : > { %5081 = vst [vmem:[#allocation31_spill] sm:$0xff] %v3477_v49 }
  0xb3   : > { %412 = vst [vmem:[#allocation1] ss:$4 sm:$0xff] %v3468_v47  ;;  %v3496_v47 = vld [vmem:[%s3201_s22 + $0x7c] sm:$0xf] }
  0xb4   : > { %409 = vst [vmem:[#allocation1 + $0x20] ss:$4 sm:$0xff] %v3471_v57 }
  0xb5   : > { %5084 = vst [vmem:[#allocation34_spill] sm:$0xff] %v3496_v47 }
  0xb6   : > { %5085 = vst [vmem:[#allocation35_spill] sm:$0xff] %v3498_v63 }
  0xb9   : > { %556 = vadd.xlane.f32.xlu2 %v555_v48  ;;  %v3508_v38 = vpop.permute.xlu2 %2374 }
  0xba   : > { %5089 = vst [vmem:[#allocation39_spill] sm:$0xff] %v3508_v38  ;;  %v3519_v13 = vld.sshfl [vmem:[#allocation1] sm:$0xff pattern:$0x73625140] }
  0xbb   : > { %v3500_v39 = vld.sshfl [vmem:[#allocation1 + $0x20] sm:$0xff pattern:$0x73625140]  ;;  %v3502_v32 = vld.sshfl [vmem:[#allocation1 + $0x28] sm:$0xff pattern:$0x73625140] }
  0xbc   : > { %2382 = vperm.xlu0 %2915, %v2318_v16   ;;  %5086 = vst [vmem:[#allocation36_spill] sm:$0xff] %v3500_v39  ;;  %v3521_v53 = vld.sshfl [vmem:[#allocation1 + $0x8] sm:$0xff pattern:$0x73625140] }
  0xbd   : > { %5087 = vst [vmem:[#allocation37_spill] sm:$0xff] %v3502_v32 }
  0xbe   : > { %2378 = vperm.xlu1 %2914, %v2317_v5   ;;  %415 = vst [vmem:[#allocation1 + $0x20] ss:$4 sm:$0xff] %v3496_v47  ;;  %v2322_v47 = vld [vmem:[%s5007_s2 + $0x1c] sm:$0x3] }
  0xbf   : > { %5091 = vst [vmem:[#allocation41_spill] sm:$0xff] %v3521_v53 }
  0xc5   : > { %v487_v48 = vpop.xlane.xlu0 %486 }
  0xc6   : > { %v643_v16 = vsel %vm482_vm0, %v487_v48, 0.0 }
  0xc7   : > { %v644_v57 = vrot.slane %v643_v16, 4 }
  0xc9   : > { %v645_v49 = vadd.f32 %v644_v57, %v643_v16 }
  0xcb   : > { %v646_v25 = vrot.slane %v645_v49, 2 }
  0xcd   : > { %v647_v33 = vadd.f32 %v646_v25, %v645_v49  ;;  %v492_v5 = vpop.xlane.xlu0 %491  ;;  %v497_v22 = vpop.xlane.xlu1 %496 }
  0xce   : > { %v650_v63 = vsel %vm482_vm0, %v492_v5, 0.0  ;;  %v657_v3 = vsel %vm482_vm0, %v497_v22, 0.0 }
  0xcf   : > { %v648_v11 = vrot.slane %v647_v33, 1  ;;  %v651_v39 = vrot.slane %v650_v63, 4  ;;  %v658_v32 = vrot.slane %v657_v3, 4 }
  0xd1   : > { %v649_v48 = vadd.f32 %v648_v11, %v647_v33  ;;  %v652_v21 = vadd.f32 %v651_v39, %v650_v63  ;;  %2398 = vperm.xlu2 %2916, %v2322_v47   ;;  %v659_v57 = vadd.f32 %v658_v32, %v657_v3 }
  0xd3   : > { %v867_v16 = vmul.f32 0.001953125, %v649_v48  ;;  %v653_v38 = vrot.slane %v652_v21, 2  ;;  %v507_v49 = vpop.xlane.xlu2 %506  ;;  %v660_v25 = vrot.slane %v659_v57, 2 }
  0xd4   : > { %v671_v52 = vsel %vm482_vm0, %v507_v49, 0.0 }
  0xd5   : > { %v3516_v5 = vsub.f32 %v3217_v4, %v867_v16  ;;  %v654_v31 = vadd.f32 %v653_v38, %v652_v21  ;;  %v672_v1 = vrot.slane %v671_v52, 4  ;;  %v661_v56 = vadd.f32 %v660_v25, %v659_v57  ;;  %v502_v22 = vpop.xlane.xlu1 %501 }
  0xd6   : > { %v664_v33 = vsel %vm482_vm0, %v502_v22, 0.0 }
  0xd7   : > { %5090 = vst [vmem:[#allocation40_spill] sm:$0xff] %v3516_v5  ;;  %v931_v11 = vmul.f32 %v3516_v5, %v3516_v5  ;;  %v655_v32 = vrot.slane %v654_v31, 1  ;;  %v673_v39 = vadd.f32 %v672_v1, %v671_v52  ;;  %v662_v63 = vrot.slane %v661_v56, 1 }
  0xd8   : > { %v665_v4 = vrot.slane %v664_v33, 4  ;;  %v543_v1 = vsel %vm482_vm0, %v3323_v6, 0.0  ;;  %v544_v52 = vsel %vm482_vm0, %v3325_v9, 0.0 }
  0xd9   : > { %v656_v47 = vadd.f32 %v655_v32, %v654_v31  ;;  %995 = vst [vmem:[#allocation1] ss:$4 sm:$0xff] %v931_v11  ;;  %v674_v21 = vrot.slane %v673_v39, 2  ;;  %v663_v38 = vadd.f32 %v662_v63, %v661_v56  ;;  %v3534_v31 = vld.sshfl [vmem:[#allocation1 + $0x20] sm:$0xff pattern:$0x73625140]  ;;  %v545_v9 = vadd.f32 %v544_v52, %v543_v1 }
  0xda   : > { %v666_v3 = vadd.f32 %v665_v4, %v664_v33  ;;  %v3539_v33 = vld.sshfl [vmem:[#allocation1 + $0x28] sm:$0xff pattern:$0x73625140]  ;;  %v558_v52 = vsel %vm482_vm0, %v3358_v28, 0.0  ;;  %v548_v28 = vsel %vm482_vm0, %v3342_v17, 0.0 }
  0xdb   : > { %v868_v48 = vmul.f32 0.001953125, %v656_v47  ;;  %v675_v16 = vadd.f32 %v674_v21, %v673_v39  ;;  %v512_v57 = vpop.xlane.xlu2 %511  ;;  %v869_v49 = vmul.f32 0.001953125, %v663_v38  ;;  %v533_v47 = vsel %vm482_vm0, %v3289_v54, 0.0 }
  0xdc   : > { %v667_v25 = vrot.slane %v666_v3, 2  ;;  %v678_v5 = vsel %vm482_vm0, %v512_v57, 0.0 }
  0xdd   : > { %v3527_v53 = vsub.f32 %v3227_v7, %v868_v48  ;;  %v676_v56 = vrot.slane %v675_v16, 1  ;;  %v679_v22 = vrot.slane %v678_v5, 4  ;;  %v3537_v11 = vsub.f32 %v3231_v8, %v869_v49 }
  0xde   : > { %v668_v32 = vadd.f32 %v667_v25, %v666_v3  ;;  %v534_v48 = vsel %vm482_vm0, %v3291_v55, 0.0  ;;  %v559_v55 = vsel %vm482_vm0, %v3360_v29, 0.0  ;;  %v549_v29 = vsel %vm482_vm0, %v3345_v20, 0.0 }
  0xdf   : > { %v932_v7 = vmul.f32 %v3527_v53, %v3527_v53  ;;  %v677_v39 = vadd.f32 %v676_v56, %v675_v16  ;;  %v680_v63 = vadd.f32 %v679_v22, %v678_v5  ;;  %v933_v6 = vmul.f32 %v3537_v11, %v3537_v11 }
  0xe0   : > { %v669_v4 = vrot.slane %v668_v32, 1  ;;  %v3547_v21 = vld.sshfl [vmem:[#allocation1] sm:$0xff pattern:$0x73625140]  ;;  %v535_v25 = vadd.f32 %v534_v48, %v533_v47  ;;  %v568_v20 = vsel %vm482_vm0, %v3373_v34, 0.0  ;;  %v584_v48 = vsel %vm482_vm0, %v3391_v42, 0.0 }
  0xe1   : > { %999 = vst [vmem:[#allocation1 + $0x20] ss:$4 sm:$0xff] %v932_v7  ;;  %v871_v8 = vmul.f32 0.001953125, %v677_v39  ;;  %v681_v38 = vrot.slane %v680_v63, 2  ;;  %v560_v39 = vadd.f32 %v559_v55, %v558_v52  ;;  %v2320_v34 = vld [vmem:[%s5007_s2 + $0x18] sm:$0x3] }
  0xe2   : > { %v670_v3 = vadd.f32 %v669_v4, %v668_v32  ;;  %v3551_v57 = vld.sshfl [vmem:[#allocation1 + $0x8] sm:$0xff pattern:$0x73625140] }
  0xe3   : > { %1002 = vst [vmem:[#allocation1] ss:$4 sm:$0xff] %v933_v6  ;;  %v3554_v5 = vsub.f32 %v3238_v14, %v871_v8  ;;  %v682_v16 = vadd.f32 %v681_v38, %v680_v63  ;;  %v569_v38 = vsel %vm482_vm0, %v3375_v35, 0.0  ;;  %v527_v35 = vpop.xlane.xlu2 %526 }
  0xe4   : > { %v870_v49 = vmul.f32 0.001953125, %v670_v3  ;;  %v583_v3 = vsel %vm482_vm0, %v3389_v40, 0.0 }
  0xe5   : > { %5092 = vst [vmem:[#allocation42_spill] sm:$0xff] %v3554_v5  ;;  %v683_v1 = vrot.slane %v682_v16, 1  ;;  %v935_v56 = vmul.f32 %v3554_v5, %v3554_v5 }
  0xe6   : > { %v3557_v54 = vsub.f32 %v3241_v15, %v870_v49  ;;  %546 = vadd.xlane.f32.xlu0 %v545_v9  ;;  %v550_v9 = vadd.f32 %v549_v29, %v548_v28  ;;  %v585_v49 = vadd.f32 %v584_v48, %v583_v3  ;;  %v2325_v29 = vld [vmem:[%s5007_s2 + $0x22] sm:$0x3] }
  0xe7   : > { %v684_v22 = vadd.f32 %v683_v1, %v682_v16  ;;  %v2321_v16 = vld [vmem:[%s5007_s2 + $0x1a] sm:$0x3]  ;;  %v699_v1 = vsel %vm482_vm0, %v527_v35, 0.0 }
  0xe8   : > { %v934_v14 = vmul.f32 %v3557_v54, %v3557_v54  ;;  %536 = vadd.xlane.f32.xlu1 %v535_v25  ;;  %v3567_v32 = vld.sshfl [vmem:[#allocation1 + $0x20] sm:$0xff pattern:$0x73625140]  ;;  %v3569_v7 = vld.sshfl [vmem:[#allocation1 + $0x28] sm:$0xff pattern:$0x73625140]  ;;  %v3599_v25 = vpop.permute.xlu0 %2358 }
  0xe9   : > { %v872_v15 = vmul.f32 0.001953125, %v684_v22  ;;  %5093 = vst [vmem:[#allocation43_spill] sm:$0xff] %v3599_v25  ;;  %v700_v42 = vrot.slane %v699_v1, 4 }
  0xea   : > { %v3575_v63 = vld.sshfl [vmem:[#allocation1] sm:$0xff pattern:$0x73625140]  ;;  %v3577_v6 = vld.sshfl [vmem:[#allocation1 + $0x8] sm:$0xff pattern:$0x73625140] }
  0xeb   : > { %1005 = vst [vmem:[#allocation1 + $0x20] ss:$4 sm:$0xff] %v934_v14  ;;  %v3580_v4 = vsub.f32 %v3246_v18, %v872_v15  ;;  %v570_v18 = vadd.f32 %v569_v38, %v568_v20  ;;  %v701_v52 = vadd.f32 %v700_v42, %v699_v1 }
  0xec   : > { %1008 = vst [vmem:[#allocation1] ss:$4 sm:$0xff] %v935_v56 }
  0xed   : > { %v936_v47 = vmul.f32 %v3580_v4, %v3580_v4  ;;  %v3607_v55 = vpop.permute.xlu1 %2366  ;;  %v702_v22 = vrot.slane %v701_v52, 2 }
  0xee   : > { %561 = vadd.xlane.f32.xlu0 %v560_v39  ;;  %5095 = vst [vmem:[#allocation45_spill] sm:$0xff] %v3607_v55 }
  0xef   : > { %v703_v28 = vadd.f32 %v702_v22, %v701_v52 }
  0xf0   : > { %551 = vadd.xlane.f32.xlu1 %v550_v9  ;;  %v3605_v40 = vpop.permute.xlu0 %2370 }
  0xf1   : > { %5094 = vst [vmem:[#allocation44_spill] sm:$0xff] %v3605_v40  ;;  %v704_v48 = vrot.slane %v703_v28, 1 }
  0xf2   : > { %v3584_v8 = vld.sshfl [vmem:[#allocation1 + $0x20] sm:$0xff pattern:$0x73625140]  ;;  %v3586_v17 = vld.sshfl [vmem:[#allocation1 + $0x28] sm:$0xff pattern:$0x73625140] }
  0xf3   : > { %1011 = vst [vmem:[#allocation1 + $0x20] ss:$4 sm:$0xff] %v936_v47  ;;  %v705_v22 = vadd.f32 %v704_v48, %v703_v28 }
  0xfa   : > { %571 = vadd.xlane.f32.xlu2 %v570_v18 }
 0x102   : > { %2394 = vperm.xlu0 %2915, %v2321_v16   ;;  %586 = vadd.xlane.f32.xlu2 %v585_v49  ;;  %v3615_v49 = vpop.permute.xlu2 %2386 }
 0x103   : > { %5096 = vst [vmem:[#allocation46_spill] sm:$0xff] %v3615_v49  ;;  %v573_v49 = vsel %vm482_vm0, %v3377_v36, 0.0 }
 0x109   : > { %2390 = vperm.xlu1 %2914, %v2320_v34  }
 0x113   : > { %v517_v56 = vpop.xlane.xlu0 %516 }
 0x114   : > { %v685_v14 = vsel %vm482_vm0, %v517_v56, 0.0 }
 0x115   : > { %v686_v15 = vrot.slane %v685_v14, 4 }
 0x117   : > { %v687_v39 = vadd.f32 %v686_v15, %v685_v14 }
 0x118   : > { %v522_v47 = vpop.xlane.xlu1 %521 }
 0x119   : > { %v688_v9 = vrot.slane %v687_v39, 2  ;;  %v692_v20 = vsel %vm482_vm0, %v522_v47, 0.0  ;;  %v3620_v47 = vld.sshfl [vmem:[#allocation1] sm:$0xff pattern:$0x73625140] }
 0x11a   : > { %v693_v18 = vrot.slane %v692_v20, 4  ;;  %2410 = vperm.xlu2 %2916, %v2325_v29  }
 0x11b   : > { %v689_v38 = vadd.f32 %v688_v9, %v687_v39  ;;  %v532_v3 = vpop.xlane.xlu0 %531 }
 0x11c   : > { %v706_v16 = vsel %vm482_vm0, %v532_v3, 0.0  ;;  %v694_v35 = vadd.f32 %v693_v18, %v692_v20  ;;  %v875_v3 = vmul.f32 0.001953125, %v705_v22  ;;  %v3624_v20 = vld.sshfl [vmem:[#allocation1 + $0x8] sm:$0xff pattern:$0x73625140] }
 0x11d   : > { %v690_v34 = vrot.slane %v689_v38, 1  ;;  %v707_v1 = vrot.slane %v706_v16, 4  ;;  %v3639_v22 = vld.sshfl [vmem:[#allocation1 + $0x28] sm:$0xff pattern:$0x73625140] }
 0x11e   : > { %v695_v52 = vrot.slane %v694_v35, 2 }
 0x11f   : > { %v691_v42 = vadd.f32 %v690_v34, %v689_v38  ;;  %v708_v56 = vadd.f32 %v707_v1, %v706_v16  ;;  %v3632_v1 = vsub.f32 %v3254_v24, %v875_v3  ;;  %v563_v24 = vsel %vm482_vm0, %v3354_v23, 0.0 }
 0x120   : > { %v696_v15 = vadd.f32 %v695_v52, %v694_v35  ;;  %v589_v3 = vsel %vm482_vm0, %v3420_v62, 0.0 }
 0x121   : > { %v873_v14 = vmul.f32 0.001953125, %v691_v42  ;;  %v709_v55 = vrot.slane %v708_v56, 2  ;;  %5098 = vst [vmem:[#allocation48_spill] sm:$0xff] %v3632_v1 }
 0x122   : > { %v697_v9 = vrot.slane %v696_v15, 1 }
 0x123   : > { %v3618_v39 = vsub.f32 %v3249_v19, %v873_v14  ;;  %v710_v29 = vadd.f32 %v709_v55, %v708_v56  ;;  %v574_v19 = vsel %vm482_vm0, %v3379_v37, 0.0  ;;  %v3637_v56 = vld.sshfl [vmem:[#allocation1 + $0x20] sm:$0xff pattern:$0x73625140] }
 0x124   : > { %v698_v28 = vadd.f32 %v697_v9, %v696_v15  ;;  %v542_v48 = vpop.xlane.xlu2 %541  ;;  %v575_v36 = vadd.f32 %v574_v19, %v573_v49  ;;  %v939_v9 = vmul.f32 %v3632_v1, %v3632_v1 }
 0x125   : > { %5097 = vst [vmem:[#allocation47_spill] sm:$0xff] %v3618_v39  ;;  %v937_v38 = vmul.f32 %v3618_v39, %v3618_v39  ;;  %v711_v18 = vrot.slane %v710_v29, 1  ;;  %v720_v16 = vsel %vm482_vm0, %v542_v48, 0.0 }
 0x126   : > { %v874_v55 = vmul.f32 0.001953125, %v698_v28  ;;  %v721_v35 = vrot.slane %v720_v16, 4 }
 0x127   : > { %v712_v34 = vadd.f32 %v711_v18, %v710_v29  ;;  %1014 = vst [vmem:[#allocation1] ss:$4 sm:$0xff] %v937_v38  ;;  %v588_v29 = vsel %vm482_vm0, %v3418_v26, 0.0 }
 0x128   : > { %v3635_v42 = vsub.f32 %v3274_v41, %v874_v55  ;;  %v722_v52 = vadd.f32 %v721_v35, %v720_v16  ;;  %v564_v41 = vsel %vm482_vm0, %v3356_v27, 0.0  ;;  %v590_v19 = vadd.f32 %v589_v3, %v588_v29 }
 0x129   : > { %v876_v14 = vmul.f32 0.001953125, %v712_v34  ;;  %v565_v23 = vadd.f32 %v564_v41, %v563_v24  ;;  %v578_v34 = vsel %vm482_vm0, %v3394_v43, 0.0  ;;  %v579_v35 = vsel %vm482_vm0, %v3396_v44, 0.0  ;;  %v2324_v44 = vld [vmem:[%s5007_s2 + $0x20] sm:$0x3] }
 0x12a   : > { %5099 = vst [vmem:[#allocation49_spill] sm:$0xff] %v3635_v42  ;;  %v938_v37 = vmul.f32 %v3635_v42, %v3635_v42  ;;  %v723_v15 = vrot.slane %v722_v52, 2  ;;  %v614_v24 = vsel %vm482_vm0, %v3455_v10, 0.0  ;;  %v5122_v42 = vld [vmem:[#allocation41_spill] sm:$0xff] }
 0x12b   : > { %v3656_v28 = vsub.f32 %v3282_v50, %v876_v14 }
 0x12c   : > { %576 = vadd.xlane.f32.xlu0 %v575_v36  ;;  %v724_v49 = vadd.f32 %v723_v15, %v722_v52  ;;  %1017 = vst [vmem:[#allocation1 + $0x20] ss:$4 sm:$0xff] %v938_v37  ;;  %v580_v36 = vadd.f32 %v579_v35, %v578_v34  ;;  %v599_v15 = vsel %vm482_vm0, %v3440_v61, 0.0  ;;  %v2323_v61 = vld [vmem:[%s5007_s2 + $0x1e] sm:$0x3]  ;;  %v557_v3 = vpop.xlane.xlu2 %556 }
 0x12d   : > { %5100 = vst [vmem:[#allocation50_spill] sm:$0xff] %v3656_v28  ;;  %v940_v27 = vmul.f32 %v3656_v28, %v3656_v28 }
 0x12e   : > { %v3653_v38 = vld.sshfl [vmem:[#allocation1] sm:$0xff pattern:$0x73625140]  ;;  %v725_v18 = vrot.slane %v724_v49, 1 }
 0x12f   : > { %v3658_v48 = vld.sshfl [vmem:[#allocation1 + $0x8] sm:$0xff pattern:$0x73625140] }
 0x130   : > { %1020 = vst [vmem:[#allocation1] ss:$4 sm:$0xff] %v939_v9  ;;  %v726_v16 = vadd.f32 %v725_v18, %v724_v49  ;;  %v613_v9 = vsel %vm482_vm0, %v3453_v51, 0.0  ;;  %v3695_v41 = vpop.permute.xlu1 %2378  ;;  %v741_v51 = vsel %vm482_vm0, %v557_v3, 0.0 }
 0x131   : > { %v615_v49 = vadd.f32 %v614_v24, %v613_v9 }
 0x132   : > { %v878_v26 = vmul.f32 0.001953125, %v726_v16 }
 0x133   : > { %566 = vadd.xlane.f32.xlu1 %v565_v23  ;;  %v3662_v62 = vld.sshfl [vmem:[#allocation1 + $0x20] sm:$0xff pattern:$0x73625140]  ;;  %v3664_v55 = vld.sshfl [vmem:[#allocation1 + $0x28] sm:$0xff pattern:$0x73625140] }
 0x134   : > { %591 = vadd.xlane.f32.xlu0 %v590_v19  ;;  %v3667_v50 = vsub.f32 %v3296_v58, %v878_v26  ;;  %1023 = vst [vmem:[#allocation1 + $0x20] ss:$4 sm:$0xff] %v940_v27  ;;  %v598_v58 = vsel %vm482_vm0, %v3438_v60, 0.0  ;;  %v3690_v60 = vpop.permute.xlu0 %2382  ;;  %v742_v27 = vrot.slane %v741_v51, 4 }
 0x135   : > { %v600_v43 = vadd.f32 %v599_v15, %v598_v58  ;;  %5102 = vst [vmem:[#allocation52_spill] sm:$0xff] %v3690_v60 }
 0x136   : > { %5101 = vst [vmem:[#allocation51_spill] sm:$0xff] %v3667_v50  ;;  %v942_v52 = vmul.f32 %v3667_v50, %v3667_v50  ;;  %v743_v58 = vadd.f32 %v742_v27, %v741_v51 }
 0x138   : > { %v744_v3 = vrot.slane %v743_v58, 2 }
 0x13a   : > { %v745_v27 = vadd.f32 %v744_v3, %v743_v58  ;;  %v3716_v3 = vld.sshfl [vmem:[#allocation1] sm:$0xff pattern:$0x73625140] }
 0x13b   : > { %581 = vadd.xlane.f32.xlu1 %v580_v36  ;;  %v3675_v37 = vld.sshfl [vmem:[#allocation1 + $0x20] sm:$0xff pattern:$0x73625140]  ;;  %v3677_v14 = vld.sshfl [vmem:[#allocation1 + $0x28] sm:$0xff pattern:$0x73625140] }
 0x13c   : > { %1029 = vst [vmem:[#allocation1 + $0x20] ss:$4 sm:$0xff] %v942_v52  ;;  %v2328_v52 = vld [vmem:[%s5007_s2 + $0x28] sm:$0x3] }
 0x143   : > { %601 = vadd.xlane.f32.xlu2 %v600_v43 }
 0x148   : > { %2406 = vperm.xlu0 %2915, %v2324_v44  }
 0x14b   : > { %616 = vadd.xlane.f32.xlu2 %v615_v49 }
 0x154   : > { %2402 = vperm.xlu1 %2914, %v2323_v61  }
 0x159   : > { %v547_v29 = vpop.xlane.xlu0 %546 }
 0x15a   : > { %v727_v18 = vsel %vm482_vm0, %v547_v29, 0.0 }
 0x15b   : > { %v728_v23 = vrot.slane %v727_v18, 4  ;;  %v537_v10 = vpop.xlane.xlu1 %536 }
 0x15c   : > { %v713_v16 = vsel %vm482_vm0, %v537_v10, 0.0 }
 0x15d   : > { %v729_v19 = vadd.f32 %v728_v23, %v727_v18  ;;  %v714_v26 = vrot.slane %v713_v16, 4  ;;  %v3705_v18 = vpop.permute.xlu2 %2398 }
 0x15e   : > { %5103 = vst [vmem:[#allocation53_spill] sm:$0xff] %v3705_v18 }
 0x15f   : > { %v730_v34 = vrot.slane %v729_v19, 2  ;;  %v715_v35 = vadd.f32 %v714_v26, %v713_v16 }
 0x161   : > { %v562_v36 = vpop.xlane.xlu0 %561  ;;  %v716_v15 = vrot.slane %v715_v35, 2  ;;  %v731_v9 = vadd.f32 %v730_v34, %v729_v19  ;;  %v603_v19 = vsel %vm482_vm0, %v3433_v45, 0.0  ;;  %v604_v34 = vsel %vm482_vm0, %v3435_v46, 0.0 }
 0x162   : > { %v748_v43 = vsel %vm482_vm0, %v562_v36, 0.0 }
 0x163   : > { %v749_v44 = vrot.slane %v748_v43, 4  ;;  %v717_v24 = vadd.f32 %v716_v15, %v715_v35  ;;  %v552_v49 = vpop.xlane.xlu1 %551  ;;  %2422 = vperm.xlu2 %2916, %v2328_v52   ;;  %v732_v16 = vrot.slane %v731_v9, 1 }
 0x164   : > { %v734_v29 = vsel %vm482_vm0, %v552_v49, 0.0 }
 0x165   : > { %v750_v61 = vadd.f32 %v749_v44, %v748_v43  ;;  %v718_v23 = vrot.slane %v717_v24, 1  ;;  %v735_v10 = vrot.slane %v734_v29, 4  ;;  %v733_v35 = vadd.f32 %v732_v16, %v731_v9 }
 0x166   : > { %v746_v44 = vrot.slane %v745_v27, 1  ;;  %v618_v16 = vsel %vm482_vm0, %v3480_v0, 0.0 }
 0x167   : > { %v719_v26 = vadd.f32 %v718_v23, %v717_v24  ;;  %v736_v50 = vadd.f32 %v735_v10, %v734_v29  ;;  %v751_v51 = vrot.slane %v750_v61, 2  ;;  %v605_v29 = vadd.f32 %v604_v34, %v603_v19  ;;  %v3719_v23 = vld.sshfl [vmem:[#allocation1 + $0x8] sm:$0xff pattern:$0x73625140] }
 0x168   : > { %v879_v46 = vmul.f32 0.001953125, %v733_v35  ;;  %v3731_v35 = vld.sshfl [vmem:[#allocation1 + $0x20] sm:$0xff pattern:$0x73625140] }
 0x169   : > { %v877_v1 = vmul.f32 0.001953125, %v719_v26  ;;  %v737_v36 = vrot.slane %v736_v50, 2  ;;  %v752_v43 = vadd.f32 %v751_v51, %v750_v61  ;;  %v619_v26 = vsel %vm482_vm0, %v3482_v12, 0.0 }
 0x16a   : > { %v3726_v51 = vsub.f32 %v3299_v59, %v879_v46 }
 0x16b   : > { %v3712_v52 = vsub.f32 %v3264_v30, %v877_v1  ;;  %v738_v15 = vadd.f32 %v737_v36, %v736_v50  ;;  %v753_v30 = vrot.slane %v752_v43, 1  ;;  %v747_v1 = vadd.f32 %v746_v44, %v745_v27  ;;  %v3733_v27 = vld.sshfl [vmem:[#allocation1 + $0x28] sm:$0xff pattern:$0x73625140] }
 0x16c   : > { %5105 = vst [vmem:[#allocation55_spill] sm:$0xff] %v3726_v51  ;;  %v943_v59 = vmul.f32 %v3726_v51, %v3726_v51 }
 0x16d   : > { %5104 = vst [vmem:[#allocation54_spill] sm:$0xff] %v3712_v52  ;;  %v941_v24 = vmul.f32 %v3712_v52, %v3712_v52  ;;  %v739_v49 = vrot.slane %v738_v15, 1  ;;  %v572_v58 = vpop.xlane.xlu2 %571  ;;  %v754_v34 = vadd.f32 %v753_v30, %v752_v43  ;;  %v5108_v43 = vld [vmem:[#allocation20_spill] sm:$0xff]  ;;  %v633_v52 = vsel %vm482_vm0, %v3519_v13, 0.0 }
 0x16e   : > { %v762_v45 = vsel %vm482_vm0, %v572_v58, 0.0 }
 0x16f   : > { %v740_v9 = vadd.f32 %v739_v49, %v738_v15  ;;  %v763_v10 = vrot.slane %v762_v45, 4  ;;  %1026 = vst [vmem:[#allocation1] ss:$4 sm:$0xff] %v941_v24  ;;  %v881_v15 = vmul.f32 0.001953125, %v747_v1  ;;  %v620_v24 = vadd.f32 %v619_v26, %v618_v16 }
 0x171   : > { %v880_v50 = vmul.f32 0.001953125, %v740_v9  ;;  %v764_v61 = vadd.f32 %v763_v10, %v762_v45  ;;  %v882_v45 = vmul.f32 0.001953125, %v754_v34  ;;  %v5109_v9 = vld [vmem:[#allocation8_spill] sm:$0xff] }
 0x172   : > { %606 = vadd.xlane.f32.xlu0 %v605_v29  ;;  %v594_v29 = vsel %vm482_vm0, %v5108_v43, 0.0  ;;  %v3748_v10 = vsub.f32 %v5109_v9, %v881_v15 }
 0x173   : > { %v3729_v36 = vsub.f32 %v3317_v2, %v880_v50  ;;  %v765_v19 = vrot.slane %v764_v61, 2  ;;  %v5107_v2 = vld [vmem:[#allocation19_spill] sm:$0xff]  ;;  %v5111_v50 = vld [vmem:[#allocation10_spill] sm:$0xff] }
 0x174   : > { %v593_v58 = vsel %vm482_vm0, %v5107_v2, 0.0  ;;  %5110 = vst [vmem:[#allocation19_spill] sm:$0xff] %v3748_v10  ;;  %v945_v16 = vmul.f32 %v3748_v10, %v3748_v10 }
 0x175   : > { %5106 = vst [vmem:[#allocation56_spill] sm:$0xff] %v3729_v36  ;;  %v944_v44 = vmul.f32 %v3729_v36, %v3729_v36  ;;  %v766_v0 = vadd.f32 %v765_v19, %v764_v61  ;;  %v595_v1 = vadd.f32 %v594_v29, %v593_v58  ;;  %v3751_v61 = vsub.f32 %v5111_v50, %v882_v45  ;;  %v5113_v19 = vld [vmem:[#allocation25_spill] sm:$0xff]  ;;  %v5115_v58 = vld [vmem:[#allocation11_spill] sm:$0xff]  ;;  %v5117_v45 = vld [vmem:[#allocation36_spill] sm:$0xff] }
 0x176   : > { %v3737_v49 = vld.sshfl [vmem:[#allocation1] sm:$0xff pattern:$0x73625140]  ;;  %v3745_v46 = vld.sshfl [vmem:[#allocation1 + $0x8] sm:$0xff pattern:$0x73625140] }
 0x177   : > { %v767_v12 = vrot.slane %v766_v0, 1  ;;  %1035 = vst [vmem:[#allocation1 + $0x20] ss:$4 sm:$0xff] %v944_v44  ;;  %v608_v34 = vsel %vm482_vm0, %v5113_v19, 0.0  ;;  %v5114_v44 = vld [vmem:[#allocation26_spill] sm:$0xff]  ;;  %v628_v9 = vsel %vm482_vm0, %v5117_v45, 0.0 }
 0x178   : > { %1032 = vst [vmem:[#allocation1] ss:$4 sm:$0xff] %v943_v59  ;;  %v609_v2 = vsel %vm482_vm0, %v5114_v44, 0.0  ;;  %v2331_v45 = vld [vmem:[%s5007_s2 + $0x2e] sm:$0x3] }
 0x179   : > { %v768_v30 = vadd.f32 %v767_v12, %v766_v0  ;;  %5112 = vst [vmem:[#allocation20_spill] sm:$0xff] %v3751_v61  ;;  %v946_v0 = vmul.f32 %v3751_v61, %v3751_v61  ;;  %v610_v29 = vadd.f32 %v609_v2, %v608_v34  ;;  %v2326_v34 = vld [vmem:[%s5007_s2 + $0x24] sm:$0x3]  ;;  %v2334_v36 = vld [vmem:[%s5007_s2 + $0x34] sm:$0x3] }
 0x17a   : > { %621 = vadd.xlane.f32.xlu0 %v620_v24 }
 0x17b   : > { %v884_v26 = vmul.f32 0.001953125, %v768_v30  ;;  %v5118_v30 = vld [vmem:[#allocation37_spill] sm:$0xff]  ;;  %v3790_v2 = vpop.permute.xlu1 %2390 }
 0x17c   : > { %5120 = vst [vmem:[#allocation25_spill] sm:$0xff] %v3790_v2 }
 0x17d   : > { %v3770_v43 = vsub.f32 %v5115_v58, %v884_v26  ;;  %v3785_v26 = vpop.permute.xlu0 %2394 }
 0x17e   : > { %596 = vadd.xlane.f32.xlu1 %v595_v1  ;;  %v3759_v15 = vld.sshfl [vmem:[#allocation1 + $0x20] sm:$0xff pattern:$0x73625140]  ;;  %v3761_v24 = vld.sshfl [vmem:[#allocation1 + $0x28] sm:$0xff pattern:$0x73625140] }
 0x17f   : > { %v3765_v59 = vld.sshfl [vmem:[#allocation1] sm:$0xff pattern:$0x73625140]  ;;  %v3767_v12 = vld.sshfl [vmem:[#allocation1 + $0x8] sm:$0xff pattern:$0x73625140]  ;;  %v948_v50 = vmul.f32 %v3770_v43, %v3770_v43 }
 0x180   : > { %1038 = vst [vmem:[#allocation1] ss:$4 sm:$0xff] %v945_v16  ;;  %v629_v1 = vsel %vm482_vm0, %v5118_v30, 0.0  ;;  %v2327_v16 = vld [vmem:[%s5007_s2 + $0x26] sm:$0x3] }
 0x181   : > { %5116 = vst [vmem:[#allocation8_spill] sm:$0xff] %v3770_v43  ;;  %v630_v19 = vadd.f32 %v629_v1, %v628_v9  ;;  %v587_v9 = vpop.xlane.xlu2 %586 }
 0x182   : > { %1041 = vst [vmem:[#allocation1 + $0x20] ss:$4 sm:$0xff] %v946_v0  ;;  %v783_v30 = vsel %vm482_vm0, %v587_v9, 0.0 }
 0x183   : > { %5119 = vst [vmem:[#allocation10_spill] sm:$0xff] %v3785_v26 }
 0x186   : > { %611 = vadd.xlane.f32.xlu1 %v610_v29 }
 0x189   : > { %v3778_v44 = vld.sshfl [vmem:[#allocation1 + $0x20] sm:$0xff pattern:$0x73625140]  ;;  %v3780_v10 = vld.sshfl [vmem:[#allocation1 + $0x28] sm:$0xff pattern:$0x73625140] }
 0x18a   : > { %1047 = vst [vmem:[#allocation1 + $0x20] ss:$4 sm:$0xff] %v948_v50 }
 0x18c   : > { %631 = vadd.xlane.f32.xlu2 %v630_v19 }
 0x18e   : > { %2418 = vperm.xlu0 %2915, %v2327_v16   ;;  %v784_v16 = vrot.slane %v783_v30, 4 }
 0x190   : > { %v785_v5 = vadd.f32 %v784_v16, %v783_v30 }
 0x19f   : > { %v577_v0 = vpop.xlane.xlu0 %576  ;;  %2414 = vperm.xlu1 %2914, %v2326_v34  }
 0x1a0   : > { %v769_v58 = vsel %vm482_vm0, %v577_v0, 0.0 }
 0x1a1   : > { %v770_v29 = vrot.slane %v769_v58, 4 }
 0x1a3   : > { %v771_v1 = vadd.f32 %v770_v29, %v769_v58  ;;  %v3802_v29 = vpop.permute.xlu2 %2410 }
 0x1a4   : > { %2434 = vperm.xlu2 %2916, %v2331_v45   ;;  %5121 = vst [vmem:[#allocation26_spill] sm:$0xff] %v3802_v29 }
 0x1a5   : > { %v772_v34 = vrot.slane %v771_v1, 2 }
 0x1a6   : > { %v567_v50 = vpop.xlane.xlu1 %566 }
 0x1a7   : > { %v592_v19 = vpop.xlane.xlu0 %591  ;;  %v755_v43 = vsel %vm482_vm0, %v567_v50, 0.0  ;;  %v773_v58 = vadd.f32 %v772_v34, %v771_v1  ;;  %v786_v50 = vrot.slane %v785_v5, 2  ;;  %v5123_v34 = vld [vmem:[#allocation9_spill] sm:$0xff] }
 0x1a8   : > { %v790_v18 = vsel %vm482_vm0, %v592_v19, 0.0  ;;  %v756_v39 = vrot.slane %v755_v43, 4 }
 0x1a9   : > { %v791_v0 = vrot.slane %v790_v18, 4  ;;  %v787_v30 = vadd.f32 %v786_v50, %v785_v5 }
 0x1aa   : > { %v757_v26 = vadd.f32 %v756_v39, %v755_v43  ;;  %v634_v39 = vsel %vm482_vm0, %v5122_v42, 0.0  ;;  %v774_v43 = vrot.slane %v773_v58, 1 }
 0x1ab   : > { %v792_v9 = vadd.f32 %v791_v0, %v790_v18  ;;  %v635_v1 = vadd.f32 %v634_v39, %v633_v52  ;;  %v788_v40 = vrot.slane %v787_v30, 1  ;;  %v3815_v52 = vld.sshfl [vmem:[#allocation1] sm:$0xff pattern:$0x73625140] }
 0x1ac   : > { %v758_v25 = vrot.slane %v757_v26, 2  ;;  %2446 = vperm.xlu2 %2916, %v2334_v36   ;;  %v775_v0 = vadd.f32 %v774_v43, %v773_v58 }
 0x1ad   : > { %v793_v51 = vrot.slane %v792_v9, 2  ;;  %v789_v50 = vadd.f32 %v788_v40, %v787_v30 }
 0x1ae   : > { %v759_v45 = vadd.f32 %v758_v25, %v757_v26  ;;  %v582_v61 = vpop.xlane.xlu1 %581 }
 0x1af   : > { %v776_v19 = vsel %vm482_vm0, %v582_v61, 0.0  ;;  %v794_v25 = vadd.f32 %v793_v51, %v792_v9  ;;  %v885_v51 = vmul.f32 0.001953125, %v775_v0  ;;  %v3817_v9 = vld.sshfl [vmem:[#allocation1 + $0x8] sm:$0xff pattern:$0x73625140]  ;;  %v887_v0 = vmul.f32 0.001953125, %v789_v50 }
 0x1b0   : > { %v760_v60 = vrot.slane %v759_v45, 1  ;;  %v777_v2 = vrot.slane %v776_v19, 4  ;;  %v5132_v50 = vld [vmem:[#allocation16_spill] sm:$0xff] }
 0x1b2   : > { %v761_v18 = vadd.f32 %v760_v60, %v759_v45  ;;  %v778_v36 = vadd.f32 %v777_v2, %v776_v19  ;;  %v795_v60 = vrot.slane %v794_v25, 1 }
 0x1b4   : > { %v883_v16 = vmul.f32 0.001953125, %v761_v18  ;;  %v779_v26 = vrot.slane %v778_v36, 2  ;;  %v796_v19 = vadd.f32 %v795_v60, %v794_v25  ;;  %v5125_v18 = vld [vmem:[#allocation12_spill] sm:$0xff] }
 0x1b6   : > { %v3810_v61 = vsub.f32 %v5123_v34, %v883_v16  ;;  %v780_v29 = vadd.f32 %v779_v26, %v778_v36  ;;  %v602_v13 = vpop.xlane.xlu2 %601  ;;  %v3820_v36 = vsub.f32 %v5125_v18, %v885_v51  ;;  %v3825_v34 = vld.sshfl [vmem:[#allocation1 + $0x20] sm:$0xff pattern:$0x73625140]  ;;  %v5130_v51 = vld [vmem:[#allocation13_spill] sm:$0xff] }
 0x1b7   : > { %v804_v28 = vsel %vm482_vm0, %v602_v13, 0.0  ;;  %v3827_v13 = vld.sshfl [vmem:[#allocation1 + $0x28] sm:$0xff pattern:$0x73625140] }
 0x1b8   : > { %5124 = vst [vmem:[#allocation11_spill] sm:$0xff] %v3810_v61  ;;  %636 = vadd.xlane.f32.xlu0 %v635_v1  ;;  %v947_v42 = vmul.f32 %v3810_v61, %v3810_v61  ;;  %v781_v2 = vrot.slane %v780_v29, 1  ;;  %v805_v5 = vrot.slane %v804_v28, 4  ;;  %v5126_v1 = vld [vmem:[#allocation14_spill] sm:$0xff]  ;;  %v888_v61 = vmul.f32 0.001953125, %v796_v19 }
 0x1ba   : > { %v782_v58 = vadd.f32 %v781_v2, %v780_v29  ;;  %v806_v45 = vadd.f32 %v805_v5, %v804_v28  ;;  %1044 = vst [vmem:[#allocation1] ss:$4 sm:$0xff] %v947_v42  ;;  %v949_v29 = vmul.f32 %v3820_v36, %v3820_v36  ;;  %v5128_v42 = vld [vmem:[#allocation30_spill] sm:$0xff]  ;;  %v5129_v2 = vld [vmem:[#allocation31_spill] sm:$0xff]  ;;  %v3845_v19 = vsub.f32 %v5132_v50, %v888_v61 }
 0x1bb   : > { %v623_v60 = vsel %vm482_vm0, %v5128_v42, 0.0  ;;  %v624_v5 = vsel %vm482_vm0, %v5129_v2, 0.0  ;;  %v638_v61 = vsel %vm482_vm0, %v3534_v31, 0.0  ;;  %v1156_v31 = vsel %vm482_vm0, %v3547_v21, 0.0 }
 0x1bc   : > { %v886_v39 = vmul.f32 0.001953125, %v782_v58  ;;  %v807_v43 = vrot.slane %v806_v45, 2  ;;  %v3842_v58 = vsub.f32 %v5130_v51, %v887_v0  ;;  %5133 = vst [vmem:[#allocation41_spill] sm:$0xff] %v3845_v19  ;;  %v2333_v51 = vld [vmem:[%s5007_s2 + $0x32] sm:$0x3]  ;;  %v1172_v21 = vsel %vm482_vm0, %v3586_v17, 0.0 }
 0x1bd   : > { %v1201_v17 = vsel %vm482_vm0, %v3675_v37, 0.0  ;;  %v2332_v37 = vld [vmem:[%s5007_s2 + $0x30] sm:$0x3] }
 0x1be   : > { %v3823_v16 = vsub.f32 %v5126_v1, %v886_v39  ;;  %v808_v26 = vadd.f32 %v807_v43, %v806_v45  ;;  %5131 = vst [vmem:[#allocation37_spill] sm:$0xff] %v3842_v58  ;;  %v625_v39 = vadd.f32 %v624_v5, %v623_v60  ;;  %v951_v43 = vmul.f32 %v3842_v58, %v3842_v58  ;;  %v2330_v1 = vld [vmem:[%s5007_s2 + $0x2c] sm:$0x3]  ;;  %v5134_v60 = vld [vmem:[#allocation18_spill] sm:$0xff] }
 0x1c0   : > { %5127 = vst [vmem:[#allocation36_spill] sm:$0xff] %v3823_v16  ;;  %v950_v28 = vmul.f32 %v3823_v16, %v3823_v16  ;;  %v809_v40 = vrot.slane %v808_v26, 1 }
 0x1c1   : > { %v3833_v30 = vld.sshfl [vmem:[#allocation1] sm:$0xff pattern:$0x73625140]  ;;  %v3835_v25 = vld.sshfl [vmem:[#allocation1 + $0x8] sm:$0xff pattern:$0x73625140] }
 0x1c2   : > { %1053 = vst [vmem:[#allocation1 + $0x20] ss:$4 sm:$0xff] %v950_v28  ;;  %v810_v45 = vadd.f32 %v809_v40, %v808_v26  ;;  %v952_v28 = vmul.f32 %v3845_v19, %v3845_v19  ;;  %v639_v26 = vsel %vm482_vm0, %v3539_v33, 0.0  ;;  %v1157_v33 = vsel %vm482_vm0, %v3551_v57, 0.0  ;;  %v3886_v57 = vpop.permute.xlu0 %2406 }
 0x1c3   : > { %1050 = vst [vmem:[#allocation1] ss:$4 sm:$0xff] %v949_v29  ;;  %v640_v5 = vadd.f32 %v639_v26, %v638_v61  ;;  %v1158_v50 = vadd.f32 %v1157_v33, %v1156_v31  ;;  %v1187_v61 = vsel %vm482_vm0, %v3658_v48, 0.0  ;;  %v617_v31 = vpop.xlane.xlu2 %616 }
 0x1c4   : > { %v890_v18 = vmul.f32 0.001953125, %v810_v45  ;;  %v825_v33 = vsel %vm482_vm0, %v617_v31, 0.0 }
 0x1c6   : > { %v3867_v2 = vsub.f32 %v5134_v60, %v890_v18  ;;  %v1171_v18 = vsel %vm482_vm0, %v3584_v8, 0.0  ;;  %v2329_v8 = vld [vmem:[%s5007_s2 + $0x2a] sm:$0x3] }
 0x1c8   : > { %5135 = vst [vmem:[#allocation9_spill] sm:$0xff] %v3867_v2  ;;  %v954_v45 = vmul.f32 %v3867_v2, %v3867_v2 }
 0x1c9   : > { %626 = vadd.xlane.f32.xlu1 %v625_v39  ;;  %v3854_v29 = vld.sshfl [vmem:[#allocation1 + $0x20] sm:$0xff pattern:$0x73625140]  ;;  %v3856_v0 = vld.sshfl [vmem:[#allocation1 + $0x28] sm:$0xff pattern:$0x73625140] }
 0x1ca   : > { %v3862_v40 = vld.sshfl [vmem:[#allocation1] sm:$0xff pattern:$0x73625140]  ;;  %v3864_v42 = vld.sshfl [vmem:[#allocation1 + $0x8] sm:$0xff pattern:$0x73625140] }
 0x1cb   : > { %1059 = vst [vmem:[#allocation1 + $0x20] ss:$4 sm:$0xff] %v952_v28  ;;  %v1186_v28 = vsel %vm482_vm0, %v3653_v38, 0.0 }
 0x1cc   : > { %2430 = vperm.xlu0 %2915, %v2330_v1   ;;  %1056 = vst [vmem:[#allocation1] ss:$4 sm:$0xff] %v951_v43  ;;  %v1173_v1 = vadd.f32 %v1172_v21, %v1171_v18  ;;  %v1188_v26 = vadd.f32 %v1187_v61, %v1186_v28 }
 0x1d1   : > { %641 = vadd.xlane.f32.xlu1 %v640_v5  ;;  %v1202_v5 = vsel %vm482_vm0, %v3677_v14, 0.0  ;;  %v1216_v14 = vsel %vm482_vm0, %v3765_v59, 0.0 }
 0x1d2   : > { %v3878_v39 = vld.sshfl [vmem:[#allocation1 + $0x20] sm:$0xff pattern:$0x73625140]  ;;  %v3880_v43 = vld.sshfl [vmem:[#allocation1 + $0x28] sm:$0xff pattern:$0x73625140]  ;;  %v1203_v48 = vadd.f32 %v1202_v5, %v1201_v17 }
 0x1d3   : > { %1065 = vst [vmem:[#allocation1 + $0x20] ss:$4 sm:$0xff] %v954_v45 }
 0x1d4   : > { %2442 = vperm.xlu0 %2915, %v2333_v51   ;;  %v3899_v51 = vpop.permute.xlu1 %2402 }
 0x1d5   : > { %1159 = vadd.xlane.f32.xlu2 %v1158_v50  ;;  %v826_v50 = vrot.slane %v825_v33, 4 }
 0x1dd   : > { %1174 = vadd.xlane.f32.xlu2 %v1173_v1  ;;  %v1217_v1 = vsel %vm482_vm0, %v3767_v12, 0.0  ;;  %v2335_v12 = vld [vmem:[%s5007_s2 + $0x36] sm:$0x3] }
 0x1de   : > { %v1218_v17 = vadd.f32 %v1217_v1, %v1216_v14  ;;  %v1232_v14 = vsel %vm482_vm0, %v3780_v10, 0.0 }
 0x1e5   : > { %v607_v60 = vpop.xlane.xlu0 %606  ;;  %1189 = vadd.xlane.f32.xlu2 %v1188_v26 }
 0x1e6   : > { %v811_v38 = vsel %vm482_vm0, %v607_v60, 0.0  ;;  %v827_v60 = vadd.f32 %v826_v50, %v825_v33  ;;  %v1162_v33 = vsel %vm482_vm0, %v3569_v7, 0.0 }
 0x1e7   : > { %v812_v45 = vrot.slane %v811_v38, 4 }
 0x1e9   : > { %v813_v21 = vadd.f32 %v812_v45, %v811_v38  ;;  %v828_v38 = vrot.slane %v827_v60, 2  ;;  %v3912_v45 = vpop.permute.xlu2 %2422 }
 0x1ea   : > { %2426 = vperm.xlu1 %2914, %v2329_v8   ;;  %5136 = vst [vmem:[#allocation12_spill] sm:$0xff] %v3912_v45 }
 0x1eb   : > { %v814_v5 = vrot.slane %v813_v21, 2  ;;  %v829_v2 = vadd.f32 %v828_v38, %v827_v60  ;;  %v1247_v60 = vsel %vm482_vm0, %v3864_v42, 0.0 }
 0x1ed   : > { %1204 = vadd.xlane.f32.xlu2 %v1203_v48  ;;  %v622_v18 = vpop.xlane.xlu0 %621  ;;  %v815_v50 = vadd.f32 %v814_v5, %v813_v21 }
 0x1ee   : > { %v832_v61 = vsel %vm482_vm0, %v622_v18, 0.0  ;;  %v1161_v18 = vsel %vm482_vm0, %v3567_v32, 0.0 }
 0x1ef   : > { %v833_v31 = vrot.slane %v832_v61, 4  ;;  %v816_v16 = vrot.slane %v815_v50, 1 }
 0x1f1   : > { %v597_v28 = vpop.xlane.xlu1 %596  ;;  %v834_v1 = vadd.f32 %v833_v31, %v832_v61  ;;  %v817_v31 = vadd.f32 %v816_v16, %v815_v50  ;;  %v3936_v50 = vld.sshfl [vmem:[#allocation1] sm:$0xff pattern:$0x73625140] }
 0x1f2   : > { %v797_v26 = vsel %vm482_vm0, %v597_v28, 0.0  ;;  %2438 = vperm.xlu1 %2914, %v2332_v37   ;;  %v1231_v37 = vsel %vm482_vm0, %v3778_v44, 0.0  ;;  %v830_v44 = vrot.slane %v829_v2, 1 }
 0x1f3   : > { %v798_v8 = vrot.slane %v797_v26, 4  ;;  %v1233_v45 = vadd.f32 %v1232_v14, %v1231_v37  ;;  %v835_v7 = vrot.slane %v834_v1, 2 }
 0x1f5   : > { %v799_v48 = vadd.f32 %v798_v8, %v797_v26  ;;  %1219 = vadd.xlane.f32.xlu2 %v1218_v17  ;;  %v1163_v17 = vadd.f32 %v1162_v33, %v1161_v18  ;;  %v836_v38 = vadd.f32 %v835_v7, %v834_v1 }
 0x1f7   : > { %v800_v59 = vrot.slane %v799_v48, 2 }
 0x1f9   : > { %v801_v28 = vadd.f32 %v800_v59, %v799_v48  ;;  %v612_v26 = vpop.xlane.xlu1 %611  ;;  %v1246_v59 = vsel %vm482_vm0, %v3862_v40, 0.0  ;;  %v831_v40 = vadd.f32 %v830_v44, %v829_v2  ;;  %v3950_v44 = vld.sshfl [vmem:[#allocation1 + $0x20] sm:$0xff pattern:$0x73625140] }
 0x1fa   : > { %v818_v8 = vsel %vm482_vm0, %v612_v26, 0.0  ;;  %2450 = vperm.xlu1 %2914, %v2335_v12   ;;  %v5137_v12 = vld [vmem:[#allocation15_spill] sm:$0xff]  ;;  %v1248_v16 = vadd.f32 %v1247_v60, %v1246_v59  ;;  %v3938_v26 = vld.sshfl [vmem:[#allocation1 + $0x8] sm:$0xff pattern:$0x73625140] }
 0x1fb   : > { %v802_v58 = vrot.slane %v801_v28, 1  ;;  %v819_v32 = vrot.slane %v818_v8, 4 }
 0x1fd   : > { %v803_v21 = vadd.f32 %v802_v58, %v801_v28  ;;  %v820_v5 = vadd.f32 %v819_v32, %v818_v8  ;;  %1234 = vadd.xlane.f32.xlu2 %v1233_v45  ;;  %v891_v28 = vmul.f32 0.001953125, %v817_v31  ;;  %v837_v8 = vrot.slane %v836_v38, 1  ;;  %v5138_v32 = vld [vmem:[#allocation17_spill] sm:$0xff]  ;;  %v5139_v31 = vld [vmem:[#allocation22_spill] sm:$0xff] }
 0x1fe   : > { %1164 = vadd.xlane.f32.xlu0 %v1163_v17 }
 0x1ff   : > { %v889_v19 = vmul.f32 0.001953125, %v803_v21  ;;  %v821_v10 = vrot.slane %v820_v5, 2  ;;  %v632_v61 = vpop.xlane.xlu2 %631  ;;  %v3941_v7 = vsub.f32 %v5138_v32, %v891_v28  ;;  %v1261_v21 = vsel %vm482_vm0, %v3878_v39, 0.0 }
 0x200   : > { %v846_v48 = vsel %vm482_vm0, %v632_v61, 0.0  ;;  %v838_v61 = vadd.f32 %v837_v8, %v836_v38 }
 0x201   : > { %v3932_v18 = vsub.f32 %v5137_v12, %v889_v19  ;;  %v822_v58 = vadd.f32 %v821_v10, %v820_v5  ;;  %v847_v45 = vrot.slane %v846_v48, 4  ;;  %v1262_v5 = vsel %vm482_vm0, %v3880_v43, 0.0 }
 0x202   : > { %v893_v10 = vmul.f32 0.001953125, %v831_v40  ;;  %v1263_v12 = vadd.f32 %v1262_v5, %v1261_v21  ;;  %v955_v39 = vmul.f32 %v3941_v7, %v3941_v7  ;;  %v894_v38 = vmul.f32 0.001953125, %v838_v61 }
 0x203   : > { %v953_v33 = vmul.f32 %v3932_v18, %v3932_v18  ;;  %v823_v37 = vrot.slane %v822_v58, 1  ;;  %v848_v14 = vadd.f32 %v847_v45, %v846_v48  ;;  %v3952_v48 = vld.sshfl [vmem:[#allocation1 + $0x28] sm:$0xff pattern:$0x73625140]  ;;  %v5141_v45 = vld [vmem:[#allocation21_spill] sm:$0xff] }
 0x205   : > { %v824_v42 = vadd.f32 %v823_v37, %v822_v58  ;;  %v849_v1 = vrot.slane %v848_v14, 2  ;;  %1249 = vadd.xlane.f32.xlu2 %v1248_v16  ;;  %1062 = vst [vmem:[#allocation1] ss:$4 sm:$0xff] %v953_v33  ;;  %v3963_v33 = vsub.f32 %v5141_v45, %v893_v10  ;;  %v2336_v37 = vld [vmem:[%s5007_s2 + $0x38] sm:$0x3]  ;;  %v5143_v16 = vld [vmem:[#allocation24_spill] sm:$0xff] }
 0x206   : > { %v3969_v28 = vsub.f32 %v5143_v16, %v894_v38  ;;  %v5144_v10 = vld [vmem:[#allocation28_spill] sm:$0xff]  ;;  %v1166_v45 = vsel %vm482_vm0, %v3575_v63, 0.0  ;;  %v1196_v63 = vsel %vm482_vm0, %v3716_v3, 0.0  ;;  %v1211_v3 = vsel %vm482_vm0, %v3731_v35, 0.0 }
 0x207   : > { %v892_v19 = vmul.f32 0.001953125, %v824_v42  ;;  %v850_v17 = vadd.f32 %v849_v1, %v848_v14  ;;  %5142 = vst [vmem:[#allocation30_spill] sm:$0xff] %v3963_v33  ;;  %v957_v40 = vmul.f32 %v3963_v33, %v3963_v33  ;;  %v1226_v35 = vsel %vm482_vm0, %v3815_v52, 0.0 }
 0x208   : > { %v1206_v52 = vsel %vm482_vm0, %v3737_v49, 0.0 }
 0x209   : > { %v3948_v2 = vsub.f32 %v5139_v31, %v892_v19  ;;  %v851_v60 = vrot.slane %v850_v17, 1  ;;  %v958_v19 = vmul.f32 %v3969_v28, %v3969_v28 }
 0x20b   : > { %5140 = vst [vmem:[#allocation14_spill] sm:$0xff] %v3948_v2  ;;  %v956_v59 = vmul.f32 %v3948_v2, %v3948_v2  ;;  %v852_v14 = vadd.f32 %v851_v60, %v850_v17 }
 0x20c   : > { %v3958_v58 = vld.sshfl [vmem:[#allocation1] sm:$0xff pattern:$0x73625140]  ;;  %v3960_v43 = vld.sshfl [vmem:[#allocation1 + $0x8] sm:$0xff pattern:$0x73625140] }
 0x20d   : > { %1071 = vst [vmem:[#allocation1 + $0x20] ss:$4 sm:$0xff] %v956_v59  ;;  %1264 = vadd.xlane.f32.xlu2 %v1263_v12  ;;  %v896_v8 = vmul.f32 0.001953125, %v852_v14 }
 0x20e   : > { %1068 = vst [vmem:[#allocation1] ss:$4 sm:$0xff] %v955_v39 }
 0x20f   : > { %v3982_v61 = vsub.f32 %v5144_v10, %v896_v8  ;;  %v1182_v8 = vsel %vm482_vm0, %v3639_v22, 0.0 }
 0x211   : > { %5145 = vst [vmem:[#allocation31_spill] sm:$0xff] %v3982_v61  ;;  %v960_v59 = vmul.f32 %v3982_v61, %v3982_v61  ;;  %v4003_v10 = vpop.permute.xlu1 %2414 }
 0x212   : > { %2454 = vperm.xlu0 %2915, %v2336_v37   ;;  %v1167_v37 = vsel %vm482_vm0, %v3577_v6, 0.0  ;;  %v1197_v6 = vsel %vm482_vm0, %v3719_v23, 0.0  ;;  %v1212_v23 = vsel %vm482_vm0, %v3733_v27, 0.0  ;;  %v1227_v27 = vsel %vm482_vm0, %v3817_v9, 0.0 }
 0x213   : > { %v1168_v16 = vadd.f32 %v1167_v37, %v1166_v45  ;;  %v1207_v9 = vsel %vm482_vm0, %v3745_v46, 0.0  ;;  %v5148_v46 = vld [vmem:[#allocation23_spill] sm:$0xff] }
 0x214   : > { %v3973_v42 = vld.sshfl [vmem:[#allocation1 + $0x20] sm:$0xff pattern:$0x73625140]  ;;  %v3975_v1 = vld.sshfl [vmem:[#allocation1 + $0x28] sm:$0xff pattern:$0x73625140] }
 0x215   : > { %v1069_v32 = vld.sshfl [vmem:[#allocation1] sm:$0xff pattern:$0x73625140]  ;;  %v1070_v21 = vld.sshfl [vmem:[#allocation1 + $0x8] sm:$0xff pattern:$0x73625140] }
 0x216   : > { %v1276_v5 = vsel %vm482_vm0, %v1069_v32, 0.0  ;;  %v1277_v17 = vsel %vm482_vm0, %v1070_v21, 0.0  ;;  %1074 = vst [vmem:[#allocation1] ss:$4 sm:$0xff] %v957_v40  ;;  %v1181_v40 = vsel %vm482_vm0, %v3637_v56, 0.0  ;;  %v4005_v56 = vpop.permute.xlu2 %2434 }
 0x217   : > { %v1278_v31 = vadd.f32 %v1277_v17, %v1276_v5  ;;  %1077 = vst [vmem:[#allocation1 + $0x20] ss:$4 sm:$0xff] %v958_v19  ;;  %v3996_v19 = vpop.permute.xlu0 %2418  ;;  %v1183_v32 = vadd.f32 %v1182_v8, %v1181_v40  ;;  %v1198_v5 = vadd.f32 %v1197_v6, %v1196_v63  ;;  %v1228_v6 = vadd.f32 %v1227_v27, %v1226_v35 }
 0x218   : > { %5146 = vst [vmem:[#allocation13_spill] sm:$0xff] %v4005_v56  ;;  %v1257_v35 = vsel %vm482_vm0, %v3938_v26, 0.0  ;;  %v1221_v27 = vsel %vm482_vm0, %v3759_v15, 0.0  ;;  %v5150_v26 = vld [vmem:[#allocation27_spill] sm:$0xff] }
 0x219   : > { %1279 = vadd.xlane.f32.xlu2 %v1278_v31  ;;  %v1176_v31 = vsel %vm482_vm0, %v3620_v47, 0.0  ;;  %v1191_v47 = vsel %vm482_vm0, %v3662_v62, 0.0 }
 0x21e   : > { %v1078_v60 = vld.sshfl [vmem:[#allocation1 + $0x20] sm:$0xff pattern:$0x73625140]  ;;  %v1079_v12 = vld.sshfl [vmem:[#allocation1 + $0x28] sm:$0xff pattern:$0x73625140] }
 0x21f   : > { %v1291_v39 = vsel %vm482_vm0, %v1078_v60, 0.0  ;;  %v1292_v38 = vsel %vm482_vm0, %v1079_v12, 0.0  ;;  %1083 = vst [vmem:[#allocation1 + $0x20] ss:$4 sm:$0xff] %v960_v59  ;;  %v1177_v59 = vsel %vm482_vm0, %v3624_v20, 0.0  ;;  %v1192_v20 = vsel %vm482_vm0, %v3664_v55, 0.0 }
 0x220   : > { %v1293_v14 = vadd.f32 %v1292_v38, %v1291_v39  ;;  %v1178_v60 = vadd.f32 %v1177_v59, %v1176_v31  ;;  %v1213_v39 = vadd.f32 %v1212_v23, %v1211_v3  ;;  %v1193_v8 = vadd.f32 %v1192_v20, %v1191_v47 }
 0x221   : > { %v1241_v55 = vsel %vm482_vm0, %v3825_v34, 0.0  ;;  %v1242_v31 = vsel %vm482_vm0, %v3827_v13, 0.0  ;;  %v1256_v13 = vsel %vm482_vm0, %v3936_v50, 0.0 }
 0x222   : > { %1294 = vadd.xlane.f32.xlu2 %v1293_v14  ;;  %v1243_v34 = vadd.f32 %v1242_v31, %v1241_v55 }
 0x224   : > { %1169 = vadd.xlane.f32.xlu1 %v1168_v16  ;;  %v4024_v16 = vpop.permute.xlu2 %2446 }
 0x225   : > { %5147 = vst [vmem:[#allocation16_spill] sm:$0xff] %v4024_v16 }
 0x22b   : > { %v637_v21 = vpop.xlane.xlu0 %636 }
 0x22c   : > { %1184 = vadd.xlane.f32.xlu1 %v1183_v32  ;;  %v853_v17 = vsel %vm482_vm0, %v637_v21, 0.0 }
 0x22d   : > { %v854_v22 = vrot.slane %v853_v17, 4 }
 0x22f   : > { %v855_v12 = vadd.f32 %v854_v22, %v853_v17 }
 0x231   : > { %v856_v37 = vrot.slane %v855_v12, 2 }
 0x233   : > { %v857_v32 = vadd.f32 %v856_v37, %v855_v12 }
 0x234   : > { %1199 = vadd.xlane.f32.xlu1 %v1198_v5 }
 0x235   : > { %v858_v17 = vrot.slane %v857_v32, 1 }
 0x23c   : > { %1179 = vadd.xlane.f32.xlu0 %v1178_v60  ;;  %v627_v38 = vpop.xlane.xlu1 %626  ;;  %1214 = vadd.xlane.f32.xlu1 %v1213_v39  ;;  %v1208_v39 = vadd.f32 %v1207_v9, %v1206_v52 }
 0x23d   : > { %v839_v45 = vsel %vm482_vm0, %v627_v38, 0.0  ;;  %v859_v38 = vadd.f32 %v858_v17, %v857_v32 }
 0x23e   : > { %v840_v14 = vrot.slane %v839_v45, 4 }
 0x240   : > { %v841_v40 = vadd.f32 %v840_v14, %v839_v45 }
 0x242   : > { %v842_v63 = vrot.slane %v841_v40, 2 }
 0x244   : > { %1194 = vadd.xlane.f32.xlu0 %v1193_v8  ;;  %v843_v21 = vadd.f32 %v842_v63, %v841_v40  ;;  %1229 = vadd.xlane.f32.xlu1 %v1228_v6  ;;  %v642_v62 = vpop.xlane.xlu1 %641  ;;  %v1222_v40 = vsel %vm482_vm0, %v3761_v24, 0.0  ;;  %v897_v8 = vmul.f32 0.001953125, %v859_v38  ;;  %v5152_v24 = vld [vmem:[#allocation34_spill] sm:$0xff]  ;;  %v1084_v38 = vld.sshfl [vmem:[#allocation1 + $0x20] sm:$0xff pattern:$0x73625140] }
 0x245   : > { %v860_v5 = vsel %vm482_vm0, %v642_v62, 0.0  ;;  %v1076_v62 = vld.sshfl [vmem:[#allocation1 + $0x8] sm:$0xff pattern:$0x73625140]  ;;  %v1223_v9 = vadd.f32 %v1222_v40, %v1221_v27 }
 0x246   : > { %v844_v22 = vrot.slane %v843_v21, 1  ;;  %v861_v59 = vrot.slane %v860_v5, 4  ;;  %v1287_v40 = vsel %vm482_vm0, %v1076_v62, 0.0  ;;  %v1301_v62 = vsel %vm482_vm0, %v1084_v38, 0.0 }
 0x248   : > { %v845_v3 = vadd.f32 %v844_v22, %v843_v21  ;;  %v1160_v23 = vpop.xlane.xlu2 %1159  ;;  %v862_v60 = vadd.f32 %v861_v59, %v860_v5  ;;  %v1075_v21 = vld.sshfl [vmem:[#allocation1] sm:$0xff pattern:$0x73625140]  ;;  %v4050_v5 = vsub.f32 %v5150_v26, %v897_v8  ;;  %v1258_v22 = vadd.f32 %v1257_v35, %v1256_v13  ;;  %v4074_v13 = vpop.permute.xlu0 %2430 }
 0x249   : > { %v1316_v12 = vsel %vm482_vm0, %v1160_v23, 0.0  ;;  %v1271_v59 = vsel %vm482_vm0, %v3950_v44, 0.0  ;;  %v1236_v23 = vsel %vm482_vm0, %v3833_v30, 0.0  ;;  %v1286_v27 = vsel %vm482_vm0, %v1075_v21, 0.0 }
 0x24a   : > { %v895_v49 = vmul.f32 0.001953125, %v845_v3  ;;  %v1317_v45 = vrot.slane %v1316_v12, 4  ;;  %v863_v37 = vrot.slane %v862_v60, 2  ;;  %5151 = vst [vmem:[#allocation15_spill] sm:$0xff] %v4050_v5  ;;  %v1272_v3 = vsel %vm482_vm0, %v3952_v48, 0.0 }
 0x24b   : > { %v1252_v8 = vsel %vm482_vm0, %v3856_v0, 0.0  ;;  %v1288_v26 = vadd.f32 %v1287_v40, %v1286_v27 }
 0x24c   : > { %1209 = vadd.xlane.f32.xlu0 %v1208_v39  ;;  %v4037_v14 = vsub.f32 %v5148_v46, %v895_v49  ;;  %v1318_v47 = vadd.f32 %v1317_v45, %v1316_v12  ;;  %1244 = vadd.xlane.f32.xlu1 %v1243_v34  ;;  %v864_v20 = vadd.f32 %v863_v37, %v862_v60  ;;  %v1237_v60 = vsel %vm482_vm0, %v3835_v25, 0.0  ;;  %v1085_v49 = vld.sshfl [vmem:[#allocation1 + $0x28] sm:$0xff pattern:$0x73625140] }
 0x24d   : > { %v961_v12 = vmul.f32 %v4050_v5, %v4050_v5  ;;  %v1238_v37 = vadd.f32 %v1237_v60, %v1236_v23  ;;  %v1273_v46 = vadd.f32 %v1272_v3, %v1271_v59  ;;  %v1302_v0 = vsel %vm482_vm0, %v1085_v49, 0.0 }
 0x24e   : > { %5149 = vst [vmem:[#allocation18_spill] sm:$0xff] %v4037_v14  ;;  %v959_v32 = vmul.f32 %v4037_v14, %v4037_v14  ;;  %v1319_v63 = vrot.slane %v1318_v47, 2  ;;  %v865_v6 = vrot.slane %v864_v20, 1  ;;  %v1303_v23 = vadd.f32 %v1302_v0, %v1301_v62 }
 0x250   : > { %v1320_v55 = vadd.f32 %v1319_v63, %v1318_v47  ;;  %v1175_v52 = vpop.xlane.xlu2 %1174  ;;  %v866_v50 = vadd.f32 %v865_v6, %v864_v20  ;;  %1080 = vst [vmem:[#allocation1] ss:$4 sm:$0xff] %v959_v32  ;;  %v1251_v20 = vsel %vm482_vm0, %v3854_v29, 0.0  ;;  %v4093_v59 = vpop.permute.xlu0 %2442 }
 0x251   : > { %v1337_v25 = vsel %vm482_vm0, %v1175_v52, 0.0 }
 0x252   : > { %v1321_v15 = vrot.slane %v1320_v55, 1  ;;  %v898_v17 = vmul.f32 0.001953125, %v866_v50  ;;  %v1338_v47 = vrot.slane %v1337_v25, 4 }
 0x254   : > { %1224 = vadd.xlane.f32.xlu0 %v1223_v9  ;;  %v4053_v31 = vsub.f32 %v5152_v24, %v898_v17  ;;  %1259 = vadd.xlane.f32.xlu1 %v1258_v22  ;;  %v1322_v34 = vadd.f32 %v1321_v15, %v1320_v55  ;;  %v1339_v50 = vadd.f32 %v1338_v47, %v1337_v25  ;;  %v1266_v17 = vsel %vm482_vm0, %v3958_v58, 0.0 }
 0x255   : > { %v1253_v9 = vadd.f32 %v1252_v8, %v1251_v20  ;;  %v1267_v22 = vsel %vm482_vm0, %v3960_v43, 0.0 }
 0x256   : > { %5153 = vst [vmem:[#allocation17_spill] sm:$0xff] %v4053_v31  ;;  %v962_v39 = vmul.f32 %v4053_v31, %v4053_v31  ;;  %v1540_v30 = vmul.f32 0.001953125, %v1322_v34  ;;  %v1340_v21 = vrot.slane %v1339_v50, 2 }
 0x257   : > { %v4067_v45 = vld.sshfl [vmem:[#allocation1] sm:$0xff pattern:$0x73625140]  ;;  %v4069_v44 = vld.sshfl [vmem:[#allocation1 + $0x8] sm:$0xff pattern:$0x73625140] }
 0x258   : > { %v1190_v48 = vpop.xlane.xlu2 %1189  ;;  %1086 = vst [vmem:[#allocation1] ss:$4 sm:$0xff] %v961_v12  ;;  %v4076_v35 = vadd.f32 1e-06, %v1540_v30  ;;  %v1341_v12 = vadd.f32 %v1340_v21, %v1339_v50  ;;  %v1282_v30 = vsel %vm482_vm0, %v3975_v1, 0.0  ;;  %v1296_v1 = vsel %vm482_vm0, %v4067_v45, 0.0 }
 0x259   : > { %1089 = vst [vmem:[#allocation1 + $0x20] ss:$4 sm:$0xff] %v962_v39  ;;  %v1358_v15 = vsel %vm482_vm0, %v1190_v48, 0.0  ;;  %v1268_v39 = vadd.f32 %v1267_v22, %v1266_v17  ;;  %v1297_v0 = vsel %vm482_vm0, %v4069_v44, 0.0 }
 0x25a   : > { %2917 = vrsqrt.f32 %v4076_v35  ;;  %v1359_v34 = vrot.slane %v1358_v15, 4  ;;  %v1342_v43 = vrot.slane %v1341_v12, 1  ;;  %vm1610_vm1 = vweird.f32 %v4076_v35 }
 0x25c   : > { %1239 = vadd.xlane.f32.xlu0 %v1238_v37  ;;  %1274 = vadd.xlane.f32.xlu1 %v1273_v46  ;;  %v1360_v48 = vadd.f32 %v1359_v34, %v1358_v15  ;;  %v1281_v37 = vsel %vm482_vm0, %v3973_v42, 0.0  ;;  %v1343_v8 = vadd.f32 %v1342_v43, %v1341_v12 }
 0x25d   : > { %v1283_v27 = vadd.f32 %v1282_v30, %v1281_v37  ;;  %v4114_v37 = vpop.permute.xlu1 %2426 }
 0x25f   : > { %v1087_v32 = vld.sshfl [vmem:[#allocation1] sm:$0xff pattern:$0x73625140]  ;;  %v1088_v63 = vld.sshfl [vmem:[#allocation1 + $0x8] sm:$0xff pattern:$0x73625140] }
 0x260   : > { %v1205_v6 = vpop.xlane.xlu2 %1204  ;;  %v1306_v55 = vsel %vm482_vm0, %v1087_v32, 0.0  ;;  %v1307_v52 = vsel %vm482_vm0, %v1088_v63, 0.0  ;;  %v4095_v60 = vpop.eup %2917  ;;  %v1361_v32 = vrot.slane %v1360_v48, 2  ;;  %v1091_v30 = vld.sshfl [vmem:[#allocation1 + $0x28] sm:$0xff pattern:$0x73625140] }
 0x261   : > { %v1308_v29 = vadd.f32 %v1307_v52, %v1306_v55  ;;  %v1379_v24 = vsel %vm482_vm0, %v1205_v6, 0.0  ;;  %v1605_v49 = vmul.f32 %v4095_v60, %v4076_v35  ;;  %vm1611_vm2 = vweird.f32 %v4095_v60 }
 0x262   : > { %v1380_v38 = vrot.slane %v1379_v24, 4  ;;  %v1362_v21 = vadd.f32 %v1361_v32, %v1360_v48  ;;  %v1090_v48 = vld.sshfl [vmem:[#allocation1 + $0x20] sm:$0xff pattern:$0x73625140]  ;;  %vm4122_vm3 = vmor %vm1610_vm1, %vm1611_vm2 }
 0x263   : > { %1309 = vadd.xlane.f32.xlu2 %v1308_v29  ;;  %v1606_v40 = vmul.f32 %v4095_v60, %v1605_v49 }
 0x264   : > { %1254 = vadd.xlane.f32.xlu0 %v1253_v9  ;;  %1289 = vadd.xlane.f32.xlu1 %v1288_v26  ;;  %v1381_v25 = vadd.f32 %v1380_v38, %v1379_v24  ;;  %v1543_v26 = vmul.f32 0.001953125, %v1343_v8 }
 0x265   : > { %v1607_v9 = vmul.f32 0.5, %v1606_v40  ;;  %v1311_v40 = vsel %vm482_vm0, %v1090_v48, 0.0 }
 0x266   : > { %v1382_v55 = vrot.slane %v1381_v25, 2  ;;  %v4111_v34 = vadd.f32 1e-06, %v1543_v26 }
 0x267   : > { %v1608_v12 = vsub.f32 1.5, %v1607_v9 }
 0x268   : > { %v1220_v3 = vpop.xlane.xlu2 %1219  ;;  %v1383_v15 = vadd.f32 %v1382_v55, %v1381_v25  ;;  %2919 = vrsqrt.f32 %v4111_v34  ;;  %vm1640_vm8 = vweird.f32 %v4111_v34 }
 0x269   : > { %v1400_v58 = vsel %vm482_vm0, %v1220_v3, 0.0 }
 0x26a   : > { %v1401_v46 = vrot.slane %v1400_v58, 4  ;;  %v1384_v49 = vrot.slane %v1383_v15, 1 }
 0x26c   : > { %1269 = vadd.xlane.f32.xlu0 %v1268_v39  ;;  %1304 = vadd.xlane.f32.xlu1 %v1303_v23  ;;  %v1402_v42 = vadd.f32 %v1401_v46, %v1400_v58  ;;  %v1298_v23 = vadd.f32 %v1297_v0, %v1296_v1  ;;  %v1363_v39 = vrot.slane %v1362_v21, 1  ;;  %v1385_v8 = vadd.f32 %v1384_v49, %v1383_v15  ;;  %v1924_v1 = vld [vmem:[%s5006_s1] sm:$0x3] }
 0x26e   : > { %v1403_v22 = vrot.slane %v1402_v42, 2  ;;  %v1549_v0 = vmul.f32 0.001953125, %v1385_v8 }
 0x270   : > { %v1235_v47 = vpop.xlane.xlu2 %1234  ;;  %v1404_v44 = vadd.f32 %v1403_v22, %v1402_v42 }
 0x271   : > { %v1165_v20 = vpop.xlane.xlu0 %1164  ;;  %v1421_v63 = vsel %vm482_vm0, %v1235_v47, 0.0  ;;  %v1609_v47 = vmul.f32 %v4095_v60, %v1608_v12  ;;  %v4140_v12 = vpop.permute.xlu1 %2438 }
 0x272   : > { %v1323_v6 = vsel %vm482_vm0, %v1165_v20, 0.0  ;;  %v1422_v52 = vrot.slane %v1421_v63, 4  ;;  %v1364_v20 = vadd.f32 %v1363_v39, %v1362_v21  ;;  %v1405_v55 = vrot.slane %v1404_v44, 1 }
 0x273   : > { %v1324_v50 = vrot.slane %v1323_v6, 4 }
 0x274   : > { %1284 = vadd.xlane.f32.xlu0 %v1283_v27  ;;  %v1423_v62 = vadd.f32 %v1422_v52, %v1421_v63  ;;  %v1546_v9 = vmul.f32 0.001953125, %v1364_v20  ;;  %v1406_v22 = vadd.f32 %v1405_v55, %v1404_v44 }
 0x275   : > { %v1325_v29 = vadd.f32 %v1324_v50, %v1323_v6  ;;  %v1312_v6 = vsel %vm482_vm0, %v1091_v30, 0.0 }
 0x276   : > { %v1424_v38 = vrot.slane %v1423_v62, 2 }
 0x277   : > { %v1326_v17 = vrot.slane %v1325_v29, 2 }
 0x278   : > { %v1250_v3 = vpop.xlane.xlu2 %1249  ;;  %v1425_v27 = vadd.f32 %v1424_v38, %v1423_v62  ;;  %v1313_v62 = vadd.f32 %v1312_v6, %v1311_v40 }
 0x279   : > { %v1327_v24 = vadd.f32 %v1326_v17, %v1325_v29  ;;  %v1442_v45 = vsel %vm482_vm0, %v1250_v3, 0.0  ;;  %v1613_v29 = vsel %vm4122_vm3, %v4095_v60, %v1609_v47  ;;  %v4135_v17 = vpop.eup %2919 }
 0x27a   : > { %v1443_v43 = vrot.slane %v1442_v45, 4  ;;  %v1426_v26 = vrot.slane %v1425_v27, 1  ;;  %v1956_v3 = vmul.f32 %v1924_v1, %v1613_v29  ;;  %v1635_v38 = vmul.f32 %v4135_v17, %v4111_v34  ;;  %v4158_v29 = vpop.permute.xlu1 %2450 }
 0x27b   : > { %v1328_v58 = vrot.slane %v1327_v24, 1  ;;  %vm1641_vm7 = vweird.f32 %v4135_v17 }
 0x27c   : > { %1299 = vadd.xlane.f32.xlu0 %v1298_v23  ;;  %v1444_v46 = vadd.f32 %v1443_v43, %v1442_v45  ;;  %v4138_v23 = vadd.f32 1e-06, %v1546_v9  ;;  %v1427_v39 = vadd.f32 %v1426_v26, %v1425_v27  ;;  %v4144_v45 = vadd.f32 1e-06, %v1549_v0  ;;  %vm4194_vm9 = vmor %vm1640_vm8, %vm1641_vm7 }
 0x27d   : > { %v1329_v25 = vadd.f32 %v1328_v58, %v1327_v24  ;;  %v1552_v58 = vmul.f32 0.001953125, %v1406_v22  ;;  %v1636_v47 = vmul.f32 %v4135_v17, %v1635_v38  ;;  %v1925_v22 = vld [vmem:[%s5006_s1 + $0x2] sm:$0x3] }
 0x27e   : > { %v1445_v63 = vrot.slane %v1444_v46, 2  ;;  %v1555_v30 = vmul.f32 0.001953125, %v1427_v39  ;;  %vm1670_vm12 = vweird.f32 %v4138_v23  ;;  %vm1700_vm13 = vweird.f32 %v4144_v45 }
 0x27f   : > { %v1541_v32 = vmul.f32 0.001953125, %v1329_v25  ;;  %v4150_v20 = vadd.f32 1e-06, %v1552_v58 }
 0x280   : > { %v1446_v50 = vadd.f32 %v1445_v63, %v1444_v46  ;;  %v1265_v42 = vpop.xlane.xlu2 %1264  ;;  %v4152_v63 = vadd.f32 1e-06, %v1555_v30 }
 0x281   : > { %v4126_v52 = vadd.f32 1e-06, %v1541_v32  ;;  %v1463_v21 = vsel %vm482_vm0, %v1265_v42, 0.0  ;;  %vm1730_vm3 = vweird.f32 %v4150_v20 }
 0x282   : > { %v1464_v15 = vrot.slane %v1463_v21, 4  ;;  %v1447_v24 = vrot.slane %v1446_v50, 1 }
 0x283   : > { %2921 = vrsqrt.f32 %v4126_v52  ;;  %vm1620_vm5 = vweird.f32 %v4126_v52 }
 0x284   : > { %1314 = vadd.xlane.f32.xlu0 %v1313_v62  ;;  %v1465_v60 = vadd.f32 %v1464_v15, %v1463_v21  ;;  %v1448_v43 = vadd.f32 %v1447_v24, %v1446_v50  ;;  %2923 = vrsqrt.f32 %v4138_v23  ;;  %v1637_v50 = vmul.f32 0.5, %v1636_v47 }
 0x285   : > { %1990 = vperm.xlu1 %2914, %v1956_v3   ;;  %2925 = vrsqrt.f32 %v4144_v45 }
 0x286   : > { %v1466_v49 = vrot.slane %v1465_v60, 2  ;;  %v1558_v27 = vmul.f32 0.001953125, %v1448_v43  ;;  %2927 = vrsqrt.f32 %v4150_v20  ;;  %v1638_v24 = vsub.f32 1.5, %v1637_v50 }
 0x287   : > { %2929 = vrsqrt.f32 %v4152_v63 }
 0x288   : > { %v1467_v48 = vadd.f32 %v1466_v49, %v1465_v60  ;;  %v4160_v1 = vadd.f32 1e-06, %v1558_v27 }
 0x289   : > { %v2922_v44 = vpop.eup %2921 }
 0x28a   : > { %v1615_v25 = vmul.f32 %v2922_v44, %v4126_v52  ;;  %v1468_v46 = vrot.slane %v1467_v48, 1  ;;  %v4155_v42 = vpop.eup %2923  ;;  %vm1621_vm4 = vweird.f32 %v2922_v44  ;;  %2931 = vrsqrt.f32 %v4160_v1 }
 0x28b   : > { %v4162_v26 = vpop.eup %2925  ;;  %v1665_v3 = vmul.f32 %v4155_v42, %v4138_v23  ;;  %vm1622_vm6 = vmor %vm1620_vm5, %vm1621_vm4  ;;  %vm1671_vm10 = vweird.f32 %v4155_v42  ;;  %vm1760_vm5 = vweird.f32 %v4152_v63  ;;  %vm1790_vm8 = vweird.f32 %v4160_v1 }
 0x28c   : > { %v1469_v40 = vadd.f32 %v1468_v46, %v1467_v48  ;;  %v1280_v8 = vpop.xlane.xlu2 %1279  ;;  %v1616_v32 = vmul.f32 %v2922_v44, %v1615_v25  ;;  %v1695_v60 = vmul.f32 %v4162_v26, %v4144_v45  ;;  %v4176_v58 = vpop.eup %2927  ;;  %v1639_v25 = vmul.f32 %v4135_v17, %v1638_v24  ;;  %vm4238_vm14 = vmor %vm1670_vm12, %vm1671_vm10 }
 0x28d   : > { %v1484_v6 = vsel %vm482_vm0, %v1280_v8, 0.0  ;;  %v4181_v46 = vpop.eup %2929  ;;  %v1725_v8 = vmul.f32 %v4176_v58, %v4150_v20  ;;  %vm1701_vm11 = vweird.f32 %v4162_v26  ;;  %vm1731_vm1 = vweird.f32 %v4176_v58 }
 0x28e   : > { %v1485_v55 = vrot.slane %v1484_v6, 4  ;;  %v1617_v35 = vmul.f32 0.5, %v1616_v32  ;;  %v1561_v9 = vmul.f32 0.001953125, %v1469_v40  ;;  %v1666_v40 = vmul.f32 %v4155_v42, %v1665_v3  ;;  %vm4248_vm15 = vmor %vm1700_vm13, %vm1701_vm11 }
 0x28f   : > { %v1643_v34 = vsel %vm4194_vm9, %v4135_v17, %v1639_v25  ;;  %vm1761_vm2 = vweird.f32 %v4181_v46  ;;  %vm4278_vm4 = vmor %vm1730_vm3, %vm1731_vm1 }
 0x290   : > { %v1486_v21 = vadd.f32 %v1485_v55, %v1484_v6  ;;  %v1618_v62 = vsub.f32 1.5, %v1617_v35  ;;  %v4174_v39 = vadd.f32 1e-06, %v1561_v9  ;;  %v4190_v55 = vpop.eup %2931  ;;  %vm4289_vm7 = vmor %vm1760_vm5, %vm1761_vm2 }
 0x292   : > { %v1487_v0 = vrot.slane %v1486_v21, 2  ;;  %v1619_v15 = vmul.f32 %v2922_v44, %v1618_v62  ;;  %2933 = vrsqrt.f32 %v4174_v39  ;;  %vm1820_vm11 = vweird.f32 %v4174_v39 }
 0x294   : > { %v1488_v38 = vadd.f32 %v1487_v0, %v1486_v21  ;;  %v1623_v49 = vsel %vm1622_vm6, %v2922_v44, %v1619_v15  ;;  %v1696_v44 = vmul.f32 %v4162_v26, %v1695_v60  ;;  %v3098_v21 = vmov 269488144  }
 0x295   : > { %v1295_v52 = vpop.xlane.xlu2 %1294  ;;  %v1957_v43 = vmul.f32 %v1925_v22, %v1623_v49  ;;  %v2117_v62 = vunpack.c.l.s4 %v3098_v21  ;;  %v1755_v0 = vmul.f32 %v4181_v46, %v4152_v63  ;;  %v1927_v22 = vld [vmem:[%s5006_s1 + $0x6] sm:$0x3]  ;;  %v1785_v49 = vmul.f32 %v4190_v55, %v4160_v1 }
 0x296   : > { %v1489_v48 = vrot.slane %v1488_v38, 1  ;;  %v1505_v30 = vsel %vm482_vm0, %v1295_v52, 0.0  ;;  %v1697_v60 = vmul.f32 0.5, %v1696_v44  ;;  %v1726_v52 = vmul.f32 %v4176_v58, %v1725_v8 }
 0x297   : > { %v1506_v47 = vrot.slane %v1505_v30, 4  ;;  %v1170_v27 = vpop.xlane.xlu1 %1169  ;;  %1994 = vperm.xlu2 %2916, %v1957_v43   ;;  %v1959_v17 = vmul.f32 %v1927_v22, %v1643_v34  ;;  %v4213_v25 = vunpack.c.0.s8 %v2117_v62  ;;  %vm1791_vm6 = vweird.f32 %v4190_v55 }
 0x298   : > { %v1490_v32 = vadd.f32 %v1489_v48, %v1488_v38  ;;  %v1330_v6 = vsel %vm482_vm0, %v1170_v27, 0.0  ;;  %v1667_v38 = vmul.f32 0.5, %v1666_v40  ;;  %v4209_v43 = vpop.eup %2933  ;;  %v1756_v27 = vmul.f32 %v4181_v46, %v1755_v0  ;;  %v5158_v0 = vld [vmem:[#allocation33_spill] sm:$0xff]  ;;  %vm4311_vm9 = vmor %vm1790_vm8, %vm1791_vm6 }
 0x299   : > { %v1507_v35 = vadd.f32 %v1506_v47, %v1505_v30  ;;  %v1331_v50 = vrot.slane %v1330_v6, 4  ;;  %v1698_v40 = vsub.f32 1.5, %v1697_v60  ;;  %v1815_v8 = vmul.f32 %v4209_v43, %v4174_v39 }
 0x29a   : > { %v1564_v15 = vmul.f32 0.001953125, %v1490_v32  ;;  %v1727_v21 = vmul.f32 0.5, %v1726_v52  ;;  %vm1821_vm10 = vweird.f32 %v4209_v43 }
 0x29b   : > { %v1508_v24 = vrot.slane %v1507_v35, 2  ;;  %v1332_v3 = vadd.f32 %v1331_v50, %v1330_v6  ;;  %v1668_v50 = vsub.f32 1.5, %v1667_v38  ;;  %v1699_v52 = vmul.f32 %v4162_v26, %v1698_v40  ;;  %vm4344_vm12 = vmor %vm1820_vm11, %vm1821_vm10 }
 0x29c   : > { %v4211_v48 = vadd.f32 1e-06, %v1564_v15 }
 0x29d   : > { %v1509_v30 = vadd.f32 %v1508_v24, %v1507_v35  ;;  %v1333_v47 = vrot.slane %v1332_v3, 2  ;;  %v1786_v35 = vmul.f32 %v4190_v55, %v1785_v49  ;;  %v1757_v24 = vmul.f32 0.5, %v1756_v27  ;;  %v5159_v27 = vld [vmem:[#allocation32_spill] sm:$0xff] }
 0x29e   : > { %2935 = vrsqrt.f32 %v4211_v48  ;;  %v1728_v49 = vsub.f32 1.5, %v1727_v21 }
 0x29f   : > { %v1510_v32 = vrot.slane %v1509_v30, 1  ;;  %v1334_v6 = vadd.f32 %v1333_v47, %v1332_v3  ;;  %v1185_v44 = vpop.xlane.xlu1 %1184  ;;  %2002 = vperm.xlu2 %2916, %v1959_v17   ;;  %v1669_v47 = vmul.f32 %v4155_v42, %v1668_v50  ;;  %v1787_v17 = vmul.f32 0.5, %v1786_v35 }
 0x2a0   : > { %v1351_v9 = vsel %vm482_vm0, %v1185_v44, 0.0  ;;  %v1816_v44 = vmul.f32 %v4209_v43, %v1815_v8  ;;  %v1758_v40 = vsub.f32 1.5, %v1757_v24  ;;  %v1729_v24 = vmul.f32 %v4176_v58, %v1728_v49 }
 0x2a1   : > { %v1511_v62 = vadd.f32 %v1510_v32, %v1509_v30  ;;  %v1335_v15 = vrot.slane %v1334_v6, 1  ;;  %v1352_v34 = vrot.slane %v1351_v9, 4  ;;  %v1673_v45 = vsel %vm4238_vm14, %v4155_v42, %v1669_v47 }
 0x2a2   : > { %v1759_v47 = vmul.f32 %v4181_v46, %v1758_v40  ;;  %v1733_v63 = vsel %vm4278_vm4, %v4176_v58, %v1729_v24  ;;  %v1936_v58 = vld [vmem:[%s5006_s1 + $0x18] sm:$0x3] }
 0x2a3   : > { %v1567_v3 = vmul.f32 0.001953125, %v1511_v62  ;;  %v1336_v60 = vadd.f32 %v1335_v15, %v1334_v6  ;;  %v1353_v38 = vadd.f32 %v1352_v34, %v1351_v9  ;;  %v4231_v62 = vpop.permute.xlu0 %2454  ;;  %v1703_v34 = vsel %vm4248_vm15, %v4162_v26, %v1699_v52  ;;  %v1933_v26 = vld [vmem:[%s5006_s1 + $0x12] sm:$0x3]  ;;  %v5165_v52 = vld [vmem:[#allocation38_spill] sm:$0xff] }
 0x2a4   : > { %5160 = vst [vmem:[#allocation22_spill] sm:$0xff] %v4231_v62  ;;  %v4242_v9 = vpop.eup %2935  ;;  %v4333_v22 = vmul.f32 %v1936_v58, %v1733_v63  ;;  %vm1850_vm15 = vweird.f32 %v4211_v48 }
 0x2a5   : > { %v1542_v30 = vmul.f32 0.001953125, %v1336_v60  ;;  %v1354_v32 = vrot.slane %v1353_v38, 2  ;;  %v4233_v6 = vadd.f32 1e-06, %v1567_v3  ;;  %v1788_v3 = vsub.f32 1.5, %v1787_v17 }
 0x2a6   : > { %v1845_v42 = vmul.f32 %v4242_v9, %v4211_v48  ;;  %vm1851_vm2 = vweird.f32 %v4242_v9  ;;  %v1948_v48 = vld [vmem:[%s5006_s1 + $0x30] sm:$0x3] }
 0x2a7   : > { %v4244_v23 = vadd.f32 1e-06, %v1542_v30  ;;  %v1355_v8 = vadd.f32 %v1354_v32, %v1353_v38  ;;  %v1200_v21 = vpop.xlane.xlu1 %1199  ;;  %v1930_v30 = vld [vmem:[%s5006_s1 + $0xc] sm:$0x3]  ;;  %v1817_v32 = vmul.f32 0.5, %v1816_v44  ;;  %vm4404_vm5 = vmor %vm1850_vm15, %vm1851_vm2 }
 0x2a8   : > { %v1372_v15 = vsel %vm482_vm0, %v1200_v21, 0.0  ;;  %v1789_v21 = vmul.f32 %v4190_v55, %v1788_v3  ;;  %v4285_v40 = vmul.f32 %v1930_v30, %v1673_v45  ;;  %v1763_v3 = vsel %vm4289_vm7, %v4181_v46, %v1759_v47  ;;  %v1939_v44 = vld [vmem:[%s5006_s1 + $0x1e] sm:$0x3] }
 0x2a9   : > { %2937 = vrsqrt.f32 %v4244_v23  ;;  %v1356_v60 = vrot.slane %v1355_v8, 1  ;;  %v1373_v38 = vrot.slane %v1372_v15, 4  ;;  %v1846_v45 = vmul.f32 %v4242_v9, %v1845_v42 }
 0x2aa   : > { %2939 = vrsqrt.f32 %v4233_v6  ;;  %v4338_v16 = vmul.f32 %v1939_v44, %v1763_v3  ;;  %vm1630_vm13 = vweird.f32 %v4244_v23  ;;  %vm1880_vm7 = vweird.f32 %v4233_v6 }
 0x2ab   : > { %v1357_v17 = vadd.f32 %v1356_v60, %v1355_v8  ;;  %v1374_v50 = vadd.f32 %v1373_v38, %v1372_v15  ;;  %v4287_v8 = vmul.f32 %v1933_v26, %v1703_v34  ;;  %v1818_v15 = vsub.f32 1.5, %v1817_v32 }
 0x2ad   : > { %v1545_v35 = vmul.f32 0.001953125, %v1357_v17  ;;  %v1375_v49 = vrot.slane %v1374_v50, 2  ;;  %v1819_v20 = vmul.f32 %v4209_v43, %v1818_v15 }
 0x2af   : > { %v1180_v60 = vpop.xlane.xlu0 %1179  ;;  %v4301_v34 = vpop.eup %2937  ;;  %v4303_v38 = vadd.f32 1e-06, %v1545_v35  ;;  %v1376_v30 = vadd.f32 %v1375_v49, %v1374_v50  ;;  %v1793_v49 = vsel %vm4311_vm9, %v4190_v55, %v1789_v21  ;;  %v1942_v35 = vld [vmem:[%s5006_s1 + $0x24] sm:$0x3]  ;;  %v1847_v55 = vmul.f32 0.5, %v1846_v45 }
 0x2b0   : > { %v1215_v26 = vpop.xlane.xlu1 %1214  ;;  %v1344_v32 = vsel %vm482_vm0, %v1180_v60, 0.0  ;;  %v4316_v1 = vpop.eup %2939  ;;  %v1625_v24 = vmul.f32 %v4301_v34, %v4244_v23  ;;  %v4340_v56 = vmul.f32 %v1942_v35, %v1793_v49  ;;  %v1823_v39 = vsel %vm4344_vm12, %v4209_v43, %v1819_v20 }
 0x2b1   : > { %v1393_v42 = vsel %vm482_vm0, %v1215_v26, 0.0  ;;  %v1345_v47 = vrot.slane %v1344_v32, 4  ;;  %2941 = vrsqrt.f32 %v4303_v38  ;;  %v1377_v17 = vrot.slane %v1376_v30, 1 }
 0x2b2   : > { %v1394_v50 = vrot.slane %v1393_v42, 4  ;;  %v1626_v26 = vmul.f32 %v4301_v34, %v1625_v24  ;;  %v1875_v21 = vmul.f32 %v4316_v1, %v4233_v6  ;;  %vm1631_vm14 = vweird.f32 %v4301_v34  ;;  %v1951_v6 = vld [vmem:[%s5006_s1 + $0x36] sm:$0x3] }
 0x2b3   : > { %v1346_v60 = vadd.f32 %v1345_v47, %v1344_v32  ;;  %v1378_v46 = vadd.f32 %v1377_v17, %v1376_v30  ;;  %v1848_v58 = vsub.f32 1.5, %v1847_v55  ;;  %vm1632_vm1 = vmor %vm1630_vm13, %vm1631_vm14  ;;  %vm1660_vm3 = vweird.f32 %v4303_v38 }
 0x2b4   : > { %v1395_v5 = vadd.f32 %v1394_v50, %v1393_v42  ;;  %v1627_v33 = vmul.f32 0.5, %v1626_v26  ;;  %v1945_v50 = vld [vmem:[%s5006_s1 + $0x2a] sm:$0x3]  ;;  %v1876_v43 = vmul.f32 %v4316_v1, %v1875_v21  ;;  %v1926_v26 = vld [vmem:[%s5006_s1 + $0x4] sm:$0x3]  ;;  %vm1881_vm8 = vweird.f32 %v4316_v1 }
 0x2b5   : > { %v1347_v61 = vrot.slane %v1346_v60, 2  ;;  %v1548_v63 = vmul.f32 0.001953125, %v1378_v46  ;;  %v4376_v15 = vmul.f32 %v1945_v50, %v1823_v39  ;;  %vm4443_vm10 = vmor %vm1880_vm7, %vm1881_vm8 }
 0x2b6   : > { %v1396_v45 = vrot.slane %v1395_v5, 2  ;;  %v1628_v3 = vsub.f32 1.5, %v1627_v33  ;;  %v1877_v23 = vmul.f32 0.5, %v1876_v43 }
 0x2b7   : > { %v1348_v30 = vadd.f32 %v1347_v61, %v1346_v60  ;;  %v1195_v32 = vpop.xlane.xlu0 %1194  ;;  %v4353_v24 = vpop.eup %2941  ;;  %v4355_v42 = vadd.f32 1e-06, %v1548_v63 }
 0x2b8   : > { %v1397_v47 = vadd.f32 %v1396_v45, %v1395_v5  ;;  %v1230_v49 = vpop.xlane.xlu1 %1229  ;;  %v1365_v17 = vsel %vm482_vm0, %v1195_v32, 0.0  ;;  %v1655_v33 = vmul.f32 %v4353_v24, %v4303_v38  ;;  %v1629_v60 = vmul.f32 %v4301_v34, %v1628_v3 }
 0x2b9   : > { %v1349_v61 = vrot.slane %v1348_v30, 1  ;;  %v1414_v44 = vsel %vm482_vm0, %v1230_v49, 0.0  ;;  %v1366_v35 = vrot.slane %v1365_v17, 4  ;;  %2943 = vrsqrt.f32 %v4355_v42 }
 0x2ba   : > { %v1398_v20 = vrot.slane %v1397_v47, 1  ;;  %v1415_v5 = vrot.slane %v1414_v44, 4  ;;  %v1656_v46 = vmul.f32 %v4353_v24, %v1655_v33  ;;  %v1633_v32 = vsel %vm1632_vm1, %v4301_v34, %v1629_v60 }
 0x2bb   : > { %v1350_v55 = vadd.f32 %v1349_v61, %v1348_v30  ;;  %v1367_v21 = vadd.f32 %v1366_v35, %v1365_v17  ;;  %v1958_v31 = vmul.f32 %v1926_v26, %v1633_v32  ;;  %v1849_v35 = vmul.f32 %v4242_v9, %v1848_v58 }
 0x2bc   : > { %v1399_v63 = vadd.f32 %v1398_v20, %v1397_v47  ;;  %v1416_v45 = vadd.f32 %v1415_v5, %v1414_v44  ;;  %v1657_v30 = vmul.f32 0.5, %v1656_v46  ;;  %vm1661_vm4 = vweird.f32 %v4353_v24 }
 0x2bd   : > { %v1544_v3 = vmul.f32 0.001953125, %v1350_v55  ;;  %v1368_v49 = vrot.slane %v1367_v21, 2  ;;  %1998 = vperm.xlu0 %2915, %v1958_v31   ;;  %vm1662_vm6 = vmor %vm1660_vm3, %vm1661_vm4  ;;  %vm1690_vm9 = vweird.f32 %v4355_v42 }
 0x2be   : > { %v1551_v17 = vmul.f32 0.001953125, %v1399_v63  ;;  %v1417_v61 = vrot.slane %v1416_v45, 2  ;;  %v1658_v47 = vsub.f32 1.5, %v1657_v30 }
 0x2bf   : > { %v4381_v14 = vadd.f32 1e-06, %v1544_v3  ;;  %v1369_v33 = vadd.f32 %v1368_v49, %v1367_v21  ;;  %v1210_v39 = vpop.xlane.xlu0 %1209  ;;  %v4384_v34 = vpop.eup %2943  ;;  %v1878_v21 = vsub.f32 1.5, %v1877_v23 }
 0x2c0   : > { %v4386_v50 = vadd.f32 1e-06, %v1551_v17  ;;  %v1418_v44 = vadd.f32 %v1417_v61, %v1416_v45  ;;  %v1245_v20 = vpop.xlane.xlu1 %1244  ;;  %v1386_v5 = vsel %vm482_vm0, %v1210_v39, 0.0  ;;  %v1685_v58 = vmul.f32 %v4384_v34, %v4355_v42  ;;  %v1929_v45 = vld [vmem:[%s5006_s1 + $0xa] sm:$0x3] }
 0x2c1   : > { %2945 = vrsqrt.f32 %v4381_v14  ;;  %v1370_v31 = vrot.slane %v1369_v33, 1  ;;  %v1435_v43 = vsel %vm482_vm0, %v1245_v20, 0.0  ;;  %v1387_v55 = vrot.slane %v1386_v5, 4 }
 0x2c2   : > { %v1419_v60 = vrot.slane %v1418_v44, 1  ;;  %v1436_v26 = vrot.slane %v1435_v43, 4  ;;  %2947 = vrsqrt.f32 %v4386_v50  ;;  %v1659_v63 = vmul.f32 %v4353_v24, %v1658_v47 }
 0x2c3   : > { %v1371_v46 = vadd.f32 %v1370_v31, %v1369_v33  ;;  %v1686_v32 = vmul.f32 %v4384_v34, %v1685_v58  ;;  %v1388_v17 = vadd.f32 %v1387_v55, %v1386_v5  ;;  %v1853_v61 = vsel %vm4404_vm5, %v4242_v9, %v1849_v35 }
 0x2c4   : > { %v1420_v49 = vadd.f32 %v1419_v60, %v1418_v44  ;;  %v1437_v30 = vadd.f32 %v1436_v26, %v1435_v43  ;;  %v1663_v33 = vsel %vm1662_vm6, %v4353_v24, %v1659_v63  ;;  %v4425_v35 = vmul.f32 %v1948_v48, %v1853_v61 }
 0x2c5   : > { %v1547_v23 = vmul.f32 0.001953125, %v1371_v46  ;;  %v1687_v39 = vmul.f32 0.5, %v1686_v32  ;;  %v1389_v20 = vrot.slane %v1388_v17, 2  ;;  %v1961_v5 = vmul.f32 %v1929_v45, %v1663_v33  ;;  %2026 = vperm.xlu0 %2915, %v4287_v8  }
 0x2c6   : > { %v1554_v47 = vmul.f32 0.001953125, %v1420_v49  ;;  %v1438_v44 = vrot.slane %v1437_v30, 2  ;;  %v1879_v31 = vmul.f32 %v4316_v1, %v1878_v21  ;;  %vm1650_vm11 = vweird.f32 %v4381_v14 }
 0x2c7   : > { %v4420_v38 = vpop.eup %2945  ;;  %v4422_v58 = vadd.f32 1e-06, %v1547_v23  ;;  %v1225_v9 = vpop.xlane.xlu0 %1224  ;;  %v1390_v60 = vadd.f32 %v1389_v20, %v1388_v17  ;;  %2010 = vperm.xlu2 %2916, %v1961_v5   ;;  %v1688_v21 = vsub.f32 1.5, %v1687_v39  ;;  %vm1691_vm12 = vweird.f32 %v4384_v34 }
 0x2c8   : > { %v1645_v24 = vmul.f32 %v4420_v38, %v4381_v14  ;;  %v1439_v43 = vadd.f32 %v1438_v44, %v1437_v30  ;;  %v1260_v26 = vpop.xlane.xlu1 %1259  ;;  %v4432_v55 = vpop.eup %2947  ;;  %v1407_v46 = vsel %vm482_vm0, %v1225_v9, 0.0  ;;  %v4437_v63 = vadd.f32 1e-06, %v1554_v47  ;;  %vm4474_vm14 = vmor %vm1690_vm9, %vm1691_vm12 }
 0x2c9   : > { %2949 = vrsqrt.f32 %v4422_v58  ;;  %v1456_v8 = vsel %vm482_vm0, %v1260_v26, 0.0  ;;  %v1391_v32 = vrot.slane %v1390_v60, 1  ;;  %v1408_v30 = vrot.slane %v1407_v46, 4 }
 0x2ca   : > { %v1440_v45 = vrot.slane %v1439_v43, 1  ;;  %v1457_v3 = vrot.slane %v1456_v8, 4  ;;  %v1646_v17 = vmul.f32 %v4420_v38, %v1645_v24  ;;  %v1883_v61 = vsel %vm4443_vm10, %v4316_v1, %v1879_v31 }
 0x2cb   : > { %v1715_v48 = vmul.f32 %v4432_v55, %v4386_v50  ;;  %v1392_v33 = vadd.f32 %v1391_v32, %v1390_v60  ;;  %v1409_v47 = vadd.f32 %v1408_v30, %v1407_v46  ;;  %v1689_v20 = vmul.f32 %v4384_v34, %v1688_v21 }
 0x2cc   : > { %v1441_v23 = vadd.f32 %v1440_v45, %v1439_v43  ;;  %v1458_v39 = vadd.f32 %v1457_v3, %v1456_v8  ;;  %v1647_v44 = vmul.f32 0.5, %v1646_v17  ;;  %2951 = vrsqrt.f32 %v4437_v63 }
 0x2cd   : > { %v1550_v1 = vmul.f32 0.001953125, %v1392_v33  ;;  %v1410_v24 = vrot.slane %v1409_v47, 2  ;;  %2038 = vperm.xlu0 %2915, %v4333_v22   ;;  %vm1651_vm13 = vweird.f32 %v4420_v38  ;;  %v4464_v26 = vmul.f32 %v1951_v6, %v1883_v61  ;;  %v1932_v61 = vld [vmem:[%s5006_s1 + $0x10] sm:$0x3] }
 0x2ce   : > { %v1557_v5 = vmul.f32 0.001953125, %v1441_v23  ;;  %v1459_v9 = vrot.slane %v1458_v39, 2  ;;  %v1648_v60 = vsub.f32 1.5, %v1647_v44  ;;  %v1716_v22 = vmul.f32 %v4432_v55, %v1715_v48  ;;  %vm1652_vm15 = vmor %vm1650_vm11, %vm1651_vm13 }
 0x2cf   : > { %v4460_v31 = vpop.eup %2949  ;;  %v1240_v43 = vpop.xlane.xlu0 %1239  ;;  %v4468_v46 = vadd.f32 1e-06, %v1550_v1  ;;  %v1411_v3 = vadd.f32 %v1410_v24, %v1409_v47  ;;  %v1693_v17 = vsel %vm4474_vm14, %v4384_v34, %v1689_v20  ;;  %v1928_v47 = vld [vmem:[%s5006_s1 + $0x8] sm:$0x3]  ;;  %vm1680_vm1 = vweird.f32 %v4422_v58 }
 0x2d0   : > { %v1675_v8 = vmul.f32 %v4460_v31, %v4422_v58  ;;  %v1460_v21 = vadd.f32 %v1459_v9, %v1458_v39  ;;  %v1275_v45 = vpop.xlane.xlu1 %1274  ;;  %v1428_v30 = vsel %vm482_vm0, %v1240_v43, 0.0  ;;  %v4487_v42 = vadd.f32 1e-06, %v1557_v5 }
 0x2d1   : > { %v1477_v49 = vsel %vm482_vm0, %v1275_v45, 0.0  ;;  %v1429_v39 = vrot.slane %v1428_v30, 4  ;;  %2953 = vrsqrt.f32 %v4468_v46  ;;  %v1412_v48 = vrot.slane %v1411_v3, 1 }
 0x2d2   : > { %v1461_v23 = vrot.slane %v1460_v21, 1  ;;  %v1478_v33 = vrot.slane %v1477_v49, 4  ;;  %v1649_v6 = vmul.f32 %v4420_v38, %v1648_v60  ;;  %v1676_v34 = vmul.f32 %v4460_v31, %v1675_v8  ;;  %v4495_v44 = vpop.eup %2951 }
 0x2d3   : > { %v1430_v5 = vadd.f32 %v1429_v39, %v1428_v30  ;;  %v1413_v9 = vadd.f32 %v1412_v48, %v1411_v3  ;;  %v4503_v60 = vmul.f32 %v1932_v61, %v1693_v17  ;;  %2955 = vrsqrt.f32 %v4487_v42 }
 0x2d4   : > { %v1462_v20 = vadd.f32 %v1461_v23, %v1460_v21  ;;  %v1479_v1 = vadd.f32 %v1478_v33, %v1477_v49  ;;  %v1653_v24 = vsel %vm1652_vm15, %v4420_v38, %v1649_v6  ;;  %v1677_v43 = vmul.f32 0.5, %v1676_v34 }
 0x2d5   : > { %v1431_v32 = vrot.slane %v1430_v5, 2  ;;  %v1960_v62 = vmul.f32 %v1928_v47, %v1653_v24  ;;  %v4507_v21 = vmul.f32 %v4495_v44, %v4437_v63  ;;  %v1553_v14 = vmul.f32 0.001953125, %v1413_v9  ;;  %2050 = vperm.xlu0 %2915, %v4338_v16  }
 0x2d6   : > { %v1560_v45 = vmul.f32 0.001953125, %v1462_v20  ;;  %v1480_v8 = vrot.slane %v1479_v1, 2  ;;  %v1310_v49 = vpop.xlane.xlu2 %1309  ;;  %v4511_v30 = vmul.f32 0.5, %v1716_v22  ;;  %v1678_v33 = vsub.f32 1.5, %v1677_v43 }
 0x2d7   : > { %v1255_v3 = vpop.xlane.xlu0 %1254  ;;  %v1432_v17 = vadd.f32 %v1431_v32, %v1430_v5  ;;  %2006 = vperm.xlu1 %2914, %v1960_v62   ;;  %v1526_v61 = vsel %vm482_vm0, %v1310_v49, 0.0  ;;  %v4514_v39 = vpop.eup %2953  ;;  %v4516_v48 = vadd.f32 1e-06, %v1553_v14  ;;  %vm1681_vm2 = vweird.f32 %v4460_v31  ;;  %v1931_v32 = vld [vmem:[%s5006_s1 + $0xe] sm:$0x3] }
 0x2d8   : > { %v1481_v38 = vadd.f32 %v1480_v8, %v1479_v1  ;;  %v1290_v23 = vpop.xlane.xlu1 %1289  ;;  %v1527_v6 = vrot.slane %v1526_v61, 4  ;;  %v1705_v16 = vmul.f32 %v4514_v39, %v4468_v46  ;;  %v4522_v22 = vadd.f32 1e-06, %v1560_v45  ;;  %vm1682_vm3 = vmor %vm1680_vm1, %vm1681_vm2 }
 0x2d9   : > { %v1498_v47 = vsel %vm482_vm0, %v1290_v23, 0.0  ;;  %v1433_v62 = vrot.slane %v1432_v17, 1  ;;  %2957 = vrsqrt.f32 %v4516_v48  ;;  %v1449_v5 = vsel %vm482_vm0, %v1255_v3, 0.0  ;;  %v4530_v14 = vpop.eup %2955 }
 0x2da   : > { %v1482_v34 = vrot.slane %v1481_v38, 1  ;;  %v1528_v20 = vadd.f32 %v1527_v6, %v1526_v61  ;;  %v1499_v1 = vrot.slane %v1498_v47, 4  ;;  %v1450_v43 = vrot.slane %v1449_v5, 4 }
 0x2db   : > { %v1434_v24 = vadd.f32 %v1433_v62, %v1432_v17  ;;  %v1679_v8 = vmul.f32 %v4460_v31, %v1678_v33  ;;  %v1706_v3 = vmul.f32 %v4514_v39, %v1705_v16  ;;  %vm1710_vm4 = vweird.f32 %v4468_v46 }
 0x2dc   : > { %v1483_v9 = vadd.f32 %v1482_v34, %v1481_v38  ;;  %v1529_v45 = vrot.slane %v1528_v20, 2  ;;  %v1500_v49 = vadd.f32 %v1499_v1, %v1498_v47  ;;  %v1718_v38 = vsub.f32 1.5, %v4511_v30 }
 0x2dd   : > { %v1556_v61 = vmul.f32 0.001953125, %v1434_v24  ;;  %v1451_v23 = vadd.f32 %v1450_v43, %v1449_v5  ;;  %v1683_v33 = vsel %vm1682_vm3, %v4460_v31, %v1679_v8  ;;  %2959 = vrsqrt.f32 %v4522_v22  ;;  %2062 = vperm.xlu0 %2915, %v4340_v56  }
 0x2de   : > { %v1563_v17 = vmul.f32 0.001953125, %v1483_v9  ;;  %v1530_v6 = vadd.f32 %v1529_v45, %v1528_v20  ;;  %v1501_v47 = vrot.slane %v1500_v49, 2  ;;  %v1963_v34 = vmul.f32 %v1931_v32, %v1683_v33 }
 0x2df   : > { %v1270_v58 = vpop.xlane.xlu0 %1269  ;;  %vm1721_vm5 = vweird.f32 %v4432_v55  ;;  %v4543_v16 = vadd.f32 1e-06, %v1556_v61  ;;  %v1452_v30 = vrot.slane %v1451_v23, 2  ;;  %2014 = vperm.xlu1 %2914, %v4285_v40   ;;  %v1707_v1 = vmul.f32 0.5, %v1706_v3  ;;  %v4547_v5 = vpop.eup %2957 }
 0x2e0   : > { %v1305_v62 = vpop.xlane.xlu1 %1304  ;;  %v1470_v31 = vsel %vm482_vm0, %v1270_v58, 0.0  ;;  %v4549_v9 = vadd.f32 1e-06, %v1563_v17  ;;  %v1531_v20 = vrot.slane %v1530_v6, 1  ;;  %v1502_v24 = vadd.f32 %v1501_v47, %v1500_v49  ;;  %2018 = vperm.xlu2 %2916, %v1963_v34  }
 0x2e1   : > { %v1519_v56 = vsel %vm482_vm0, %v1305_v62, 0.0  ;;  %vm1720_vm6 = vweird.f32 %v4386_v50  ;;  %v1735_v43 = vmul.f32 %v4547_v5, %v4516_v48  ;;  %v1453_v8 = vadd.f32 %v1452_v30, %v1451_v23 }
 0x2e2   : > { %v1520_v40 = vrot.slane %v1519_v56, 4  ;;  %v1746_v32 = vmul.f32 %v4495_v44, %v4507_v21  ;;  %2961 = vrsqrt.f32 %v4543_v16  ;;  %v1532_v45 = vadd.f32 %v1531_v20, %v1530_v6  ;;  %vm4601_vm9 = vmor %vm1720_vm6, %vm1721_vm5 }
 0x2e3   : > { %v1503_v3 = vrot.slane %v1502_v24, 1  ;;  %v1471_v17 = vrot.slane %v1470_v31, 4  ;;  %v1454_v61 = vrot.slane %v1453_v8, 1  ;;  %v1708_v33 = vsub.f32 1.5, %v1707_v1  ;;  %v4559_v47 = vpop.eup %2959 }
 0x2e4   : > { %v1521_v49 = vadd.f32 %v1520_v40, %v1519_v56  ;;  %vm1711_vm7 = vweird.f32 %v4514_v39  ;;  %2963 = vrsqrt.f32 %v4549_v9  ;;  %v1570_v34 = vmul.f32 0.001953125, %v1532_v45 }
 0x2e5   : > { %v1504_v23 = vadd.f32 %v1503_v3, %v1502_v24  ;;  %v1472_v58 = vadd.f32 %v1471_v17, %v1470_v31  ;;  %v1455_v30 = vadd.f32 %v1454_v61, %v1453_v8  ;;  %v1709_v21 = vmul.f32 %v4514_v39, %v1708_v33  ;;  %2074 = vperm.xlu0 %2915, %v4376_v15   ;;  %vm4569_vm8 = vmor %vm1710_vm4, %vm1711_vm7  ;;  %v1934_v31 = vld [vmem:[%s5006_s1 + $0x14] sm:$0x3] }
 0x2e6   : > { %v1522_v62 = vrot.slane %v1521_v49, 2  ;;  %v1719_v6 = vmul.f32 %v4432_v55, %v1718_v38  ;;  %v4564_v20 = vadd.f32 1e-06, %v1570_v34  ;;  %v1736_v8 = vmul.f32 %v4547_v5, %v1735_v43 }
 0x2e7   : > { %v1566_v2 = vmul.f32 0.001953125, %v1504_v23  ;;  %v1473_v56 = vrot.slane %v1472_v58, 2  ;;  %v1285_v24 = vpop.xlane.xlu0 %1284  ;;  %v1559_v38 = vmul.f32 0.001953125, %v1455_v30  ;;  %2022 = vperm.xlu1 %2914, %v4503_v60   ;;  %v1713_v15 = vsel %vm4569_vm8, %v4514_v39, %v1709_v21 }
 0x2e8   : > { %v1523_v40 = vadd.f32 %v1522_v62, %v1521_v49  ;;  %v1491_v46 = vsel %vm482_vm0, %v1285_v24, 0.0  ;;  %v4582_v45 = vpop.eup %2961  ;;  %v4586_v3 = vmul.f32 %v4530_v14, %v4487_v42  ;;  %v4590_v17 = vmul.f32 %v4559_v47, %v4522_v22  ;;  %v1935_v62 = vld [vmem:[%s5006_s1 + $0x16] sm:$0x3] }
 0x2e9   : > { %2965 = vrsqrt.f32 %v4564_v20  ;;  %v1474_v43 = vadd.f32 %v1473_v56, %v1472_v58  ;;  %v1765_v60 = vmul.f32 %v4582_v45, %v4543_v16  ;;  %v4595_v61 = vadd.f32 1e-06, %v1559_v38 }
 0x2ea   : > { %v1524_v39 = vrot.slane %v1523_v40, 1  ;;  %v1966_v49 = vmul.f32 %v1934_v31, %v1713_v15  ;;  %v4605_v34 = vpop.eup %2963  ;;  %v1492_v30 = vrot.slane %v1491_v46, 4  ;;  %v1723_v58 = vsel %vm4601_vm9, %v4432_v55, %v1719_v6 }
 0x2eb   : > { %v1475_v23 = vrot.slane %v1474_v43, 1  ;;  %v1737_v21 = vmul.f32 0.5, %v1736_v8  ;;  %v4613_v56 = vadd.f32 1e-06, %v1566_v2  ;;  %2967 = vrsqrt.f32 %v4595_v61 }
 0x2ec   : > { %v1525_v50 = vadd.f32 %v1524_v39, %v1523_v40  ;;  %2030 = vperm.xlu2 %2916, %v1966_v49   ;;  %vm1741_vm10 = vweird.f32 %v4547_v5  ;;  %v1493_v31 = vadd.f32 %v1492_v30, %v1491_v46  ;;  %v1747_v38 = vmul.f32 0.5, %v1746_v32  ;;  %v1937_v46 = vld [vmem:[%s5006_s1 + $0x1a] sm:$0x3] }
 0x2ed   : > { %v1476_v1 = vadd.f32 %v1475_v23, %v1474_v43  ;;  %v1738_v24 = vsub.f32 1.5, %v1737_v21  ;;  %v1967_v33 = vmul.f32 %v1935_v62, %v1723_v58  ;;  %vm1740_vm11 = vweird.f32 %v4516_v48  ;;  %2086 = vperm.xlu0 %2915, %v4425_v35  }
 0x2ee   : > { %v1569_v15 = vmul.f32 0.001953125, %v1525_v50  ;;  %v1766_v55 = vmul.f32 %v4582_v45, %v1765_v60  ;;  %v1494_v8 = vrot.slane %v1493_v31, 2  ;;  %v1748_v32 = vsub.f32 1.5, %v1747_v38  ;;  %vm1742_vm12 = vmor %vm1740_vm11, %vm1741_vm10 }
 0x2ef   : > { %v4619_v6 = vpop.eup %2965  ;;  %v1562_v2 = vmul.f32 0.001953125, %v1476_v1  ;;  %v1739_v40 = vmul.f32 %v4547_v5, %v1738_v24  ;;  %v1300_v43 = vpop.xlane.xlu0 %1299  ;;  %2969 = vrsqrt.f32 %v4613_v56  ;;  %2034 = vperm.xlu1 %2914, %v1967_v33   ;;  %vm1751_vm13 = vweird.f32 %v4495_v44 }
 0x2f0   : > { %v1512_v48 = vsel %vm482_vm0, %v1300_v43, 0.0  ;;  %v1767_v60 = vmul.f32 0.5, %v1766_v55  ;;  %v1495_v39 = vadd.f32 %v1494_v8, %v1493_v31  ;;  %v1905_v58 = vmul.f32 %v4619_v6, %v4564_v20 }
 0x2f1   : > { %v4631_v35 = vadd.f32 1e-06, %v1562_v2  ;;  %v1743_v49 = vsel %vm1742_vm12, %v4547_v5, %v1739_v40  ;;  %v1513_v23 = vrot.slane %v1512_v48, 4  ;;  %v4634_v30 = vpop.eup %2967  ;;  %v1995_v21 = vpop.permute.xlu2 %1994  ;;  %v1749_v50 = vmul.f32 %v4495_v44, %v1748_v32  ;;  %v1938_v5 = vld [vmem:[%s5006_s1 + $0x1c] sm:$0x3] }
 0x2f2   : > { %v1969_v62 = vmul.f32 %v1937_v46, %v1743_v49  ;;  %vm1750_vm14 = vweird.f32 %v4437_v63  ;;  %v4640_v1 = vadd.f32 1e-06, %v1569_v15  ;;  %v1496_v24 = vrot.slane %v1495_v39, 1  ;;  %v1940_v32 = vld [vmem:[%s5006_s1 + $0x20] sm:$0x3] }
 0x2f3   : > { %2971 = vrsqrt.f32 %v4631_v35  ;;  %v1514_v31 = vadd.f32 %v1513_v23, %v1512_v48  ;;  %vm1752_vm15 = vmor %vm1750_vm14, %vm1751_vm13  ;;  %v1795_v38 = vmul.f32 %v4634_v30, %v4595_v61  ;;  %v2123_v33 = vperm.slane %v1995_v21, %v4213_v25 }
 0x2f4   : > { %2042 = vperm.xlu2 %2916, %v1969_v62   ;;  %v1753_v63 = vsel %vm1752_vm15, %v4495_v44, %v1749_v50  ;;  %v1768_v15 = vsub.f32 1.5, %v1767_v60  ;;  %v1497_v55 = vadd.f32 %v1496_v24, %v1495_v39  ;;  %vm1770_vm1 = vweird.f32 %v4543_v16 }
 0x2f5   : > { %v1515_v2 = vrot.slane %v1514_v31, 2  ;;  %vm1771_vm2 = vweird.f32 %v4582_v45  ;;  %v4654_v8 = vpop.eup %2969  ;;  %v2277_v40 = vmul.f32 %v2123_v33, %v3527_v53  ;;  %v1970_v46 = vmul.f32 %v1938_v5, %v1753_v63  ;;  %2098 = vperm.xlu0 %2915, %v4464_v26  }
 0x2f6   : > { %v1769_v43 = vmul.f32 %v4582_v45, %v1768_v15  ;;  %v1906_v44 = vmul.f32 %v4619_v6, %v1905_v58  ;;  %v1565_v48 = vmul.f32 0.001953125, %v1497_v55  ;;  %vm1772_vm3 = vmor %vm1770_vm1, %vm1771_vm2  ;;  %vm1910_vm4 = vweird.f32 %v4564_v20 }
 0x2f7   : > { %v1516_v60 = vadd.f32 %v1515_v2, %v1514_v31  ;;  %v1315_v16 = vpop.xlane.xlu0 %1314  ;;  %v1776_v53 = vmul.f32 %v4530_v14, %v4586_v3  ;;  %v5184_v39 = vperm.slane %v5158_v0, %v4213_v25  ;;  %2046 = vperm.xlu1 %2914, %v1970_v46   ;;  %v1991_v58 = vpop.permute.xlu1 %1990  ;;  %vm1911_vm5 = vweird.f32 %v4619_v6  ;;  %v5185_v2 = vld [vmem:[#allocation40_spill] sm:$0xff] }
 0x2f8   : > { %v1773_v23 = vsel %vm1772_vm3, %v4582_v45, %v1769_v43  ;;  %v1533_v62 = vsel %vm482_vm0, %v1315_v16, 0.0  ;;  %v1907_v21 = vmul.f32 0.5, %v1906_v44  ;;  %v4673_v50 = vadd.f32 1e-06, %v1565_v48  ;;  %vm1912_vm6 = vmor %vm1910_vm4, %vm1911_vm5 }
 0x2f9   : > { %v2629_v49 = vadd.f32 %v5184_v39, %v2277_v40  ;;  %v4671_v26 = vpop.eup %2971  ;;  %v1517_v24 = vrot.slane %v1516_v60, 1  ;;  %v1972_v31 = vmul.f32 %v1940_v32, %v1773_v23  ;;  %v2119_v0 = vperm.slane %v1991_v58, %v4213_v25  ;;  %v2003_v5 = vpop.permute.xlu2 %2002  ;;  %v1954_v32 = vld [vmem:[%s5006_s1 + $0x3c] sm:$0x3] }
 0x2fa   : > { %v1825_v3 = vmul.f32 %v4671_v26, %v4631_v35  ;;  %v1534_v45 = vrot.slane %v1533_v62, 4  ;;  %v1908_v33 = vsub.f32 1.5, %v1907_v21  ;;  %2973 = vrsqrt.f32 %v4673_v50 }
 0x2fb   : > { %2661 = vst [vmem:[%s4680_s10 + $0x4] sm:$0xf] %v2629_v49  ;;  %v1518_v63 = vadd.f32 %v1517_v24, %v1516_v60  ;;  %v2131_v15 = vperm.slane %v2003_v5, %v4213_v25  ;;  %v1777_v55 = vmul.f32 0.5, %v1776_v53  ;;  %v2276_v40 = vmul.f32 %v2119_v0, %v5185_v2 }
 0x2fc   : > { %2054 = vperm.xlu2 %2916, %v1972_v31   ;;  %v1535_v46 = vadd.f32 %v1534_v45, %v1533_v62  ;;  %v1909_v43 = vmul.f32 %v4619_v6, %v1908_v33  ;;  %vm1780_vm0 = vweird.f32 %v4487_v42  ;;  %vm1781_vm7 = vweird.f32 %v4530_v14 }
 0x2fd   : > { %v1568_v44 = vmul.f32 0.001953125, %v1518_v63  ;;  %v2279_v48 = vmul.f32 %v2131_v15, %v3557_v54  ;;  %v1778_v60 = vsub.f32 1.5, %v1777_v55  ;;  %v5186_v16 = vperm.slane %v5159_v27, %v4213_v25  ;;  %v1941_v27 = vld [vmem:[%s5006_s1 + $0x22] sm:$0x3]  ;;  %vm1782_vm8 = vmor %vm1780_vm0, %vm1781_vm7 }
 0x2fe   : > { %v1536_v39 = vrot.slane %v1535_v46, 2  ;;  %v1913_v49 = vsel %vm1912_vm6, %v4619_v6, %v1909_v43  ;;  %v1796_v23 = vmul.f32 %v4634_v30, %v1795_v38  ;;  %v5187_v54 = vperm.slane %v5165_v52, %v4213_v25 }
 0x2ff   : > { %v2628_v53 = vadd.f32 %v5186_v16, %v2276_v40  ;;  %v4703_v58 = vadd.f32 1e-06, %v1568_v44  ;;  %v1986_v62 = vmul.f32 %v1954_v32, %v1913_v49  ;;  %v1779_v21 = vmul.f32 %v4530_v14, %v1778_v60  ;;  %v2339_v44 = vld [vmem:[%s5007_s2 + $0x3e] sm:$0x3]  ;;  %v1944_v49 = vld [vmem:[%s5006_s1 + $0x28] sm:$0x3] }
 0x300   : > { %v2631_v20 = vadd.f32 %v5187_v54, %v2279_v48  ;;  %v1835_v24 = vmul.f32 %v4605_v34, %v4549_v9  ;;  %2975 = vrsqrt.f32 %v4640_v1  ;;  %v1537_v6 = vadd.f32 %v1536_v39, %v1535_v46  ;;  %v4718_v52 = vpop.eup %2973 }
 0x301   : > { %2660 = vst [vmem:[%s4680_s10] sm:$0xf] %v2628_v53  ;;  %v1797_v38 = vmul.f32 0.5, %v1796_v23  ;;  %2977 = vrsqrt.f32 %v4703_v58  ;;  %2110 = vperm.xlu0 %2915, %v1986_v62   ;;  %v1783_v31 = vsel %vm1782_vm8, %v4530_v14, %v1779_v21  ;;  %vm1801_vm9 = vweird.f32 %v4634_v30 }
 0x302   : > { %2663 = vst [vmem:[%s4680_s10 + $0xc] sm:$0xf] %v2631_v20  ;;  %v1806_v0 = vmul.f32 %v4559_v47, %v4590_v17  ;;  %v1855_v45 = vmul.f32 %v4718_v52, %v4673_v50  ;;  %v1538_v5 = vrot.slane %v1537_v6, 1  ;;  %v1973_v42 = vmul.f32 %v1941_v27, %v1783_v31  ;;  %v1943_v17 = vld [vmem:[%s5006_s1 + $0x26] sm:$0x3] }
 0x303   : > { %v1798_v33 = vsub.f32 1.5, %v1797_v38  ;;  %v1865_v63 = vmul.f32 %v4654_v8, %v4613_v56  ;;  %v1826_v55 = vmul.f32 %v4671_v26, %v1825_v3  ;;  %vm1800_vm10 = vweird.f32 %v4595_v61 }
 0x304   : > { %v1807_v15 = vmul.f32 0.5, %v1806_v0  ;;  %v1539_v2 = vadd.f32 %v1538_v5, %v1537_v6  ;;  %2058 = vperm.xlu1 %2914, %v1973_v42   ;;  %v1836_v40 = vmul.f32 %v4605_v34, %v1835_v24  ;;  %vm1802_vm11 = vmor %vm1800_vm10, %vm1801_vm9  ;;  %vm1810_vm12 = vweird.f32 %v4522_v22  ;;  %v1946_v22 = vld [vmem:[%s5006_s1 + $0x2c] sm:$0x3] }
 0x305   : > { %v1799_v14 = vmul.f32 %v4634_v30, %v1798_v33  ;;  %vm1811_vm13 = vweird.f32 %v4559_v47  ;;  %v1827_v3 = vmul.f32 0.5, %v1826_v55  ;;  %v1856_v60 = vmul.f32 %v4718_v52, %v1855_v45 }
 0x306   : > { %v1808_v46 = vsub.f32 1.5, %v1807_v15  ;;  %v4741_v43 = vpop.eup %2975  ;;  %v1571_v32 = vmul.f32 0.001953125, %v1539_v2  ;;  %v1837_v48 = vmul.f32 0.5, %v1836_v40  ;;  %vm1831_vm14 = vweird.f32 %v4671_v26  ;;  %vm1812_vm15 = vmor %vm1810_vm12, %vm1811_vm13 }
 0x307   : > { %v1803_v61 = vsel %vm1802_vm11, %v4634_v30, %v1799_v14  ;;  %v4748_v16 = vpop.eup %2977  ;;  %v1828_v23 = vsub.f32 1.5, %v1827_v3  ;;  %v1857_v62 = vmul.f32 0.5, %v1856_v60  ;;  %vm1830_vm1 = vweird.f32 %v4631_v35 }
 0x308   : > { %v1975_v53 = vmul.f32 %v1943_v17, %v1803_v61  ;;  %v1809_v39 = vmul.f32 %v4559_v47, %v1808_v46  ;;  %v1885_v30 = vmul.f32 %v4748_v16, %v4703_v58  ;;  %v4757_v54 = vadd.f32 1e-06, %v1571_v32  ;;  %vm1832_vm2 = vmor %vm1830_vm1, %vm1831_vm14 }
 0x309   : > { %v1838_v20 = vsub.f32 1.5, %v1837_v48  ;;  %2466 = vperm.xlu0 %2915, %v2339_v44   ;;  %v1829_v27 = vmul.f32 %v4671_v26, %v1828_v23  ;;  %v1866_v24 = vmul.f32 %v4654_v8, %v1865_v63  ;;  %v1895_v6 = vmul.f32 %v4741_v43, %v4640_v1  ;;  %v1950_v48 = vld [vmem:[%s5006_s1 + $0x34] sm:$0x3] }
 0x30a   : > { %2066 = vperm.xlu2 %2916, %v1975_v53   ;;  %v1813_v21 = vsel %vm1812_vm15, %v4559_v47, %v1809_v39  ;;  %2979 = vrsqrt.f32 %v4757_v54  ;;  %v1858_v47 = vsub.f32 1.5, %v1857_v62  ;;  %vm1841_vm3 = vweird.f32 %v4605_v34  ;;  %v1952_v39 = vld [vmem:[%s5006_s1 + $0x38] sm:$0x3] }
 0x30b   : > { %v1976_v38 = vmul.f32 %v1944_v49, %v1813_v21  ;;  %v1833_v31 = vsel %vm1832_vm2, %v4671_v26, %v1829_v27  ;;  %v1839_v35 = vmul.f32 %v4605_v34, %v1838_v20  ;;  %v1867_v0 = vmul.f32 0.5, %v1866_v24  ;;  %v1947_v26 = vld [vmem:[%s5006_s1 + $0x2e] sm:$0x3] }
 0x30c   : > { %v1886_v45 = vmul.f32 %v4748_v16, %v1885_v30  ;;  %v1978_v5 = vmul.f32 %v1946_v22, %v1833_v31  ;;  %vm1840_vm4 = vweird.f32 %v4549_v9  ;;  %v1859_v42 = vmul.f32 %v4718_v52, %v1858_v47  ;;  %v2338_v22 = vld [vmem:[%s5007_s2 + $0x3c] sm:$0x3]  ;;  %v2337_v47 = vld [vmem:[%s5007_s2 + $0x3a] sm:$0x3] }
 0x30d   : > { %2070 = vperm.xlu1 %2914, %v1976_v38   ;;  %vm1842_vm5 = vmor %vm1840_vm4, %vm1841_vm3  ;;  %vm1861_vm0 = vweird.f32 %v4718_v52  ;;  %v1868_v15 = vsub.f32 1.5, %v1867_v0  ;;  %v1896_v55 = vmul.f32 %v4741_v43, %v1895_v6  ;;  %vm1860_vm6 = vweird.f32 %v4673_v50  ;;  %v5189_v0 = vld [vmem:[#allocation29_spill] sm:$0xff] }
 0x30e   : > { %v1887_v33 = vmul.f32 0.5, %v1886_v45  ;;  %v1843_v63 = vsel %vm1842_vm5, %v4605_v34, %v1839_v35  ;;  %vm1862_vm7 = vmor %vm1860_vm6, %vm1861_vm0  ;;  %v1949_v34 = vld [vmem:[%s5006_s1 + $0x32] sm:$0x3]  ;;  %vm1871_vm8 = vweird.f32 %v4654_v8  ;;  %vm1870_vm9 = vweird.f32 %v4613_v56 }
 0x30f   : > { %v1979_v14 = vmul.f32 %v1947_v26, %v1843_v63  ;;  %v1863_v17 = vsel %vm1862_vm7, %v4718_v52, %v1859_v42  ;;  %v1869_v46 = vmul.f32 %v4654_v8, %v1868_v15  ;;  %v1897_v3 = vmul.f32 0.5, %v1896_v55  ;;  %vm1872_vm10 = vmor %vm1870_vm9, %vm1871_vm8  ;;  %v5190_v55 = vld [vmem:[#allocation50_spill] sm:$0xff] }
 0x310   : > { %v2980_v2 = vpop.eup %2979  ;;  %v1888_v40 = vsub.f32 1.5, %v1887_v33  ;;  %v1981_v50 = vmul.f32 %v1949_v34, %v1863_v17  ;;  %vm1891_vm11 = vweird.f32 %v4748_v16  ;;  %vm1890_vm12 = vweird.f32 %v4703_v58  ;;  %v5192_v17 = vld [vmem:[#allocation49_spill] sm:$0xff] }
 0x311   : > { %v1915_v9 = vmul.f32 %v2980_v2, %v4757_v54  ;;  %v1873_v44 = vsel %vm1872_vm10, %v4654_v8, %v1869_v46  ;;  %v1898_v60 = vsub.f32 1.5, %v1897_v3  ;;  %vm1892_vm13 = vmor %vm1890_vm12, %vm1891_vm11  ;;  %vm1901_vm14 = vweird.f32 %v4741_v43 }
 0x312   : > { %2078 = vperm.xlu2 %2916, %v1978_v5   ;;  %v1889_v61 = vmul.f32 %v4748_v16, %v1888_v40  ;;  %v1982_v53 = vmul.f32 %v1950_v48, %v1873_v44  ;;  %vm1900_vm15 = vweird.f32 %v4640_v1  ;;  %vm1921_vm2 = vweird.f32 %v2980_v2  ;;  %v1955_v1 = vld [vmem:[%s5006_s1 + $0x3e] sm:$0x3] }
 0x313   : > { %v1916_v32 = vmul.f32 %v2980_v2, %v1915_v9  ;;  %v1899_v23 = vmul.f32 %v4741_v43, %v1898_v60  ;;  %vm1902_vm1 = vmor %vm1900_vm15, %vm1901_vm14  ;;  %vm1920_vm3 = vweird.f32 %v4757_v54  ;;  %v2507_v26 = vperm.slane %v3695_v41, %v4213_v25  ;;  %v5191_v9 = vld [vmem:[#allocation44_spill] sm:$0xff] }
 0x314   : > { %v1893_v56 = vsel %vm1892_vm13, %v4748_v16, %v1889_v61  ;;  %v1953_v16 = vld [vmem:[%s5006_s1 + $0x3a] sm:$0x3]  ;;  %vm1922_vm4 = vmor %vm1920_vm3, %vm1921_vm2  ;;  %v5195_v60 = vld [vmem:[#allocation52_spill] sm:$0xff] }
 0x315   : > { %2082 = vperm.xlu1 %2914, %v1979_v14   ;;  %v1917_v52 = vmul.f32 0.5, %v1916_v32  ;;  %v1984_v8 = vmul.f32 %v1952_v39, %v1893_v56  ;;  %v1903_v30 = vsel %vm1902_vm1, %v4741_v43, %v1899_v23  ;;  %v5188_v43 = vld [vmem:[#allocation35_spill] sm:$0xff]  ;;  %v2499_v14 = vperm.slane %v5191_v9, %v4213_v25  ;;  %v5193_v32 = vld [vmem:[#allocation25_spill] sm:$0xff]  ;;  %v5196_v56 = vld [vmem:[#allocation54_spill] sm:$0xff] }
 0x316   : > { %v1985_v20 = vmul.f32 %v1953_v16, %v1903_v30  ;;  %v2491_v24 = vperm.slane %v5188_v43, %v4213_v25  ;;  %v2519_v41 = vperm.slane %v5193_v32, %v4213_v25  ;;  %v2531_v16 = vperm.slane %v3899_v51, %v4213_v25  ;;  %v5201_v51 = vld [vmem:[#allocation56_spill] sm:$0xff] }
 0x317   : > { %v1918_v49 = vsub.f32 1.5, %v1917_v52 }
 0x319   : > { %v1919_v58 = vmul.f32 %v2980_v2, %v1918_v49 }
 0x31a   : > { %2090 = vperm.xlu2 %2916, %v1981_v50   ;;  %v5194_v50 = vld [vmem:[#allocation55_spill] sm:$0xff] }
 0x31b   : > { %v1923_v62 = vsel %vm1922_vm4, %v2980_v2, %v1919_v58 }
 0x31c   : > { %v1987_v6 = vmul.f32 %v1955_v1, %v1923_v62  ;;  %v5198_v1 = vld [vmem:[#allocation43_spill] sm:$0xff] }
 0x31d   : > { %2094 = vperm.xlu1 %2914, %v1982_v53   ;;  %v2511_v53 = vperm.slane %v5195_v60, %v4213_v25 }
 0x321   : > { %v2011_v21 = vpop.permute.xlu2 %2010 }
 0x322   : > { %2102 = vperm.xlu2 %2916, %v1984_v8   ;;  %v2139_v27 = vperm.slane %v2011_v21, %v4213_v25  ;;  %v2487_v21 = vperm.slane %v5198_v1, %v4213_v25 }
 0x324   : > { %v2281_v38 = vmul.f32 %v2139_v27, %v3580_v4  ;;  %v2479_v4 = vperm.slane %v5189_v0, %v4213_v25  ;;  %v5199_v27 = vld [vmem:[#allocation42_spill] sm:$0xff] }
 0x325   : > { %2106 = vperm.xlu1 %2914, %v1985_v20   ;;  %v5197_v20 = vld [vmem:[#allocation20_spill] sm:$0xff] }
 0x326   : > { %v2633_v54 = vadd.f32 %v2491_v24, %v2281_v38 }
 0x328   : > { %2665 = vst [vmem:[%s4680_s10 + $0x14] sm:$0xf] %v2633_v54 }
 0x32a   : > { %2114 = vperm.xlu2 %2916, %v1987_v6  }
 0x32d   : > { %2462 = vperm.xlu1 %2914, %v2338_v22   ;;  %v5200_v22 = vld [vmem:[#allocation10_spill] sm:$0xff] }
 0x32f   : > { %v1999_v31 = vpop.permute.xlu0 %1998 }
 0x330   : > { %v2127_v35 = vperm.slane %v1999_v31, %v4213_v25 }
 0x332   : > { %2458 = vperm.xlu2 %2916, %v2337_v47   ;;  %v2278_v45 = vmul.f32 %v2127_v35, %v3537_v11  ;;  %v2523_v47 = vperm.slane %v5200_v22, %v4213_v25 }
 0x334   : > { %v2630_v5 = vadd.f32 %v2479_v4, %v2278_v45 }
 0x336   : > { %2662 = vst [vmem:[%s4680_s10 + $0x8] sm:$0xf] %v2630_v5 }
 0x337   : > { %v2027_v42 = vpop.permute.xlu0 %2026 }
 0x338   : > { %v2155_v33 = vperm.slane %v2027_v42, %v4213_v25  ;;  %v2543_v42 = vperm.slane %v4003_v10, %v4213_v25 }
 0x33a   : > { %v2019_v63 = vpop.permute.xlu2 %2018  ;;  %v2285_v2 = vmul.f32 %v2155_v33, %v5190_v55 }
 0x33b   : > { %v2147_v15 = vperm.slane %v2019_v63, %v4213_v25  ;;  %v5202_v63 = vld [vmem:[#allocation45_spill] sm:$0xff] }
 0x33c   : > { %v2637_v11 = vadd.f32 %v2507_v26, %v2285_v2  ;;  %v2495_v26 = vperm.slane %v5202_v63, %v4213_v25 }
 0x33d   : > { %v2283_v34 = vmul.f32 %v2147_v15, %v5192_v17  ;;  %v5203_v15 = vld [vmem:[#allocation47_spill] sm:$0xff] }
 0x33e   : > { %2669 = vst [vmem:[%s4680_s10 + $0x24] sm:$0xf] %v2637_v11 }
 0x33f   : > { %v2635_v40 = vadd.f32 %v2499_v14, %v2283_v34  ;;  %v2039_v46 = vpop.permute.xlu0 %2038  ;;  %v2535_v34 = vperm.slane %v3886_v57, %v4213_v25  ;;  %v5207_v57 = vld [vmem:[#allocation48_spill] sm:$0xff] }
 0x340   : > { %v2167_v3 = vperm.slane %v2039_v46, %v4213_v25 }
 0x341   : > { %2667 = vst [vmem:[%s4680_s10 + $0x1c] sm:$0xf] %v2635_v40 }
 0x342   : > { %v2288_v61 = vmul.f32 %v2167_v3, %v5194_v50  ;;  %v5205_v50 = vld [vmem:[#allocation41_spill] sm:$0xff] }
 0x344   : > { %v2640_v44 = vadd.f32 %v2519_v41, %v2288_v61  ;;  %v2555_v41 = vperm.slane %v4114_v37, %v4213_v25 }
 0x346   : > { %v2031_v52 = vpop.permute.xlu2 %2030  ;;  %2672 = vst [vmem:[%s4680_s10 + $0x30] sm:$0xf] %v2640_v44 }
 0x347   : > { %v2159_v48 = vperm.slane %v2031_v52, %v4213_v25  ;;  %v2051_v49 = vpop.permute.xlu0 %2050  ;;  %v5206_v52 = vld [vmem:[#allocation39_spill] sm:$0xff] }
 0x348   : > { %v2179_v8 = vperm.slane %v2051_v49, %v4213_v25  ;;  %v2503_v44 = vperm.slane %v5206_v52, %v4213_v25 }
 0x349   : > { %v2286_v39 = vmul.f32 %v2159_v48, %v5196_v56  ;;  %v2007_v23 = vpop.permute.xlu1 %2006 }
 0x34a   : > { %v2135_v30 = vperm.slane %v2007_v23, %v4213_v25  ;;  %v2291_v62 = vmul.f32 %v2179_v8, %v5197_v20  ;;  %v2567_v8 = vperm.slane %v4140_v12, %v4213_v25 }
 0x34b   : > { %v2638_v58 = vadd.f32 %v2511_v53, %v2286_v39 }
 0x34c   : > { %v2280_v43 = vmul.f32 %v2135_v30, %v5199_v27  ;;  %v2643_v6 = vadd.f32 %v2531_v16, %v2291_v62  ;;  %v5208_v16 = vld [vmem:[#allocation46_spill] sm:$0xff]  ;;  %v5209_v62 = vld [vmem:[#allocation51_spill] sm:$0xff]  ;;  %v5210_v27 = vld [vmem:[#allocation36_spill] sm:$0xff] }
 0x34d   : > { %2670 = vst [vmem:[%s4680_s10 + $0x28] sm:$0xf] %v2638_v58  ;;  %v2515_v20 = vperm.slane %v5208_v16, %v4213_v25 }
 0x34e   : > { %v2043_v24 = vpop.permute.xlu2 %2042  ;;  %v2632_v38 = vadd.f32 %v2487_v21, %v2280_v43  ;;  %2675 = vst [vmem:[%s4680_s10 + $0x3c] sm:$0xf] %v2643_v6  ;;  %v2547_v21 = vperm.slane %v3996_v19, %v4213_v25  ;;  %v2579_v19 = vperm.slane %v4158_v29, %v4213_v25 }
 0x34f   : > { %v2171_v54 = vperm.slane %v2043_v24, %v4213_v25  ;;  %v2063_v35 = vpop.permute.xlu0 %2062 }
 0x350   : > { %2664 = vst [vmem:[%s4680_s10 + $0x10] sm:$0xf] %v2632_v38  ;;  %v2191_v4 = vperm.slane %v2063_v35, %v4213_v25  ;;  %v5211_v35 = vld [vmem:[#allocation53_spill] sm:$0xff] }
 0x351   : > { %v2289_v31 = vmul.f32 %v2171_v54, %v5201_v51  ;;  %v2015_v0 = vpop.permute.xlu1 %2014 }
 0x352   : > { %v2143_v5 = vperm.slane %v2015_v0, %v4213_v25  ;;  %v2294_v33 = vmul.f32 %v2191_v4, %v3820_v36  ;;  %v5204_v36 = vld [vmem:[#allocation11_spill] sm:$0xff]  ;;  %v2527_v0 = vperm.slane %v5211_v35, %v4213_v25 }
 0x353   : > { %v2641_v45 = vadd.f32 %v2523_v47, %v2289_v31  ;;  %v5212_v4 = vld [vmem:[#allocation19_spill] sm:$0xff] }
 0x354   : > { %v2282_v55 = vmul.f32 %v2143_v5, %v5203_v15  ;;  %v2646_v9 = vadd.f32 %v2543_v42, %v2294_v33  ;;  %v2559_v5 = vperm.slane %v4074_v13, %v4213_v25  ;;  %v2571_v15 = vperm.slane %v4093_v59, %v4213_v25  ;;  %v5216_v59 = vld [vmem:[#allocation22_spill] sm:$0xff] }
 0x355   : > { %2673 = vst [vmem:[%s4680_s10 + $0x34] sm:$0xf] %v2641_v45 }
 0x356   : > { %v2055_v2 = vpop.permute.xlu2 %2054  ;;  %v2634_v14 = vadd.f32 %v2495_v26, %v2282_v55  ;;  %2678 = vst [vmem:[%s4680_s10 + $0x48] sm:$0xf] %v2646_v9  ;;  %v5213_v55 = vld [vmem:[#allocation14_spill] sm:$0xff] }
 0x357   : > { %v2183_v17 = vperm.slane %v2055_v2, %v4213_v25  ;;  %v2075_v11 = vpop.permute.xlu0 %2074 }
 0x358   : > { %2666 = vst [vmem:[%s4680_s10 + $0x18] sm:$0xf] %v2634_v14  ;;  %v2203_v46 = vperm.slane %v2075_v11, %v4213_v25  ;;  %v5214_v14 = vld [vmem:[#allocation26_spill] sm:$0xff] }
 0x359   : > { %v2292_v10 = vmul.f32 %v2183_v17, %v5204_v36  ;;  %v2023_v40 = vpop.permute.xlu1 %2022  ;;  %v2539_v17 = vperm.slane %v5214_v14, %v4213_v25 }
 0x35a   : > { %v2151_v32 = vperm.slane %v2023_v40, %v4213_v25  ;;  %v2297_v61 = vmul.f32 %v2203_v46, %v5205_v50 }
 0x35b   : > { %v2644_v3 = vadd.f32 %v2535_v34, %v2292_v10  ;;  %v5215_v34 = vld [vmem:[#allocation8_spill] sm:$0xff] }
 0x35c   : > { %v2284_v48 = vmul.f32 %v2151_v32, %v5207_v57  ;;  %v2649_v60 = vadd.f32 %v2555_v41, %v2297_v61  ;;  %v5217_v32 = vld [vmem:[#allocation18_spill] sm:$0xff] }
 0x35d   : > { %2676 = vst [vmem:[%s4680_s10 + $0x40] sm:$0xf] %v2644_v3  ;;  %v2583_v3 = vperm.slane %v5216_v59, %v4213_v25 }
 0x35e   : > { %v2636_v53 = vadd.f32 %v2503_v44, %v2284_v48  ;;  %2681 = vst [vmem:[%s4680_s10 + $0x54] sm:$0xf] %v2649_v60  ;;  %v5218_v44 = vld [vmem:[#allocation12_spill] sm:$0xff]  ;;  %v5219_v48 = vld [vmem:[#allocation37_spill] sm:$0xff] }
 0x35f   : > { %v2087_v56 = vpop.permute.xlu0 %2086  ;;  %v2551_v57 = vperm.slane %v5218_v44, %v4213_v25 }
 0x360   : > { %2668 = vst [vmem:[%s4680_s10 + $0x20] sm:$0xf] %v2636_v53  ;;  %v2215_v49 = vperm.slane %v2087_v56, %v4213_v25 }
 0x361   : > { %v2035_v39 = vpop.permute.xlu1 %2034 }
 0x362   : > { %v2163_v23 = vperm.slane %v2035_v39, %v4213_v25  ;;  %v2300_v30 = vmul.f32 %v2215_v49, %v3941_v7 }
 0x364   : > { %v2067_v37 = vpop.permute.xlu2 %2066  ;;  %v2287_v1 = vmul.f32 %v2163_v23, %v5209_v62  ;;  %v2652_v24 = vadd.f32 %v2567_v8, %v2300_v30 }
 0x365   : > { %v2195_v58 = vperm.slane %v2067_v37, %v4213_v25  ;;  %v5220_v37 = vld [vmem:[#allocation17_spill] sm:$0xff] }
 0x366   : > { %v2639_v6 = vadd.f32 %v2515_v20, %v2287_v1  ;;  %2684 = vst [vmem:[%s4680_s10 + $0x60] sm:$0xf] %v2652_v24  ;;  %v5221_v20 = vld [vmem:[#allocation13_spill] sm:$0xff] }
 0x367   : > { %v2295_v43 = vmul.f32 %v2195_v58, %v5210_v27  ;;  %v2099_v12 = vpop.permute.xlu0 %2098  ;;  %v2563_v62 = vperm.slane %v5221_v20, %v4213_v25  ;;  %v5222_v1 = vld [vmem:[#allocation9_spill] sm:$0xff] }
 0x368   : > { %2671 = vst [vmem:[%s4680_s10 + $0x2c] sm:$0xf] %v2639_v6  ;;  %v2227_v54 = vperm.slane %v2099_v12, %v4213_v25  ;;  %v5223_v6 = vld [vmem:[#allocation16_spill] sm:$0xff]  ;;  %v5224_v12 = vld [vmem:[#allocation30_spill] sm:$0xff] }
 0x369   : > { %v2647_v38 = vadd.f32 %v2547_v21, %v2295_v43  ;;  %v2047_v7 = vpop.permute.xlu1 %2046 }
 0x36a   : > { %v2175_v47 = vperm.slane %v2047_v7, %v4213_v25  ;;  %v2303_v31 = vmul.f32 %v2227_v54, %v3969_v28 }
 0x36b   : > { %2679 = vst [vmem:[%s4680_s10 + $0x4c] sm:$0xf] %v2647_v38  ;;  %v2575_v38 = vperm.slane %v5223_v6, %v4213_v25 }
 0x36c   : > { %v2079_v22 = vpop.permute.xlu2 %2078  ;;  %v2290_v45 = vmul.f32 %v2175_v47, %v5212_v4  ;;  %v2655_v33 = vadd.f32 %v2579_v19, %v2303_v31  ;;  %v5225_v31 = vld [vmem:[#allocation31_spill] sm:$0xff] }
 0x36d   : > { %v2207_v51 = vperm.slane %v2079_v22, %v4213_v25 }
 0x36e   : > { %v2642_v63 = vadd.f32 %v2527_v0, %v2290_v45  ;;  %2687 = vst [vmem:[%s4680_s10 + $0x6c] sm:$0xf] %v2655_v33 }
 0x36f   : > { %v2298_v42 = vmul.f32 %v2207_v51, %v3932_v18 }
 0x370   : > { %2674 = vst [vmem:[%s4680_s10 + $0x38] sm:$0xf] %v2642_v63 }
 0x371   : > { %v2650_v26 = vadd.f32 %v2559_v5, %v2298_v42  ;;  %v5226_v5 = vld [vmem:[#allocation15_spill] sm:$0xff] }
 0x373   : > { %2682 = vst [vmem:[%s4680_s10 + $0x58] sm:$0xf] %v2650_v26  ;;  %v2111_v10 = vpop.permute.xlu0 %2110 }
 0x374   : > { %v2091_v29 = vpop.permute.xlu2 %2090  ;;  %v2239_v0 = vperm.slane %v2111_v10, %v4213_v25 }
 0x375   : > { %v2219_v28 = vperm.slane %v2091_v29, %v4213_v25 }
 0x376   : > { %v2059_v9 = vpop.permute.xlu1 %2058  ;;  %v2306_v42 = vmul.f32 %v2239_v0, %v5226_v5 }
 0x377   : > { %v2301_v2 = vmul.f32 %v2219_v28, %v5213_v55  ;;  %v2187_v13 = vperm.slane %v2059_v9, %v4213_v25 }
 0x379   : > { %v2653_v18 = vadd.f32 %v2571_v15, %v2301_v2  ;;  %v2293_v36 = vmul.f32 %v2187_v13, %v5215_v34 }
 0x37b   : > { %2685 = vst [vmem:[%s4680_s10 + $0x64] sm:$0xf] %v2653_v18  ;;  %v2645_v11 = vadd.f32 %v2539_v17, %v2293_v36  ;;  %v2467_v39 = vpop.permute.xlu0 %2466 }
 0x37c   : > { %v2103_v40 = vpop.permute.xlu2 %2102  ;;  %v2595_v8 = vperm.slane %v2467_v39, %v4213_v25 }
 0x37d   : > { %v2231_v46 = vperm.slane %v2103_v40, %v4213_v25  ;;  %2677 = vst [vmem:[%s4680_s10 + $0x44] sm:$0xf] %v2645_v11 }
 0x37f   : > { %v2304_v41 = vmul.f32 %v2231_v46, %v5217_v32  ;;  %v2071_v50 = vpop.permute.xlu1 %2070 }
 0x380   : > { %v2199_v61 = vperm.slane %v2071_v50, %v4213_v25 }
 0x381   : > { %v2656_v52 = vadd.f32 %v2583_v3, %v2304_v41 }
 0x382   : > { %v2296_v60 = vmul.f32 %v2199_v61, %v5219_v48 }
 0x383   : > { %2688 = vst [vmem:[%s4680_s10 + $0x70] sm:$0xf] %v2656_v52 }
 0x384   : > { %v2648_v53 = vadd.f32 %v2551_v57, %v2296_v60  ;;  %v2115_v56 = vpop.permute.xlu2 %2114 }
 0x385   : > { %v2243_v49 = vperm.slane %v2115_v56, %v4213_v25 }
 0x386   : > { %2680 = vst [vmem:[%s4680_s10 + $0x50] sm:$0xf] %v2648_v53 }
 0x387   : > { %v2307_v23 = vmul.f32 %v2243_v49, %v5220_v37  ;;  %v2083_v58 = vpop.permute.xlu1 %2082 }
 0x388   : > { %v2211_v30 = vperm.slane %v2083_v58, %v4213_v25 }
 0x389   : > { %v2659_v16 = vadd.f32 %v2595_v8, %v2307_v23 }
 0x38a   : > { %v2299_v21 = vmul.f32 %v2211_v30, %v5222_v1 }
 0x38b   : > { %2691 = vst [vmem:[%s4680_s10 + $0x7c] sm:$0xf] %v2659_v16 }
 0x38c   : > { %v2651_v27 = vadd.f32 %v2563_v62, %v2299_v21  ;;  %v2459_v22 = vpop.permute.xlu2 %2458 }
 0x38d   : > { %v2587_v51 = vperm.slane %v2459_v22, %v4213_v25 }
 0x38e   : > { %2683 = vst [vmem:[%s4680_s10 + $0x5c] sm:$0xf] %v2651_v27 }
 0x38f   : > { %v2095_v43 = vpop.permute.xlu1 %2094 }
 0x390   : > { %v2223_v24 = vperm.slane %v2095_v43, %v4213_v25 }
 0x392   : > { %v2302_v7 = vmul.f32 %v2223_v24, %v5224_v12 }
 0x394   : > { %v2654_v54 = vadd.f32 %v2575_v38, %v2302_v7 }
 0x396   : > { %2686 = vst [vmem:[%s4680_s10 + $0x68] sm:$0xf] %v2654_v54 }
 0x397   : > { %v2107_v47 = vpop.permute.xlu1 %2106 }
 0x398   : > { %v2235_v19 = vperm.slane %v2107_v47, %v4213_v25 }
 0x39a   : > { %v2305_v35 = vmul.f32 %v2235_v19, %v5225_v31 }
 0x39c   : > { %v2657_v4 = vadd.f32 %v2587_v51, %v2305_v35 }
 0x39e   : > { %2689 = vst [vmem:[%s4680_s10 + $0x74] sm:$0xf] %v2657_v4 }
 0x39f   : > { %v2463_v45 = vpop.permute.xlu1 %2462 }
 0x3a0   : > { %v2591_v33 = vperm.slane %v2463_v45, %v4213_v25 }
 0x3a2   : > { %v2658_v63 = vadd.f32 %v2591_v33, %v2306_v42 }
 0x3a4   : > { %2690 = vst [vmem:[%s4680_s10 + $0x78] sm:$0xf] %v2658_v63 }
 0x3a5   : > { %3038 = shalt.err (!%p3035_p13)
}
 0x3a6   : > { %s3099_s19 = smov 64   ;;  %s3100_s10 = smov 4  }
 0x3a7   : > { %2848 = dma.vmem_to_hbm [thread:$0]  (%p3172_p9), %s2708_s18, 2048, %s2710_s23, %s2693_s15, %s3099_s19, %s3099_s19, %s3100_s10  }
 0x3a8 PF: > { %s2724_s7 = sand.u32 1, %s3073_s12   ;;  %p2855_p0 = pnand %p2828_p12, %p3179_p11 }
 0x3a9   : > { %s2725_s8 = scalar_lea.sflag [#allocation4], %s2724_s7 }
 0x3aa   : > { %p2856_p1 = pneg %p2855_p0 }
 0x3ac   : > { %3068 = dma.done.wait (%p2856_p1), %s2725_s8, 2048  }
 0x3ad   : > { %3070 = vsyncadd (%p2856_p1), %s2725_s8, 4294965248  ;;  %s19_s17 = sadd.s32 1, %s3093_s17   ;;  %s5227_s12 = smov %s3077_s13 }
 0x3ae   : > { %p16_p2 = scmp.ge.s32.totalorder %s19_s17, 4   ;;  %s5228_s13 = smov %s3081_s14 }
 0x3af   : > { %s5229_s14 = smov %s3177_s26  ;;  %s5230_s15 = smov %s3089_s16 }
 0x3b0   : > { %s5231_s16 = smov %s5233_s20  ;;  %18 = sbr.rel (!%p16_p2) target bundleno = 6 (0x6), region = 85 }
 0x3b5   :  { %2731 = vsyncpa [#allocation3], 1 }
 0x3b6   :  { %2733 = vsyncpa [#allocation3 + $0x1], 1 }
 0x3b7   :  { %2734 = vsyncpa [#allocation4], 1 }
 0x3b8   :  { %2736 = vsyncpa [#allocation4 + $0x1], 1 }

</bundles_post_ra>
